<compile_context>
chip_gen: v7x
topology: tpu7x:2x2x1
jax: 0.10.0
libtpu: 0.0.40
codegen_flags: <defaults>
</compile_context>

<pallas_src>
import functools

import jax
import jax.numpy as jnp
import numpy as np
from jax.experimental import pallas as pl
from jax.experimental.pallas import tpu as pltpu


def _round_up(x, m):
    return (x + m - 1) // m * m


def _cdiv(a, b):
    return (a + b - 1) // b


# ----------------------------- Pallas kernel ------------------------------ #

def _conv_bn_act_kernel(x_ref, w_ref, b_ref, *rest, kh, kw, th, out_w,
                        apply_relu, has_res, row_align):
    """One (batch, row-tile) grid step of a stride-1 valid KHxKW conv.

    x_ref    : (1, Hp, Wp, Cin)      whole padded image (bf16), VMEM resident
    w_ref    : (kh*kw, Cin, Cout)    per-tap weights, BN scale pre-folded (bf16)
    b_ref    : (1, Cout)             folded BN bias (f32)
    rsrc_ref : (1, th*out_w, Cin_sc) optional shortcut source (bf16)
    rw_ref   : (Cin_sc, Cout)        optional shortcut 1x1 weight (bf16)
    rb_ref   : (1, Cout)             optional shortcut bias (f32)
    o_ref    : (1, th*out_w, Cout)
    """
    if has_res:
        rsrc_ref, rw_ref, rb_ref, o_ref = rest
    else:
        (o_ref,) = rest

    cin = x_ref.shape[-1]
    cout = o_ref.shape[-1]
    m = th * out_w

    row0 = pl.program_id(1) * th
    if row_align > 1:
        row0 = pl.multiple_of(row0, row_align)

    # Accumulator starts at the folded BN bias (broadcast over rows).
    acc = jnp.broadcast_to(b_ref[...], (m, cout)).astype(jnp.float32)
    for di in range(kh):                       # static, fully unrolled (<= 9 taps)
        for dj in range(kw):
            win = x_ref[0, pl.ds(row0 + di, th), pl.ds(dj, out_w), :]
            win = win.reshape(m, cin)
            acc = acc + jnp.dot(win, w_ref[di * kw + dj],
                                preferred_element_type=jnp.float32)

    if has_res:                                # fused shortcut: 1x1 matmul + bias
        res = jnp.dot(rsrc_ref[0], rw_ref[...],
                      preferred_element_type=jnp.float32) + rb_ref[...]
        acc = acc + res
    if apply_relu:
        acc = jnp.maximum(acc, 0.0)
    o_ref[0] = acc.astype(o_ref.dtype)


def _fused_conv(x_img, w_taps, bias, *, kh, kw, th, nt, out_w,
                res_src=None, res_w=None, res_b=None, relu=False,
                out_dtype=jnp.bfloat16):
    """Fused stride-1 valid conv + BN bias (+fused 1x1 shortcut) (+ReLU).

    Returns (N, nt*th*out_w, Cout) with the spatial dims flattened row-major.
    """
    N, Hp, Wp, Cin = x_img.shape
    T, Cin_w, Cout = w_taps.shape
    assert T == kh * kw and Cin_w == Cin
    assert Hp >= nt * th + kh - 1 and Wp >= out_w + kw - 1
    m = th * out_w
    has_res = res_src is not None

    in_specs = [
        pl.BlockSpec((1, Hp, Wp, Cin), lambda n, r: (n, 0, 0, 0)),   # re-DMA only on n
        pl.BlockSpec((T, Cin, Cout), lambda n, r: (0, 0, 0)),        # weights resident
        pl.BlockSpec((1, Cout), lambda n, r: (0, 0)),
    ]
    args = [x_img, w_taps, bias]
    if has_res:
        cin_sc = res_src.shape[-1]
        in_specs += [
            pl.BlockSpec((1, m, cin_sc), lambda n, r: (n, r, 0)),
            pl.BlockSpec((cin_sc, Cout), lambda n, r: (0, 0)),
            pl.BlockSpec((1, Cout), lambda n, r: (0, 0)),
        ]
        args += [res_src, res_w, res_b]

    kernel = functools.partial(
        _conv_bn_act_kernel, kh=kh, kw=kw, th=th, out_w=out_w,
        apply_relu=relu, has_res=has_res,
        row_align=8 if th % 8 == 0 else 1)

    return pl.pallas_call(
        kernel,
        out_shape=jax.ShapeDtypeStruct((N, nt * m, Cout), out_dtype),
        grid_spec=pltpu.PrefetchScalarGridSpec(
            num_scalar_prefetch=0,
            grid=(N, nt),
            in_specs=in_specs,
            out_specs=pl.BlockSpec((1, m, Cout), lambda n, r: (n, r, 0)),
        ),
        compiler_params=pltpu.CompilerParams(
            dimension_semantics=("parallel", "parallel"),
            vmem_limit_bytes=48 * 1024 * 1024,   # > default scoped limit, safe on v7x
        ),
    )(*args)


# ------------------------------- JAX glue --------------------------------- #

def _bn_fold(gamma, beta, mean, var, eps=1e-5):
    scale = gamma / jnp.sqrt(var + eps)
    return scale, beta - mean * scale


def _space_to_depth2(x):
    n, h, w, c = x.shape
    x = x.reshape(n, h // 2, 2, w // 2, 2, c)
    x = jnp.transpose(x, (0, 1, 3, 2, 4, 5))
    return x.reshape(n, h // 2, w // 2, 4 * c)


def _conv3x3_taps(w_oihw):
    """(Cout, Cin, 3, 3) -> (9, Cin, Cout), tap = 3*di + dj."""
    cout, cin = w_oihw.shape[:2]
    return jnp.transpose(w_oihw, (2, 3, 1, 0)).reshape(9, cin, cout)


def _conv3x3_s2d_taps(w_oihw):
    """Stride-2 3x3 conv -> stride-1 2x2 conv over a space-to-depth(2) input.

    Returns (4, 4*Cin, Cout); tap = 2*da + db, channel = (p*2+q)*Cin + c holds
    the original weight at (di, dj) = (2*da+p, 2*db+q) (zero where di/dj > 2).
    """
    cout, cin = w_oihw.shape[:2]
    w = jnp.zeros((2, 2, 2, 2, cin, cout), w_oihw.dtype)
    for da in range(2):
        for p in range(2):
            di = 2 * da + p
            if di > 2:
                continue
            for db in range(2):
                for q in range(2):
                    dj = 2 * db + q
                    if dj > 2:
                        continue
                    w = w.at[da, db, p, q].set(jnp.transpose(w_oihw[:, :, di, dj]))
    return w.reshape(4, 4 * cin, cout)


def _prep_w_b(w_taps, scale, bias, cout_pad, cin_pad=None):
    """Fold the BN scale into the weight, pad to lane-dense channel counts."""
    t, cin, cout = w_taps.shape
    w = w_taps * scale[None, None, :]
    if cin_pad is not None and cin_pad > cin:
        w = jnp.pad(w, ((0, 0), (0, cin_pad - cin), (0, 0)))
    w = jnp.pad(w, ((0, 0), (0, 0), (0, cout_pad - cout))).astype(jnp.bfloat16)
    b = jnp.pad(bias, (0, cout_pad - cout)).reshape(1, cout_pad).astype(jnp.float32)
    return w, b


def init_basic_block(key, in_planes, planes, stride=1):
    ks = jax.random.split(key, 9)
    p = {
        "stride": stride,
        "downsample": (stride != 1 or in_planes != planes),
        "conv1_w": 0.1 * jax.random.normal(ks[0], (planes, in_planes, 3, 3), jnp.float32),
        "conv2_w": 0.1 * jax.random.normal(ks[1], (planes, planes, 3, 3), jnp.float32),
        "bn1": dict(gamma=jax.random.uniform(ks[2], (planes,), minval=0.5, maxval=1.5),
                    beta=0.1 * jax.random.normal(ks[3], (planes,)),
                    mean=0.1 * jax.random.normal(ks[4], (planes,)),
                    var=jax.random.uniform(ks[5], (planes,), minval=0.5, maxval=1.5)),
        "bn2": dict(gamma=jax.random.uniform(ks[6], (planes,), minval=0.5, maxval=1.5),
                    beta=0.1 * jax.random.normal(ks[7], (planes,)),
                    mean=jnp.zeros((planes,)),
                    var=jnp.ones((planes,))),
    }
    if p["downsample"]:
        p["convs_w"] = 0.1 * jax.random.normal(ks[8], (planes, in_planes, 1, 1), jnp.float32)
        p["bns"] = dict(gamma=jnp.ones((planes,)), beta=jnp.zeros((planes,)),
                        mean=jnp.zeros((planes,)), var=jnp.ones((planes,)))
    return p


def basic_block_forward(params, x_nchw):
    x = jnp.transpose(x_nchw, (0, 2, 3, 1)).astype(jnp.float32)      # NHWC
    N, H, W, Cin = x.shape
    stride = int(params["stride"])
    planes = params["conv1_w"].shape[0]

    Ho = (H + 2 - 3) // stride + 1
    Wo = (W + 2 - 3) // stride + 1
    Cp = _round_up(planes, 128)                  # lane-dense output channels

    # Row tiling of the (Ho, Wo) output: ~1k rows of the implicit (rows*Wo, C)
    # matmul per grid step; padded height is an exact multiple of the tile.
    th = min(Ho, max(1, 1024 // max(Wo, 1)))
    nt = _cdiv(Ho, th)
    th = _cdiv(Ho, nt)
    if nt > 1:
        th = _round_up(th, 8)                    # keep out-block sublanes aligned
        nt = _cdiv(Ho, th)
    Hp_out = nt * th                             # padded output height

    # ---------------- conv1 + bn1 + ReLU ---------------- #
    s1, b1 = _bn_fold(**params["bn1"])
    if stride == 1:
        x1 = jnp.pad(x, ((0, 0), (1, Hp_out + 1 - H), (1, 1), (0, 0)))
        w1 = _conv3x3_taps(params["conv1_w"])
        kh1 = kw1 = 3
    else:                                        # stride 2 via space-to-depth
        xp = jnp.pad(x, ((0, 0), (1, 1), (1, 1), (0, 0)))
        He, We = 2 * (Hp_out + 1), 2 * (Wo + 1)
        xp = jnp.pad(xp, ((0, 0), (0, He - (H + 2)), (0, We - (W + 2)), (0, 0)))
        x1 = _space_to_depth2(xp)
        w1 = _conv3x3_s2d_taps(params["conv1_w"])
        kh1 = kw1 = 2
    w1, b1 = _prep_w_b(w1, s1, b1, Cp)
    out1 = _fused_conv(x1.astype(jnp.bfloat16), w1, b1, kh=kh1, kw=kw1,
                       th=th, nt=nt, out_w=Wo, relu=True,
                       out_dtype=jnp.bfloat16)           # (N, Hp_out*Wo, Cp)

    # ---------------- shortcut source (fused into conv2 epilogue) ---------- #
    if params["downsample"]:
        rs = x[:, ::stride, ::stride, :]                 # (N, Ho, Wo, Cin)
        rs = jnp.pad(rs, ((0, 0), (0, Hp_out - rs.shape[1]), (0, 0), (0, 0)))
        ss, bs = _bn_fold(**params["bns"])
        rw = jnp.transpose(params["convs_w"][:, :, 0, 0]) * ss[None, :]   # (Cin, planes)
        rw = jnp.pad(rw, ((0, 0), (0, Cp - planes))).astype(jnp.bfloat16)
        rb = jnp.pad(bs, (0, Cp - planes)).reshape(1, Cp).astype(jnp.float32)
    else:
        rs = jnp.pad(x, ((0, 0), (0, Hp_out - H), (0, 0), (0, 0)))
        rw = jnp.pad(jnp.eye(Cin, dtype=jnp.float32),
                     ((0, 0), (0, Cp - Cin))).astype(jnp.bfloat16)
        rb = jnp.zeros((1, Cp), jnp.float32)
    res_src = rs.reshape(N, Hp_out * Wo, Cin).astype(jnp.bfloat16)

    # -------- conv2 + bn2 + shortcut(1x1 matmul) + residual + ReLU (fused) -- #
    s2, b2 = _bn_fold(**params["bn2"])
    w2, b2 = _prep_w_b(_conv3x3_taps(params["conv2_w"]), s2, b2, Cp, cin_pad=Cp)
    out1_img = out1.reshape(N, Hp_out, Wo, Cp)[:, :Ho]   # drop padded rows
    x2 = jnp.pad(out1_img, ((0, 0), (1, Hp_out + 1 - Ho), (1, 1), (0, 0)))
    out2 = _fused_conv(x2, w2, b2, kh=3, kw=3, th=th, nt=nt, out_w=Wo,
                       res_src=res_src, res_w=rw, res_b=rb,
                       relu=True, out_dtype=jnp.float32)

    out = out2.reshape(N, Hp_out, Wo, Cp)[:, :Ho, :, :planes]
    return jnp.transpose(out, (0, 3, 1, 2))              # NCHW


# ------------------------- pure-JAX reference (check) ---------------------- #

def reference_forward(params, x_nchw):
    def conv(x, w, stride, pad):
        return jax.lax.conv_general_dilated(
            x, w, (stride, stride), [(pad, pad), (pad, pad)],
            dimension_numbers=("NCHW", "OIHW", "NCHW"))

    def bn(x, bp):
        s, b = _bn_fold(**bp)
        return x * s[None, :, None, None] + b[None, :, None, None]

    stride = params["stride"]
    out = jax.nn.relu(bn(conv(x_nchw, params["conv1_w"], stride, 1), params["bn1"]))
    out = bn(conv(out, params["conv2_w"], 1, 1), params["bn2"])
    if params["downsample"]:
        sc = bn(conv(x_nchw, params["convs_w"], stride, 0), params["bns"])
    else:
        sc = x_nchw
    return jax.nn.relu(out + sc)


# ---------------------------------- main ----------------------------------- #

if __name__ == "__main__":
    key = jax.random.PRNGKey(0)
    kx, kp1, kp2 = jax.random.split(key, 3)

    x1 = jax.random.normal(kx, (2, 8, 16, 16), jnp.float32)

    # Case 1: identity shortcut (stride=1, in_planes == planes)
    params1 = init_basic_block(kp1, in_planes=8, planes=8, stride=1)
    y1 = jax.block_until_ready(basic_block_forward(params1, x1))
    r1 = reference_forward(params1, x1)
    # bf16 activations/weights (f32 accumulation) -> loosened tolerances.
    np.testing.assert_allclose(np.asarray(y1), np.asarray(r1), rtol=2e-2, atol=8e-2)

    # Case 2: downsample shortcut (stride=2, channel expansion)
    params2 = init_basic_block(kp2, in_planes=8, planes=16, stride=2)
    y2 = jax.block_until_ready(basic_block_forward(params2, x1))
    r2 = reference_forward(params2, x1)
    np.testing.assert_allclose(np.asarray(y2), np.asarray(r2), rtol=2e-2, atol=8e-2)

    print("KERNEL_OK")
</pallas_src>

<mosaic_0001>
module attributes {stable_mosaic.version = 11 : i64} {
  func.func @_conv_bn_act_kernel(%arg0: i32, %arg1: i32, %arg2: memref<1x18x18x8xbf16, #tpu.memory_space<vmem>>, %arg3: memref<9x8x128xbf16, #tpu.memory_space<vmem>>, %arg4: memref<1x128xf32, #tpu.memory_space<vmem>>, %arg5: memref<1x256x128xbf16, #tpu.memory_space<vmem>>) attributes {dimension_semantics = [#tpu.dimension_semantics<parallel>, #tpu.dimension_semantics<parallel>], iteration_bounds = array<i64: 2, 1>, scalar_prefetch = 0 : i64, scratch_operands = 0 : i64, tpu.core_type = #tpu.core_type<tc>, window_params = [{transform_indices = @transform_0, window_bounds = array<i64: 1, 18, 18, 8>}, {pipeline_mode = #tpu.pipeline_mode<synchronous>, transform_indices = @transform_1, window_bounds = array<i64: 9, 8, 128>}, {pipeline_mode = #tpu.pipeline_mode<synchronous>, transform_indices = @transform_2, window_bounds = array<i64: 1, 128>}, {transform_indices = @transform_3, window_bounds = array<i64: 1, 256, 128>}]} {
    %c16_i32 = arith.constant 16 : i32
    %0 = arith.muli %arg1, %c16_i32 : i32
    %1 = tpu.assume_multiple %0, 8 : i32
    %c0 = arith.constant 0 : index
    %c0_0 = arith.constant 0 : index
    %2 = vector.load %arg4[%c0, %c0_0] : memref<1x128xf32, #tpu.memory_space<vmem>>, vector<1x128xf32>
    %3 = vector.shape_cast %2 : vector<1x128xf32> to vector<1x128xf32>
    %4 = vector.broadcast %3 : vector<1x128xf32> to vector<256x128xf32>
    %c0_i32 = arith.constant 0 : i32
    %5 = arith.addi %1, %c0_i32 : i32
    %c0_1 = arith.constant 0 : index
    %6 = arith.index_cast %5 : i32 to index
    %c0_2 = arith.constant 0 : index
    %c0_3 = arith.constant 0 : index
    %7 = vector.load %arg2[%c0_1, %6, %c0_2, %c0_3] : memref<1x18x18x8xbf16, #tpu.memory_space<vmem>>, vector<1x16x16x8xbf16>
    %8 = vector.shape_cast %7 : vector<1x16x16x8xbf16> to vector<16x16x8xbf16>
    %9 = vector.shape_cast %8 : vector<16x16x8xbf16> to vector<256x8xbf16>
    %c0_4 = arith.constant 0 : index
    %c0_5 = arith.constant 0 : index
    %c0_6 = arith.constant 0 : index
    %10 = vector.load %arg3[%c0_4, %c0_5, %c0_6] : memref<9x8x128xbf16, #tpu.memory_space<vmem>>, vector<1x8x128xbf16>
    %11 = vector.shape_cast %10 : vector<1x8x128xbf16> to vector<8x128xbf16>
    %cst = arith.constant dense<0.000000e+00> : vector<256x128xf32>
    %12 = tpu.matmul %9, %11, %cst {dimension_numbers = #tpu.dot_dimension_numbers<[1], [0], [0], [1], [0, 0, 1, 1], [], []>} : vector<256x8xbf16>, vector<8x128xbf16>, vector<256x128xf32> -> vector<256x128xf32>
    %13 = arith.addf %4, %12 : vector<256x128xf32>
    %c0_i32_7 = arith.constant 0 : i32
    %14 = arith.addi %1, %c0_i32_7 : i32
    %c0_8 = arith.constant 0 : index
    %15 = arith.index_cast %14 : i32 to index
    %c1 = arith.constant 1 : index
    %c0_9 = arith.constant 0 : index
    %16 = vector.load %arg2[%c0_8, %15, %c1, %c0_9] : memref<1x18x18x8xbf16, #tpu.memory_space<vmem>>, vector<1x16x16x8xbf16>
    %17 = vector.shape_cast %16 : vector<1x16x16x8xbf16> to vector<16x16x8xbf16>
    %18 = vector.shape_cast %17 : vector<16x16x8xbf16> to vector<256x8xbf16>
    %c1_10 = arith.constant 1 : index
    %c0_11 = arith.constant 0 : index
    %c0_12 = arith.constant 0 : index
    %19 = vector.load %arg3[%c1_10, %c0_11, %c0_12] : memref<9x8x128xbf16, #tpu.memory_space<vmem>>, vector<1x8x128xbf16>
    %20 = vector.shape_cast %19 : vector<1x8x128xbf16> to vector<8x128xbf16>
    %cst_13 = arith.constant dense<0.000000e+00> : vector<256x128xf32>
    %21 = tpu.matmul %18, %20, %cst_13 {dimension_numbers = #tpu.dot_dimension_numbers<[1], [0], [0], [1], [0, 0, 1, 1], [], []>} : vector<256x8xbf16>, vector<8x128xbf16>, vector<256x128xf32> -> vector<256x128xf32>
    %22 = arith.addf %13, %21 : vector<256x128xf32>
    %c0_i32_14 = arith.constant 0 : i32
    %23 = arith.addi %1, %c0_i32_14 : i32
    %c0_15 = arith.constant 0 : index
    %24 = arith.index_cast %23 : i32 to index
    %c2 = arith.constant 2 : index
    %c0_16 = arith.constant 0 : index
    %25 = vector.load %arg2[%c0_15, %24, %c2, %c0_16] : memref<1x18x18x8xbf16, #tpu.memory_space<vmem>>, vector<1x16x16x8xbf16>
    %26 = vector.shape_cast %25 : vector<1x16x16x8xbf16> to vector<16x16x8xbf16>
    %27 = vector.shape_cast %26 : vector<16x16x8xbf16> to vector<256x8xbf16>
    %c2_17 = arith.constant 2 : index
    %c0_18 = arith.constant 0 : index
    %c0_19 = arith.constant 0 : index
    %28 = vector.load %arg3[%c2_17, %c0_18, %c0_19] : memref<9x8x128xbf16, #tpu.memory_space<vmem>>, vector<1x8x128xbf16>
    %29 = vector.shape_cast %28 : vector<1x8x128xbf16> to vector<8x128xbf16>
    %cst_20 = arith.constant dense<0.000000e+00> : vector<256x128xf32>
    %30 = tpu.matmul %27, %29, %cst_20 {dimension_numbers = #tpu.dot_dimension_numbers<[1], [0], [0], [1], [0, 0, 1, 1], [], []>} : vector<256x8xbf16>, vector<8x128xbf16>, vector<256x128xf32> -> vector<256x128xf32>
    %31 = arith.addf %22, %30 : vector<256x128xf32>
    %c1_i32 = arith.constant 1 : i32
    %32 = arith.addi %1, %c1_i32 : i32
    %c0_21 = arith.constant 0 : index
    %33 = arith.index_cast %32 : i32 to index
    %c0_22 = arith.constant 0 : index
    %c0_23 = arith.constant 0 : index
    %34 = vector.load %arg2[%c0_21, %33, %c0_22, %c0_23] : memref<1x18x18x8xbf16, #tpu.memory_space<vmem>>, vector<1x16x16x8xbf16>
    %35 = vector.shape_cast %34 : vector<1x16x16x8xbf16> to vector<16x16x8xbf16>
    %36 = vector.shape_cast %35 : vector<16x16x8xbf16> to vector<256x8xbf16>
    %c3 = arith.constant 3 : index
    %c0_24 = arith.constant 0 : index
    %c0_25 = arith.constant 0 : index
    %37 = vector.load %arg3[%c3, %c0_24, %c0_25] : memref<9x8x128xbf16, #tpu.memory_space<vmem>>, vector<1x8x128xbf16>
    %38 = vector.shape_cast %37 : vector<1x8x128xbf16> to vector<8x128xbf16>
    %cst_26 = arith.constant dense<0.000000e+00> : vector<256x128xf32>
    %39 = tpu.matmul %36, %38, %cst_26 {dimension_numbers = #tpu.dot_dimension_numbers<[1], [0], [0], [1], [0, 0, 1, 1], [], []>} : vector<256x8xbf16>, vector<8x128xbf16>, vector<256x128xf32> -> vector<256x128xf32>
    %40 = arith.addf %31, %39 : vector<256x128xf32>
    %c1_i32_27 = arith.constant 1 : i32
    %41 = arith.addi %1, %c1_i32_27 : i32
    %c0_28 = arith.constant 0 : index
    %42 = arith.index_cast %41 : i32 to index
    %c1_29 = arith.constant 1 : index
    %c0_30 = arith.constant 0 : index
    %43 = vector.load %arg2[%c0_28, %42, %c1_29, %c0_30] : memref<1x18x18x8xbf16, #tpu.memory_space<vmem>>, vector<1x16x16x8xbf16>
    %44 = vector.shape_cast %43 : vector<1x16x16x8xbf16> to vector<16x16x8xbf16>
    %45 = vector.shape_cast %44 : vector<16x16x8xbf16> to vector<256x8xbf16>
    %c4 = arith.constant 4 : index
    %c0_31 = arith.constant 0 : index
    %c0_32 = arith.constant 0 : index
    %46 = vector.load %arg3[%c4, %c0_31, %c0_32] : memref<9x8x128xbf16, #tpu.memory_space<vmem>>, vector<1x8x128xbf16>
    %47 = vector.shape_cast %46 : vector<1x8x128xbf16> to vector<8x128xbf16>
    %cst_33 = arith.constant dense<0.000000e+00> : vector<256x128xf32>
    %48 = tpu.matmul %45, %47, %cst_33 {dimension_numbers = #tpu.dot_dimension_numbers<[1], [0], [0], [1], [0, 0, 1, 1], [], []>} : vector<256x8xbf16>, vector<8x128xbf16>, vector<256x128xf32> -> vector<256x128xf32>
    %49 = arith.addf %40, %48 : vector<256x128xf32>
    %c1_i32_34 = arith.constant 1 : i32
    %50 = arith.addi %1, %c1_i32_34 : i32
    %c0_35 = arith.constant 0 : index
    %51 = arith.index_cast %50 : i32 to index
    %c2_36 = arith.constant 2 : index
    %c0_37 = arith.constant 0 : index
    %52 = vector.load %arg2[%c0_35, %51, %c2_36, %c0_37] : memref<1x18x18x8xbf16, #tpu.memory_space<vmem>>, vector<1x16x16x8xbf16>
    %53 = vector.shape_cast %52 : vector<1x16x16x8xbf16> to vector<16x16x8xbf16>
    %54 = vector.shape_cast %53 : vector<16x16x8xbf16> to vector<256x8xbf16>
    %c5 = arith.constant 5 : index
    %c0_38 = arith.constant 0 : index
    %c0_39 = arith.constant 0 : index
    %55 = vector.load %arg3[%c5, %c0_38, %c0_39] : memref<9x8x128xbf16, #tpu.memory_space<vmem>>, vector<1x8x128xbf16>
    %56 = vector.shape_cast %55 : vector<1x8x128xbf16> to vector<8x128xbf16>
    %cst_40 = arith.constant dense<0.000000e+00> : vector<256x128xf32>
    %57 = tpu.matmul %54, %56, %cst_40 {dimension_numbers = #tpu.dot_dimension_numbers<[1], [0], [0], [1], [0, 0, 1, 1], [], []>} : vector<256x8xbf16>, vector<8x128xbf16>, vector<256x128xf32> -> vector<256x128xf32>
    %58 = arith.addf %49, %57 : vector<256x128xf32>
    %c2_i32 = arith.constant 2 : i32
    %59 = arith.addi %1, %c2_i32 : i32
    %c0_41 = arith.constant 0 : index
    %60 = arith.index_cast %59 : i32 to index
    %c0_42 = arith.constant 0 : index
    %c0_43 = arith.constant 0 : index
    %61 = vector.load %arg2[%c0_41, %60, %c0_42, %c0_43] : memref<1x18x18x8xbf16, #tpu.memory_space<vmem>>, vector<1x16x16x8xbf16>
    %62 = vector.shape_cast %61 : vector<1x16x16x8xbf16> to vector<16x16x8xbf16>
    %63 = vector.shape_cast %62 : vector<16x16x8xbf16> to vector<256x8xbf16>
    %c6 = arith.constant 6 : index
    %c0_44 = arith.constant 0 : index
    %c0_45 = arith.constant 0 : index
    %64 = vector.load %arg3[%c6, %c0_44, %c0_45] : memref<9x8x128xbf16, #tpu.memory_space<vmem>>, vector<1x8x128xbf16>
    %65 = vector.shape_cast %64 : vector<1x8x128xbf16> to vector<8x128xbf16>
    %cst_46 = arith.constant dense<0.000000e+00> : vector<256x128xf32>
    %66 = tpu.matmul %63, %65, %cst_46 {dimension_numbers = #tpu.dot_dimension_numbers<[1], [0], [0], [1], [0, 0, 1, 1], [], []>} : vector<256x8xbf16>, vector<8x128xbf16>, vector<256x128xf32> -> vector<256x128xf32>
    %67 = arith.addf %58, %66 : vector<256x128xf32>
    %c2_i32_47 = arith.constant 2 : i32
    %68 = arith.addi %1, %c2_i32_47 : i32
    %c0_48 = arith.constant 0 : index
    %69 = arith.index_cast %68 : i32 to index
    %c1_49 = arith.constant 1 : index
    %c0_50 = arith.constant 0 : index
    %70 = vector.load %arg2[%c0_48, %69, %c1_49, %c0_50] : memref<1x18x18x8xbf16, #tpu.memory_space<vmem>>, vector<1x16x16x8xbf16>
    %71 = vector.shape_cast %70 : vector<1x16x16x8xbf16> to vector<16x16x8xbf16>
    %72 = vector.shape_cast %71 : vector<16x16x8xbf16> to vector<256x8xbf16>
    %c7 = arith.constant 7 : index
    %c0_51 = arith.constant 0 : index
    %c0_52 = arith.constant 0 : index
    %73 = vector.load %arg3[%c7, %c0_51, %c0_52] : memref<9x8x128xbf16, #tpu.memory_space<vmem>>, vector<1x8x128xbf16>
    %74 = vector.shape_cast %73 : vector<1x8x128xbf16> to vector<8x128xbf16>
    %cst_53 = arith.constant dense<0.000000e+00> : vector<256x128xf32>
    %75 = tpu.matmul %72, %74, %cst_53 {dimension_numbers = #tpu.dot_dimension_numbers<[1], [0], [0], [1], [0, 0, 1, 1], [], []>} : vector<256x8xbf16>, vector<8x128xbf16>, vector<256x128xf32> -> vector<256x128xf32>
    %76 = arith.addf %67, %75 : vector<256x128xf32>
    %c2_i32_54 = arith.constant 2 : i32
    %77 = arith.addi %1, %c2_i32_54 : i32
    %c0_55 = arith.constant 0 : index
    %78 = arith.index_cast %77 : i32 to index
    %c2_56 = arith.constant 2 : index
    %c0_57 = arith.constant 0 : index
    %79 = vector.load %arg2[%c0_55, %78, %c2_56, %c0_57] : memref<1x18x18x8xbf16, #tpu.memory_space<vmem>>, vector<1x16x16x8xbf16>
    %80 = vector.shape_cast %79 : vector<1x16x16x8xbf16> to vector<16x16x8xbf16>
    %81 = vector.shape_cast %80 : vector<16x16x8xbf16> to vector<256x8xbf16>
    %c8 = arith.constant 8 : index
    %c0_58 = arith.constant 0 : index
    %c0_59 = arith.constant 0 : index
    %82 = vector.load %arg3[%c8, %c0_58, %c0_59] : memref<9x8x128xbf16, #tpu.memory_space<vmem>>, vector<1x8x128xbf16>
    %83 = vector.shape_cast %82 : vector<1x8x128xbf16> to vector<8x128xbf16>
    %cst_60 = arith.constant dense<0.000000e+00> : vector<256x128xf32>
    %84 = tpu.matmul %81, %83, %cst_60 {dimension_numbers = #tpu.dot_dimension_numbers<[1], [0], [0], [1], [0, 0, 1, 1], [], []>} : vector<256x8xbf16>, vector<8x128xbf16>, vector<256x128xf32> -> vector<256x128xf32>
    %85 = arith.addf %76, %84 : vector<256x128xf32>
    %cst_61 = arith.constant 0.000000e+00 : f32
    %86 = vector.broadcast %cst_61 : f32 to vector<256x128xf32>
    %87 = arith.maximumf %85, %86 : vector<256x128xf32>
    %88 = arith.truncf %87 : vector<256x128xf32> to vector<256x128xbf16>
    %c0_62 = arith.constant 0 : index
    %c0_63 = arith.constant 0 : index
    %c0_64 = arith.constant 0 : index
    %89 = vector.load %arg5[%c0_62, %c0_63, %c0_64] : memref<1x256x128xbf16, #tpu.memory_space<vmem>>, vector<1x256x128xbf16>
    %90 = vector.shape_cast %89 : vector<1x256x128xbf16> to vector<256x128xbf16>
    %91 = vector.shape_cast %88 : vector<256x128xbf16> to vector<1x256x128xbf16>
    tpu.vector_store %arg5[%c0_62, %c0_63, %c0_64], %91 {strides = array<i32>} : memref<1x256x128xbf16, #tpu.memory_space<vmem>>, vector<1x256x128xbf16>,
    return
  }
  func.func @transform_0(%arg0: i32, %arg1: i32) -> (i32, i32, i32, i32) {
    %c0_i32 = arith.constant 0 : i32
    %c0_i32_0 = arith.constant 0 : i32
    %c0_i32_1 = arith.constant 0 : i32
    %c0_i32_2 = arith.constant 0 : i32
    return %arg0, %c0_i32, %c0_i32_0, %c0_i32_1 : i32, i32, i32, i32
  }
  func.func @transform_1(%arg0: i32, %arg1: i32) -> (i32, i32, i32) {
    %c0_i32 = arith.constant 0 : i32
    %c0_i32_0 = arith.constant 0 : i32
    %c0_i32_1 = arith.constant 0 : i32
    %c0_i32_2 = arith.constant 0 : i32
    return %c0_i32, %c0_i32_0, %c0_i32_1 : i32, i32, i32
  }
  func.func @transform_2(%arg0: i32, %arg1: i32) -> (i32, i32) {
    %c0_i32 = arith.constant 0 : i32
    %c0_i32_0 = arith.constant 0 : i32
    %c0_i32_1 = arith.constant 0 : i32
    return %c0_i32, %c0_i32_0 : i32, i32
  }
  func.func @transform_3(%arg0: i32, %arg1: i32) -> (i32, i32, i32) {
    %c0_i32 = arith.constant 0 : i32
    %c0_i32_0 = arith.constant 0 : i32
    return %arg0, %arg1, %c0_i32 : i32, i32, i32
  }
}

</mosaic_0001>

<bundles_post_ra>
// kernel: tpu_custom_call.1
= control target key start
LH: loop header
LB: loop body
LE: loop exit
PB: predicated region body
PF: predicated region fallthrough
CT: control target
= control target key end

     0   :  { %8 = vsyncpa [#allocation3], 0  ;;  %s8604_s0 = inlined_call_operand.vmem [shape: bf16[2,18,18,8], index: 0, kind: input, shape index: {}]   ;;  %s8605_s1 = inlined_call_operand.vmem [shape: bf16[9,8,128], index: 1, kind: input, shape index: {}]   ;;  %s8606_s2 = inlined_call_operand.vmem [shape: f32[1,128], index: 2, kind: input, shape index: {}]   ;;  %s8607_s3 = inlined_call_operand.hbm [shape: bf16[2,256,128], index: 3, kind: output, shape index: {}]  }
   0x1   :  { %10 = vsyncpa [#allocation3 + $0x1], 0  ;;  %s6857_s12 = smov 0   ;;  %s6859_s13 = smov 0  }
   0x2   :  { %s6861_s14 = smov 0   ;;  %s6863_s15 = smov 0  }
   0x3   :  { %s6865_s16 = smov 0   ;;  %s6867_s17 = smov 0  }
   0x4 LB: > { %s5164_s18 = sadd.s32 4294967295, %s6832_s17   ;;  %s5165_s19 = sadd.s32 4294967294, %s6832_s17   ;;  %s6832_s17 = sphi %s6867_s17, %s16_s17   ;;  %s6828_s16 = sphi %s6865_s16, %s8620_s16   ;;  %s6824_s15 = sphi %s6863_s15, %s8619_s15   ;;  %s6820_s14 = sphi %s6861_s14, %s8618_s14   ;;  %s6816_s13 = sphi %s6859_s13, %s8617_s13   ;;  %s6812_s12 = sphi %s6857_s12, %s8616_s12  }
   0x5   : > { %s28_s20 = sadd.s32 1, %s6828_s16  ;;  %s105_s21 = sadd.s32 1, %s6820_s14 }
   0x6   : > { %p30_p0 = scmp.ge.s32.totalorder %s28_s20, 2  ;;  %p115_p1 = scmp.ne.s32.totalorder %s6820_s14, %s6816_s13 }
   0x7   : > { %p116_p2 = scmp.eq.s32.totalorder %s5164_s18, 1  ;;  %p121_p3 = scmp.ne.s32.totalorder %s6816_s13, %s6812_s12 }
   0x8   : > { %s8622_s20 = smov (%p30_p0, %s28_s20), 0  ;;  %p122_p5 = scmp.eq.s32.totalorder %s5165_s19, 1 }
   0x9   : > { %p6897_p4 = por %p116_p2, %p115_p1  ;;  %s100_s23 = ssub.s32 %s6828_s16, %s8622_s20 }
   0xa   : > { %p5168_p6 = scmp.ge.s32.totalorder %s6832_s17, 1  ;;  %p103_p7 = scmp.eq.s32.totalorder %s100_s23, 0 }
   0xb   : > { %p6904_p8 = por %p122_p5, %p121_p3  ;;  %p154_p9 = scmp.lt.s32.totalorder %s6832_s17, 3 }
   0xc   : > { %s6910_s25 = scalar_select %p103_p7, %s6820_s14, %s105_s21  }
   0xd   : > { %p155_p10 = pnand %p5168_p6, %p154_p9 }
   0xe   : > { %v228_v0 = vld [vmem:[%s8605_s1] sm:$0xf] (!%p155_p10)  ;;  %vm358_vm0 = vcmask (!%p155_p10), 1043456   ;;  %p178_p11 = scmp.lt.s32.totalorder (!%p155_p10), %s6824_s15, 1  ;;  %v5399_v2 = vld [vmem:[%s8605_s1 + $0x10] sm:$0xf] (!%p155_p10) }
   0xf   : > { %158 = sbr.rel (%p155_p10) target bundleno = 566 (0x236), region = 32  ;;  %6622 = vmatprep.subr.msk.bf16.mxu1 (!%p155_p10), %vm358_vm0, %v228_v0  ;;  %v360_v1 = vsel (!%p155_p10), %vm358_vm0, %v228_v0, 0  ;;  %v5204_v3 = vld [vmem:[%s8605_s1 + $0x4] sm:$0xf] (!%p155_p10)  ;;  %6626 = vmatprep.subr.msk.bf16.mxu0 (!%p155_p10), %vm358_vm0, %v5399_v2  ;;  %v6927_v4 = vsel (!%p155_p10), %vm358_vm0, %v5399_v2, 0  ;;  %vm309_vm1 = vcmask (!%p155_p10), 64512  }
  0x10   : > { %6027 = vmatpush3.bf16.msra.mxu1 (!%p155_p10), %v360_v1  ;;  %6163 = vmatpush3.bf16.msra.mxu0 (!%p155_p10), %v6927_v4  ;;  %v5464_v5 = vld [vmem:[%s8605_s1 + $0x14] sm:$0xf] (!%p155_p10)  ;;  %vm603_vm2 = vsmask.f32 (!%p155_p10), 3328  ;;  %vm604_vm3 = vsmask.f32 (!%p155_p10), 7440 }
  0x11   : > { %6623 = vmatprep.subr.msk.bf16.mxu1 (!%p155_p10), %vm358_vm0, %v5204_v3  ;;  %6628 = vmatprep.subr.msk.bf16.mxu0 (!%p155_p10), %vm358_vm0, %v5464_v5  ;;  %v6943_v6 = vld [vmem:[%s8605_s1 + $0x18] sm:$0xf] (!%p155_p10)  ;;  %v5253_v8 = vld [vmem:[%s8605_s1 + $0x8] sm:$0xf] (!%p155_p10)  ;;  %v1089_v10 = vsel (!%p155_p10), %vm358_vm0, %v5204_v3, 0  ;;  %v6955_v12 = vsel (!%p155_p10), %vm358_vm0, %v5464_v5, 0  ;;  %vm6995_vm4 = vmor (!%p155_p10), %vm603_vm2, %vm604_vm3 }
  0x12   : > { %v6959_v13 = vsel (!%p155_p10), %vm358_vm0, %v6943_v6, 0  ;;  %v6976_v22 = vld [vmem:[%s8605_s1 + $0x1c] sm:$0xf] (!%p155_p10)  ;;  %v6984_v27 = vsel (!%p155_p10), %vm358_vm0, %v5253_v8, 0  ;;  %vm1348_vm5 = vcmask (!%p155_p10), 1042432   ;;  %vm1349_vm6 = vcmask (!%p155_p10), 1046532  }
  0x13   : > { %v7002_v46 = vsel (!%p155_p10), %vm358_vm0, %v6976_v22, 0  ;;  %vm7122_vm7 = vmor (!%p155_p10), %vm1348_vm5, %vm1349_vm6  ;;  %s175_s9 = sand.u32 (!%p155_p10), 1, %s6816_s13   ;;  %s5777_s18 = sshll.u32 (!%p155_p10), %s6824_s15, 11 }
  0x14   : > { %s5169_s10 = sshll.u32 (!%p155_p10), %s175_s9, 7  ;;  %s8550_s26 = scalar_lea.hbm (!%p155_p10), %s8607_s3, %s5777_s18 }
  0x15   : > { %s6834_s28 = smov (!%p155_p10), [#allocation2]  }
  0x16   : > { %s179_s5 = scalar_select %p178_p11, %s6824_s15, 1 }
  0x17   : > { %s8558_s15 = scalar_lea.sflag [#allocation3], %s175_s9  ;;  %s6758_s29 = sshll.u32 %s6834_s28, 4  ;;  %s6759_s29 = int_to_ptr.vmem [resolvable:$false] %s6758_s29 }
  0x18   : > { %s6632_s8 = smul.u32 216, %s179_s5  ;;  %s6760_s30 = scalar_lea.vmem %s6759_s29, 4096 }
  0x1a   : > { %s6938_s11 = scalar_lea.vmem %s8604_s0, %s6632_s8 }
  0x1b   : > { %v6690_v7 = vld [vmem:[%s6938_s11] sm:$0xff]   ;;  %v6691_v9 = vld [vmem:[%s6938_s11 + $0xc] sm:$0xff]   ;;  %v6692_v11 = vld [vmem:[%s6938_s11 + $0x18] sm:$0xff]  }
  0x1c   : > { %6028 = vmatprep.mubr.msk.bf16.mxu1 %vm309_vm1, %v6690_v7  ;;  %v5351_v14 = vld [vmem:[%s6938_s11 + $0xc] sm:$0xf]  ;;  %v6964_v15 = vld [vmem:[%s6938_s11 + $0x10] sm:$0xf]  ;;  %v6967_v16 = vld [vmem:[%s6938_s11 + $0x14] sm:$0x1] }
  0x1d   : > { %6029 = vmatmul.mubr.msk.bf16.vlgmr.msra.gmra.mrb[0].mxu1 %vm309_vm1, %v6691_v9  ;;  %v2168_v17 = vshrl.u32 %v5351_v14, 16  ;;  %v2171_v18 = vshll.u32 %v5351_v14, 16  ;;  %v2177_v19 = vshll.u32 %v6964_v15, 16  ;;  %v2181_v20 = vshrl.u32 %v6964_v15, 16  ;;  %v5354_v21 = vld [vmem:[%s6938_s11 + $0x18] sm:$0xf] }
  0x1e   : > { %6032 = vmatprep.mubr.msk.bf16.mxu1 %vm309_vm1, %v6692_v11  ;;  %6061 = vmatpush3.bf16.msra.mxu1 %v1089_v10  ;;  %v6693_v23 = vld [vmem:[%s6938_s11 + $0x24] sm:$0xff]   ;;  %v2187_v24 = vshll.u32 %v6967_v16, 16  ;;  %v6981_v25 = vld [vmem:[%s6938_s11 + $0x1c] sm:$0xf]  ;;  %v2192_v26 = vshrl.u32 %v5354_v21, 16  ;;  %v2195_v35 = vshll.u32 %v5354_v21, 16 }
  0x1f   : > { %6624 = vmatprep.subr.msk.bf16.mxu1 %vm358_vm0, %v5253_v8  ;;  %v2170_v28 = vrot.slane %v2168_v17, 4  ;;  %v2173_v29 = vrot.slane %v2171_v18, 5  ;;  %v2179_v30 = vrot.slane %v2177_v19, 5  ;;  %v2183_v31 = vrot.slane %v2181_v20, 4  ;;  %v6987_v32 = vld [vmem:[%s6938_s11 + $0x20] sm:$0x1] }
  0x20   : > { %v2189_v33 = vrot.slane %v2187_v24, 5  ;;  %v2194_v34 = vrot.slane %v2192_v26, 4  ;;  %v2201_v36 = vshll.u32 %v6981_v25, 16  ;;  %v2205_v39 = vshrl.u32 %v6981_v25, 16  ;;  %v6694_v41 = vld [vmem:[%s6938_s11 + $0x30] sm:$0xff]   ;;  %v6695_v0 = vld [vmem:[%s6938_s11 + $0x3c] sm:$0xff]  }
  0x21   : > { %v2174_v37 = vor.u32 %v2173_v29, %v2170_v28  ;;  %v2184_v38 = vor.u32 %v2183_v31, %v2179_v30  ;;  %v2211_v40 = vshll.u32 %v6987_v32, 16  ;;  %v2911_v43 = vrot.slane %v6964_v15, 5  ;;  %v5357_v54 = vld [vmem:[%s6938_s11 + $0x24] sm:$0xf]  ;;  %v7010_v55 = vld [vmem:[%s6938_s11 + $0x28] sm:$0xf] }
  0x22   : > { %v2197_v44 = vrot.slane %v2195_v35, 5  ;;  %v2203_v45 = vrot.slane %v2201_v36, 5  ;;  %v2914_v49 = vrot.slane %v6967_v16, 5  ;;  %v2207_v50 = vrot.slane %v2205_v39, 4  ;;  %v7017_v59 = vld [vmem:[%s6938_s11 + $0x2c] sm:$0x1] }
  0x23   : > { %v2175_v47 = vrot.slane %v2174_v37, 4  ;;  %v2185_v48 = vrot.slane %v2184_v38, 4  ;;  %v2213_v52 = vrot.slane %v2211_v40, 5  ;;  %v2918_v53 = vrot.slane %v6981_v25, 5  ;;  %v5360_v61 = vld [vmem:[%s6938_s11 + $0x30] sm:$0xf] }
  0x24   : > { %v2198_v51 = vor.u32 %v2197_v44, %v2194_v34  ;;  %v2208_v58 = vor.u32 %v2207_v50, %v2203_v45  ;;  %v2216_v60 = vshrl.u32 %v5357_v54, 16  ;;  %v2219_v1 = vshll.u32 %v5357_v54, 16  ;;  %v7023_v3 = vld [vmem:[%s6938_s11 + $0x34] sm:$0xf]  ;;  %v7028_v10 = vld [vmem:[%s6938_s11 + $0x38] sm:$0x1] }
  0x25   : > { %6033 = vmatmul.mubr.msk.bf16.gmra.mrb[4].mxu1 %vm309_vm1, %v6693_v23  ;;  %v2180_v56 = vsel %vm6995_vm4, %v2175_v47, %v2179_v30  ;;  %v2190_v57 = vsel %vm6995_vm4, %v2185_v48, %v2189_v33  ;;  %v2225_v2 = vshll.u32 %v7010_v55, 16  ;;  %v2229_v8 = vshrl.u32 %v7010_v55, 16  ;;  %v6696_v19 = vld [vmem:[%s6938_s11 + $0x48] sm:$0xff]   ;;  %v5363_v36 = vld [vmem:[%s6938_s11 + $0x3c] sm:$0xf] }
  0x26   : > { %6036 = vmatprep.mubr.msk.bf16.mxu1 %vm309_vm1, %v6694_v41  ;;  %v5400_v62 = vcombine.low %v2180_v56, %v2190_v57  ;;  %v2199_v63 = vrot.slane %v2198_v51, 4  ;;  %v2209_v5 = vrot.slane %v2208_v58, 4  ;;  %v2218_v7 = vrot.slane %v2216_v60, 4  ;;  %v7049_v41 = vld [vmem:[%s6938_s11 + $0x40] sm:$0xf] }
  0x27   : > { %v2235_v9 = vshll.u32 %v7017_v59, 16  ;;  %v2221_v14 = vrot.slane %v2219_v1, 5  ;;  %v2227_v17 = vrot.slane %v2225_v2, 5  ;;  %v2240_v18 = vshrl.u32 %v5360_v61, 16  ;;  %v7053_v50 = vld [vmem:[%s6938_s11 + $0x44] sm:$0x1] }
  0x28   : > { %6164 = vmatprep.mubr.msk.bf16.mxu0 %vm309_vm1, %v5400_v62  ;;  %v2204_v11 = vsel %vm6995_vm4, %v2199_v63, %v2203_v45  ;;  %v2214_v20 = vsel %vm6995_vm4, %v2209_v5, %v2213_v52  ;;  %v2231_v21 = vrot.slane %v2229_v8, 4  ;;  %v2243_v24 = vshll.u32 %v5360_v61, 16  ;;  %v6697_v52 = vld [vmem:[%s6938_s11 + $0x54] sm:$0xff]   ;;  %v5366_v58 = vld [vmem:[%s6938_s11 + $0x48] sm:$0xf]  ;;  %v6698_v8 = vld [vmem:[%s6938_s11 + $0x60] sm:$0xff]  }
  0x29   : > { %v2237_v23 = vrot.slane %v2235_v9, 5  ;;  %v5401_v26 = vcombine.low %v2204_v11, %v2214_v20  ;;  %v2222_v28 = vor.u32 %v2221_v14, %v2218_v7  ;;  %v2242_v29 = vrot.slane %v2240_v18, 4  ;;  %v7066_v63 = vld [vmem:[%s6938_s11 + $0x4c] sm:$0xf]  ;;  %v7069_v7 = vld [vmem:[%s6938_s11 + $0x50] sm:$0x1] }
  0x2a   : > { %v2249_v30 = vshll.u32 %v7023_v3, 16  ;;  %v2232_v31 = vor.u32 %v2231_v21, %v2227_v17  ;;  %v2245_v33 = vrot.slane %v2243_v24, 5  ;;  %v2253_v34 = vshrl.u32 %v7023_v3, 16 }
  0x2b   : > { %v2259_v35 = vshll.u32 %v7028_v10, 16  ;;  %6165 = vmatmul.mubr.msk.bf16.vlgmr.msra.gmra.mrb[0].mxu0 %vm309_vm1, %v5401_v26  ;;  %v7044_v37 = vrot.slane %v2918_v53, 4  ;;  %v2921_v38 = vrot.slane %v6987_v32, 5  ;;  %v2223_v39 = vrot.slane %v2222_v28, 4  ;;  %v5369_v28 = vld [vmem:[%s6938_s11 + $0x54] sm:$0xf] }
  0x2c   : > { %v2251_v40 = vrot.slane %v2249_v30, 5  ;;  %6197 = vmatpush3.bf16.msra.mxu0 %v6955_v12  ;;  %v2233_v44 = vrot.slane %v2232_v31, 4  ;;  %v2246_v45 = vor.u32 %v2245_v33, %v2242_v29  ;;  %v2255_v47 = vrot.slane %v2253_v34, 4  ;;  %v7084_v34 = vld [vmem:[%s6938_s11 + $0x58] sm:$0xf] }
  0x2d   : > { %6037 = vmatmul.mubr.msk.bf16.gmra.mrb[8].mxu1 %vm309_vm1, %v6695_v0  ;;  %v2261_v48 = vrot.slane %v2259_v35, 5  ;;  %v2228_v51 = vsel %vm6995_vm4, %v2223_v39, %v2227_v17  ;;  %v2264_v54 = vshrl.u32 %v5363_v36, 16  ;;  %v2267_v56 = vshll.u32 %v5363_v36, 16  ;;  %6629 = vmatprep.subr.msk.bf16.mxu0 %vm358_vm0, %v6943_v6 }
  0x2e   : > { %6040 = vmatprep.mubr.msk.bf16.mxu1 %vm309_vm1, %v6696_v19  ;;  %v2273_v57 = vshll.u32 %v7049_v41, 16  ;;  %v2238_v12 = vsel %vm6995_vm4, %v2233_v44, %v2237_v23  ;;  %v2247_v60 = vrot.slane %v2246_v45, 4  ;;  %v2256_v61 = vor.u32 %v2255_v47, %v2251_v40  ;;  %v6699_v44 = vld [vmem:[%s6938_s11 + $0x6c] sm:$0xff]   ;;  %v7089_v45 = vld [vmem:[%s6938_s11 + $0x5c] sm:$0x1] }
  0x2f   : > { %v2277_v62 = vshrl.u32 %v7049_v41, 16  ;;  %v5402_v0 = vcombine.low %v2228_v51, %v2238_v12  ;;  %v2266_v1 = vrot.slane %v2264_v54, 4  ;;  %v2269_v2 = vrot.slane %v2267_v56, 5  ;;  %v5372_v54 = vld [vmem:[%s6938_s11 + $0x60] sm:$0xf] }
  0x30   : > { %v2275_v5 = vrot.slane %v2273_v57, 5  ;;  %v2252_v9 = vsel %vm6995_vm4, %v2247_v60, %v2251_v40  ;;  %v2257_v6 = vrot.slane %v2256_v61, 4  ;;  %v2283_v14 = vshll.u32 %v7053_v50, 16  ;;  %v7096_v56 = vld [vmem:[%s6938_s11 + $0x64] sm:$0xf] }
  0x31   : > { %v2279_v11 = vrot.slane %v2277_v62, 4  ;;  %6168 = vmatprep.mubr.msk.bf16.mxu0 %vm309_vm1, %v5402_v0  ;;  %v2270_v17 = vor.u32 %v2269_v2, %v2266_v1  ;;  %v2288_v18 = vshrl.u32 %v5366_v58, 16  ;;  %v2291_v19 = vshll.u32 %v5366_v58, 16  ;;  %v7102_v2 = vld [vmem:[%s6938_s11 + $0x68] sm:$0x1] }
  0x32   : > { %v2297_v20 = vshll.u32 %v7066_v63, 16  ;;  %v2262_v21 = vsel %vm6995_vm4, %v2257_v6, %v2261_v48  ;;  %v2285_v24 = vrot.slane %v2283_v14, 5  ;;  %v2301_v26 = vshrl.u32 %v7066_v63, 16 }
  0x33   : > { %v2280_v23 = vor.u32 %v2279_v11, %v2275_v5  ;;  %v5403_v29 = vcombine.low %v2252_v9, %v2262_v21  ;;  %v2271_v30 = vrot.slane %v2270_v17, 4  ;;  %v2290_v31 = vrot.slane %v2288_v18, 4  ;;  %v5433_v21 = vld [vmem:[%s6938_s11 + $0x18] sm:$0xe] }
  0x34   : > { %v2293_v33 = vrot.slane %v2291_v19, 5  ;;  %v2299_v36 = vrot.slane %v2297_v20, 5  ;;  %v2303_v39 = vrot.slane %v2301_v26, 4  ;;  %v2307_v40 = vshll.u32 %v7069_v7, 16  ;;  %v5432_v20 = vld [vmem:[%s6938_s11 + $0xc] sm:$0xe] }
  0x35   : > { %6041 = vmatmul.mubr.msk.bf16.gmra.mrb[12].mxu1 %vm309_vm1, %v6697_v52  ;;  %v2281_v35 = vrot.slane %v2280_v23, 4  ;;  %6169 = vmatmul.mubr.msk.bf16.gmra.mrb[4].mxu0 %vm309_vm1, %v5403_v29  ;;  %v2276_v47 = vsel %vm6995_vm4, %v2271_v30, %v2275_v5  ;;  %v2312_v51 = vshrl.u32 %v5369_v28, 16  ;;  %v2315_v52 = vshll.u32 %v5369_v28, 16  ;;  %v6700_v5 = vld [vmem:[%s6938_s11 + $0x78] sm:$0xff]  }
  0x36   : > { %6044 = vmatprep.mubr.msk.bf16.mxu1 %vm309_vm1, %v6698_v8  ;;  %v2294_v48 = vor.u32 %v2293_v33, %v2290_v31  ;;  %v2304_v58 = vor.u32 %v2303_v39, %v2299_v36  ;;  %v2309_v12 = vrot.slane %v2307_v40, 5  ;;  %v2321_v60 = vshll.u32 %v7084_v34, 16 }
  0x37   : > { %v2286_v57 = vsel %vm6995_vm4, %v2281_v35, %v2285_v24  ;;  %v2314_v0 = vrot.slane %v2312_v51, 4  ;;  %v2317_v1 = vrot.slane %v2315_v52, 5  ;;  %v2325_v6 = vshrl.u32 %v7084_v34, 16 }
  0x38   : > { %v5404_v61 = vcombine.low %v2276_v47, %v2286_v57  ;;  %v2295_v62 = vrot.slane %v2294_v48, 4  ;;  %v2305_v8 = vrot.slane %v2304_v58, 4  ;;  %v2323_v9 = vrot.slane %v2321_v60, 5  ;;  %v6702_v57 = vld [vmem:[%s6938_s11 + $0x90] sm:$0xff]   ;;  %v5434_v58 = vld [vmem:[%s6938_s11 + $0x24] sm:$0xe] }
  0x39   : > { %v2331_v11 = vshll.u32 %v7089_v45, 16  ;;  %v2318_v17 = vor.u32 %v2317_v1, %v2314_v0  ;;  %v2336_v18 = vshrl.u32 %v5372_v54, 16  ;;  %v2339_v19 = vshll.u32 %v5372_v54, 16  ;;  %v5435_v0 = vld [vmem:[%s6938_s11 + $0x30] sm:$0xe] }
  0x3a   : > { %6172 = vmatprep.mubr.msk.bf16.mxu0 %vm309_vm1, %v5404_v61  ;;  %v2300_v14 = vsel %vm6995_vm4, %v2295_v62, %v2299_v36  ;;  %v2310_v23 = vsel %vm6995_vm4, %v2305_v8, %v2309_v12  ;;  %v2327_v24 = vrot.slane %v2325_v6, 4  ;;  %v2345_v28 = vshll.u32 %v7096_v56, 16 }
  0x3b   : > { %v2333_v26 = vrot.slane %v2331_v11, 5  ;;  %v5405_v29 = vcombine.low %v2300_v14, %v2310_v23  ;;  %v2319_v30 = vrot.slane %v2318_v17, 4  ;;  %v2338_v31 = vrot.slane %v2336_v18, 4  ;;  %v5436_v14 = vld [vmem:[%s6938_s11 + $0x3c] sm:$0xe] }
  0x3c   : > { %v2341_v33 = vrot.slane %v2339_v19, 5  ;;  %v2328_v35 = vor.u32 %v2327_v24, %v2323_v9  ;;  %v2347_v36 = vrot.slane %v2345_v28, 5  ;;  %v2349_v39 = vshrl.u32 %v7096_v56, 16  ;;  %v555_v24 = vld [vmem:[%s6938_s11] sm:$0xf] }
  0x3d   : > { %6045 = vmatmul.mubr.msk.bf16.gmra.mrb[16].mxu1 %vm309_vm1, %v6699_v44  ;;  %v2355_v40 = vshll.u32 %v7102_v2, 16  ;;  %v6701_v44 = vld [vmem:[%s6938_s11 + $0x84] sm:$0xff]   ;;  %6173 = vmatmul.mubr.msk.bf16.gmra.mrb[8].mxu0 %vm309_vm1, %v5405_v29  ;;  %v2324_v48 = vsel %vm6995_vm4, %v2319_v30, %v2323_v9  ;;  %v5448_v52 = vrot.slane %v5432_v20, 9  ;;  %v2913_v54 = vrot.slane %v2911_v43, 4 }
  0x3e   : > { %6048 = vmatprep.mubr.msk.bf16.mxu1 %vm309_vm1, %v6700_v5  ;;  %v2342_v51 = vor.u32 %v2341_v33, %v2338_v31  ;;  %v2329_v12 = vrot.slane %v2328_v35, 4  ;;  %v2351_v60 = vrot.slane %v2349_v39, 4  ;;  %v5449_v62 = vrot.slane %v5433_v21, 9  ;;  %v5437_v20 = vld [vmem:[%s6938_s11 + $0x48] sm:$0xe]  ;;  %v6703_v31 = vld [vmem:[%s6938_s11 + $0x9c] sm:$0xff]  }
  0x3f   : > { %v2357_v61 = vrot.slane %v2355_v40, 5  ;;  %v7139_v5 = vsel %vm7122_vm7, %v7044_v37, %v2921_v38  ;;  %v5450_v8 = vrot.slane %v5434_v58, 9  ;;  %v2912_v11 = vsel %vm7122_vm7, %v5448_v52, %v2911_v43  ;;  %v556_v30 = vld [vmem:[%s6938_s11 + $0x4] sm:$0xf]  ;;  %v6704_v35 = vld [vmem:[%s6938_s11 + $0xa8] sm:$0xff]  }
  0x40   : > { %v2343_v1 = vrot.slane %v2342_v51, 4  ;;  %v2334_v9 = vsel %vm6995_vm4, %v2329_v12, %v2333_v26  ;;  %v2352_v6 = vor.u32 %v2351_v60, %v2347_v36  ;;  %v2915_v32 = vsel %vm7122_vm7, %v2913_v54, %v2914_v49  ;;  %v558_v52 = vld [vmem:[%s6938_s11 + $0xc] sm:$0xf]  ;;  %v7209_v60 = vld [vmem:[%s6938_s11 + $0x10] sm:$0xf] }
  0x41   : > { %v5406_v17 = vcombine.low %v2324_v48, %v2334_v9  ;;  %v7158_v38 = vsel %vm7122_vm7, %v5449_v62, %v2918_v53  ;;  %v2925_v15 = vrot.slane %v7010_v55, 5  ;;  %v2928_v16 = vrot.slane %v7017_v59, 5  ;;  %v7200_v48 = vld [vmem:[%s6938_s11 + $0x8] sm:$0x1] }
  0x42   : > { %v2348_v37 = vsel %vm6995_vm4, %v2343_v1, %v2347_v36  ;;  %v2353_v43 = vrot.slane %v2352_v6, 4  ;;  %v5451_v49 = vrot.slane %v5435_v0, 9  ;;  %v2932_v18 = vrot.slane %v7023_v3, 5 }
  0x43   : > { %6176 = vmatprep.mubr.msk.bf16.mxu0 %vm309_vm1, %v5406_v17  ;;  %v5465_v19 = vcombine.low %v2912_v11, %v2915_v32  ;;  %v2927_v25 = vrot.slane %v2925_v15, 4  ;;  %v2935_v53 = vrot.slane %v7028_v10, 5  ;;  %v5452_v55 = vrot.slane %v5436_v14, 9  ;;  %v7220_v11 = vld [vmem:[%s6938_s11 + $0x14] sm:$0x1] }
  0x44   : > { %v2358_v21 = vsel %vm6995_vm4, %v2353_v43, %v2357_v61  ;;  %v7172_v59 = vsel %vm7122_vm7, %v5450_v8, %v2925_v15  ;;  %v2934_v3 = vrot.slane %v2932_v18, 4  ;;  %v2939_v23 = vrot.slane %v7049_v41, 5  ;;  %v5438_v43 = vld [vmem:[%s6938_s11 + $0x54] sm:$0xe] }
  0x45   : > { %6049 = vmatmul.mubr.msk.bf16.gmra.mrb[20].mxu1 %vm309_vm1, %v6701_v44  ;;  %v5407_v26 = vcombine.low %v2348_v37, %v2358_v21  ;;  %v5466_v28 = vcombine.low %v7158_v38, %v7139_v5  ;;  %v2929_v10 = vsel %vm7122_vm7, %v2927_v25, %v2928_v16  ;;  %v2942_v29 = vrot.slane %v7053_v50, 5  ;;  %v6705_v25 = vld [vmem:[%s6938_s11 + $0xb4] sm:$0xff]  }
  0x46   : > { %6052 = vmatprep.mubr.msk.bf16.mxu1 %vm309_vm1, %v6702_v57  ;;  %v7185_v33 = vsel %vm7122_vm7, %v5451_v49, %v2932_v18  ;;  %v7189_v41 = vsel %vm7122_vm7, %v2934_v3, %v2935_v53  ;;  %v2941_v36 = vrot.slane %v2939_v23, 4  ;;  %v5453_v39 = vrot.slane %v5437_v20, 9 }
  0x47   : > { %6177 = vmatmul.mubr.msk.bf16.gmra.mrb[12].mxu0 %vm309_vm1, %v5407_v26  ;;  %v5467_v40 = vcombine.low %v7172_v59, %v2929_v10  ;;  %v7196_v50 = vsel %vm7122_vm7, %v5452_v55, %v2939_v23  ;;  %v2946_v44 = vrot.slane %v7066_v63, 5  ;;  %v607_v51 = vshrl.u32 %v555_v24, 16  ;;  %v5439_v59 = vld [vmem:[%s6938_s11 + $0x60] sm:$0xe]  ;;  %v561_v10 = vld [vmem:[%s6938_s11 + $0x18] sm:$0xf] }
  0x48   : > { %6198 = vmatprep.mubr.msk.bf16.mxu0 %vm309_vm1, %v5465_v19  ;;  %v7206_v54 = vsel %vm7122_vm7, %v2941_v36, %v2942_v29  ;;  %v610_v57 = vshll.u32 %v555_v24, 16  ;;  %v616_v58 = vshll.u32 %v556_v30, 16  ;;  %v620_v12 = vshrl.u32 %v556_v30, 16 }
  0x49   : > { %v5468_v61 = vcombine.low %v7185_v33, %v7189_v41  ;;  %v2948_v63 = vrot.slane %v2946_v44, 4  ;;  %v2949_v62 = vrot.slane %v7069_v7, 5  ;;  %v609_v0 = vrot.slane %v607_v51, 4  ;;  %v5376_v41 = vld [vmem:[%s6938_s11 + $0x70] sm:$0xf] }
  0x4a   : > { %v612_v1 = vrot.slane %v610_v57, 5  ;;  %v618_v5 = vrot.slane %v616_v58, 5  ;;  %v622_v8 = vrot.slane %v620_v12, 4  ;;  %v626_v9 = vshll.u32 %v7200_v48, 16  ;;  %v7259_v58 = vld [vmem:[%s6938_s11 + $0x20] sm:$0x1] }
  0x4b   : > { %v5469_v6 = vcombine.low %v7196_v50, %v7206_v54  ;;  %v631_v32 = vshrl.u32 %v558_v52, 16  ;;  %v634_v14 = vshll.u32 %v558_v52, 16  ;;  %v640_v7 = vshll.u32 %v7209_v60, 16 }
  0x4c   : > { %v7225_v17 = vsel %vm7122_vm7, %v5453_v39, %v2946_v44  ;;  %v613_v37 = vor.u32 %v612_v1, %v609_v0  ;;  %v623_v38 = vor.u32 %v622_v8, %v618_v5  ;;  %v628_v15 = vrot.slane %v626_v9, 5  ;;  %v564_v1 = vld [vmem:[%s6938_s11 + $0x24] sm:$0xf] }
  0x4d   : > { %6053 = vmatmul.mubr.msk.bf16.gmra.mrb[24].mxu1 %vm309_vm1, %v6703_v31  ;;  %v633_v16 = vrot.slane %v631_v32, 4  ;;  %v636_v49 = vrot.slane %v634_v14, 5  ;;  %v642_v18 = vrot.slane %v640_v7, 5  ;;  %v644_v19 = vshrl.u32 %v7209_v60, 16  ;;  %v7279_v14 = vld [vmem:[%s6938_s11 + $0x28] sm:$0xf] }
  0x4e   : > { %6056 = vmatprep.mubr.msk.bf16.mxu1 %vm309_vm1, %v6704_v35  ;;  %v7232_v53 = vsel %vm7122_vm7, %v2948_v63, %v2949_v62  ;;  %v614_v55 = vrot.slane %v613_v37, 4  ;;  %v624_v20 = vrot.slane %v623_v38, 4  ;;  %v650_v21 = vshll.u32 %v7220_v11, 16  ;;  %v7247_v35 = vld [vmem:[%s6938_s11 + $0x1c] sm:$0xf] }
  0x4f   : > { %6199 = vmatmul.mubr.msk.bf16.vlgmr.msra.gmra.mrb[0].mxu0 %vm309_vm1, %v5466_v28  ;;  %v637_v3 = vor.u32 %v636_v49, %v633_v16  ;;  %v646_v23 = vrot.slane %v644_v19, 4  ;;  %v5454_v24 = vrot.slane %v5438_v43, 9  ;;  %v2953_v26 = vrot.slane %v7084_v34, 5  ;;  %v5440_v19 = vld [vmem:[%s6938_s11 + $0x6c] sm:$0xe] }
  0x50   : > { %6231 = vmatpush3.bf16.msra.mxu0 %v6959_v13  ;;  %6202 = vmatprep.mubr.msk.bf16.mxu0 %vm309_vm1, %v5467_v40  ;;  %v619_v29 = vsel %vm6995_vm4, %v614_v55, %v618_v5  ;;  %v629_v30 = vsel %vm6995_vm4, %v624_v20, %v628_v15  ;;  %v652_v31 = vrot.slane %v650_v21, 5  ;;  %v2956_v28 = vrot.slane %v7089_v45, 5  ;;  %v7284_v15 = vld [vmem:[%s6938_s11 + $0x2c] sm:$0x1] }
  0x51   : > { %v5205_v36 = vcombine.low %v619_v29, %v629_v30  ;;  %v638_v39 = vrot.slane %v637_v3, 4  ;;  %v647_v34 = vor.u32 %v646_v23, %v642_v18  ;;  %v5455_v44 = vrot.slane %v5439_v59, 9  ;;  %6630 = vmatprep.subr.msk.bf16.mxu0 %vm358_vm0, %v6976_v22  ;;  %v5377_v23 = vld [vmem:[%s6938_s11 + $0x74] sm:$0x1] }
  0x52   : > { %v5470_v13 = vcombine.low %v7225_v17, %v7232_v53  ;;  %v2955_v40 = vrot.slane %v2953_v26, 4  ;;  %v2960_v51 = vrot.slane %v7096_v56, 5  ;;  %v655_v52 = vshrl.u32 %v561_v10, 16 }
  0x53   : > { %v643_v45 = vsel %vm6995_vm4, %v638_v39, %v642_v18  ;;  %v648_v57 = vrot.slane %v647_v34, 4  ;;  %v658_v22 = vshll.u32 %v561_v10, 16  ;;  %v664_v12 = vshll.u32 %v7247_v35, 16 }
  0x54   : > { %v7264_v63 = vsel %vm7122_vm7, %v5454_v24, %v2953_v26  ;;  %v7268_v56 = vsel %vm7122_vm7, %v2955_v40, %v2956_v28  ;;  %v2963_v62 = vrot.slane %v7102_v2, 5  ;;  %v657_v0 = vrot.slane %v655_v52, 4 }
  0x55   : > { %6057 = vmatmul.mubr.msk.bf16.gmra.mrb[28].mxu1 %vm309_vm1, %v6705_v25  ;;  %v653_v5 = vsel %vm6995_vm4, %v648_v57, %v652_v31  ;;  %v7276_v8 = vsel %vm7122_vm7, %v5455_v44, %v2960_v51  ;;  %v2962_v9 = vrot.slane %v2960_v51, 4  ;;  %v660_v32 = vrot.slane %v658_v22, 5  ;;  %v5379_v31 = vld [vmem:[%s6938_s11 + $0x7c] sm:$0xf] }
  0x56   : > { %6062 = vmatprep.mubr.msk.bf16.mxu1 %vm309_vm1, %v5205_v36  ;;  %v5206_v7 = vcombine.low %v643_v45, %v653_v5  ;;  %v666_v37 = vrot.slane %v664_v12, 5  ;;  %v668_v38 = vshrl.u32 %v7247_v35, 16  ;;  %v674_v2 = vshll.u32 %v7259_v58, 16  ;;  %v5441_v45 = vld [vmem:[%s6938_s11 + $0x78] sm:$0xe] }
  0x57   : > { %6203 = vmatmul.mubr.msk.bf16.gmra.mrb[4].mxu0 %vm309_vm1, %v5468_v61  ;;  %v5471_v43 = vcombine.low %v7264_v63, %v7268_v56  ;;  %v661_v16 = vor.u32 %v660_v32, %v657_v0  ;;  %v679_v49 = vshrl.u32 %v564_v1, 16  ;;  %v682_v18 = vshll.u32 %v564_v1, 16  ;;  %v7315_v12 = vld [vmem:[%s6938_s11 + $0x80] sm:$0x1]  ;;  %v567_v5 = vld [vmem:[%s6938_s11 + $0x30] sm:$0xf] }
  0x58   : > { %6206 = vmatprep.mubr.msk.bf16.mxu0 %vm309_vm1, %v5469_v6  ;;  %v670_v25 = vrot.slane %v668_v38, 4  ;;  %v676_v55 = vrot.slane %v674_v2, 5  ;;  %v688_v20 = vshll.u32 %v7279_v14, 16  ;;  %v692_v33 = vshrl.u32 %v7279_v14, 16 }
  0x59   : > { %v662_v61 = vrot.slane %v661_v16, 4  ;;  %v681_v21 = vrot.slane %v679_v49, 4  ;;  %v684_v59 = vrot.slane %v682_v18, 5  ;;  %v698_v3 = vshll.u32 %v7284_v15, 16 }
  0x5a   : > { %v671_v24 = vor.u32 %v670_v25, %v666_v37  ;;  %v690_v50 = vrot.slane %v688_v20, 5  ;;  %v694_v54 = vrot.slane %v692_v33, 4  ;;  %v5456_v6 = vrot.slane %v5440_v19, 9  ;;  %v570_v19 = vld [vmem:[%s6938_s11 + $0x3c] sm:$0xf] }
  0x5b   : > { %v667_v26 = vsel %vm6995_vm4, %v662_v61, %v666_v37  ;;  %v685_v10 = vor.u32 %v684_v59, %v681_v21  ;;  %v700_v29 = vrot.slane %v698_v3, 5  ;;  %v2967_v30 = vrot.slane %v5376_v41, 5  ;;  %v7355_v41 = vld [vmem:[%s6938_s11 + $0x40] sm:$0xf] }
  0x5c   : > { %v672_v28 = vrot.slane %v671_v24, 4  ;;  %v695_v36 = vor.u32 %v694_v54, %v690_v50  ;;  %v2970_v39 = vrot.slane %v5377_v23, 5  ;;  %v2393_v34 = vshll.u32 %v5379_v31, 16  ;;  %v7358_v23 = vld [vmem:[%s6938_s11 + $0x44] sm:$0x1] }
  0x5d   : > { %6063 = vmatmul.mubr.msk.bf16.vlgmr.msra.gmra.mrb[0].mxu1 %vm309_vm1, %v5206_v7  ;;  %v2964_v44 = vsel %vm7122_vm7, %v2962_v9, %v2963_v62  ;;  %v686_v40 = vrot.slane %v685_v10, 4  ;;  %v2969_v51 = vrot.slane %v2967_v30, 4  ;;  %v2397_v52 = vshrl.u32 %v5379_v31, 16  ;;  %v7331_v9 = vld [vmem:[%s6938_s11 + $0x34] sm:$0xf] }
  0x5e   : > { %6095 = vmatpush3.bf16.msra.mxu1 %v6984_v27  ;;  %v677_v27 = vsel %vm6995_vm4, %v672_v28, %v676_v55  ;;  %v696_v57 = vrot.slane %v695_v36, 4  ;;  %v2968_v22 = vsel %vm7122_vm7, %v5456_v6, %v2967_v30  ;;  %v7317_v63 = vrot.slane %v2393_v34, 5  ;;  %v7339_v7 = vld [vmem:[%s6938_s11 + $0x38] sm:$0x1]  ;;  %v5382_v28 = vld [vmem:[%s6938_s11 + $0x88] sm:$0xf] }
  0x5f   : > { %6207 = vmatmul.mubr.msk.bf16.gmra.mrb[8].mxu0 %vm309_vm1, %v5470_v13  ;;  %v5207_v56 = vcombine.low %v667_v26, %v677_v27  ;;  %v691_v62 = vsel %vm6995_vm4, %v686_v40, %v690_v50  ;;  %v2971_v0 = vsel %vm7122_vm7, %v2969_v51, %v2970_v39  ;;  %v7327_v1 = vrot.slane %v2397_v52, 4  ;;  %v5442_v26 = vld [vmem:[%s6938_s11 + $0x84] sm:$0xe]  ;;  %v5383_v36 = vld [vmem:[%s6938_s11 + $0x8c] sm:$0x1] }
  0x60   : > { %6210 = vmatprep.mubr.msk.bf16.mxu0 %vm309_vm1, %v5471_v43  ;;  %v5472_v32 = vcombine.low %v7276_v8, %v2964_v44  ;;  %v701_v17 = vsel %vm6995_vm4, %v696_v57, %v700_v29  ;;  %v5457_v13 = vrot.slane %v5441_v45, 9  ;;  %v5473_v38 = vcombine.low %v2968_v22, %v2971_v0  ;;  %v5385_v51 = vld [vmem:[%s6938_s11 + $0x94] sm:$0xf]  ;;  %v5443_v52 = vld [vmem:[%s6938_s11 + $0x90] sm:$0xe] }
  0x61   : > { %6066 = vmatprep.mubr.msk.bf16.mxu1 %vm309_vm1, %v5207_v56  ;;  %v5208_v37 = vcombine.low %v691_v62, %v701_v17  ;;  %v2974_v2 = vrot.slane %v5379_v31, 5  ;;  %v2977_v16 = vrot.slane %v7315_v12, 5  ;;  %v703_v43 = vshrl.u32 %v567_v5, 16  ;;  %v5386_v56 = vld [vmem:[%s6938_s11 + $0x98] sm:$0x1] }
  0x62   : > { %v706_v49 = vshll.u32 %v567_v5, 16  ;;  %v712_v8 = vshll.u32 %v7331_v9, 16  ;;  %v716_v18 = vshrl.u32 %v7331_v9, 16  ;;  %v722_v33 = vshll.u32 %v7339_v7, 16  ;;  %v573_v17 = vld [vmem:[%s6938_s11 + $0x48] sm:$0xf] }
  0x63   : > { %v7351_v55 = vsel %vm7122_vm7, %v5457_v13, %v2974_v2  ;;  %v2976_v20 = vrot.slane %v2974_v2, 4  ;;  %v705_v61 = vrot.slane %v703_v43, 4  ;;  %v727_v54 = vshrl.u32 %v570_v19, 16 }
  0x64   : > { %v708_v21 = vrot.slane %v706_v49, 5  ;;  %v714_v59 = vrot.slane %v712_v8, 5  ;;  %v718_v3 = vrot.slane %v716_v18, 4  ;;  %v724_v50 = vrot.slane %v722_v33, 5 }
  0x65   : > { %6067 = vmatmul.mubr.msk.bf16.gmra.mrb[4].mxu1 %vm309_vm1, %v5208_v37  ;;  %v2978_v24 = vsel %vm7122_vm7, %v2976_v20, %v2977_v16  ;;  %v730_v6 = vshll.u32 %v570_v19, 16  ;;  %v736_v31 = vshll.u32 %v7355_v41, 16  ;;  %v729_v39 = vrot.slane %v727_v54, 4  ;;  %v7380_v16 = vld [vmem:[%s6938_s11 + $0x4c] sm:$0xf] }
  0x66   : > { %v5474_v10 = vcombine.low %v7351_v55, %v2978_v24  ;;  %v709_v29 = vor.u32 %v708_v21, %v705_v61  ;;  %v719_v30 = vor.u32 %v718_v3, %v714_v59  ;;  %v740_v44 = vshrl.u32 %v7355_v41, 16  ;;  %v7385_v19 = vld [vmem:[%s6938_s11 + $0x50] sm:$0x1]  ;;  %v576_v21 = vld [vmem:[%s6938_s11 + $0x54] sm:$0xf] }
  0x67   : > { %6211 = vmatmul.mubr.msk.bf16.gmra.mrb[12].mxu0 %vm309_vm1, %v5472_v32  ;;  %v732_v34 = vrot.slane %v730_v6, 5  ;;  %v746_v40 = vshll.u32 %v7358_v23, 16  ;;  %v738_v57 = vrot.slane %v736_v31, 5  ;;  %v5458_v22 = vrot.slane %v5442_v26, 9 }
  0x68   : > { %6214 = vmatprep.mubr.msk.bf16.mxu0 %vm309_vm1, %v5473_v38  ;;  %v710_v45 = vrot.slane %v709_v29, 4  ;;  %v720_v27 = vrot.slane %v719_v30, 4  ;;  %v742_v0 = vrot.slane %v740_v44, 4  ;;  %v2981_v32 = vrot.slane %v5382_v28, 5 }
  0x69   : > { %v733_v62 = vor.u32 %v732_v34, %v729_v39  ;;  %v748_v5 = vrot.slane %v746_v40, 5  ;;  %v2984_v2 = vrot.slane %v5383_v36, 5  ;;  %v5459_v38 = vrot.slane %v5443_v52, 9  ;;  %v7400_v39 = vld [vmem:[%s6938_s11 + $0x58] sm:$0xf] }
  0x6a   : > { %v715_v13 = vsel %vm6995_vm4, %v710_v45, %v714_v59  ;;  %v725_v37 = vsel %vm6995_vm4, %v720_v27, %v724_v50  ;;  %v743_v8 = vor.u32 %v742_v0, %v738_v57  ;;  %v2982_v18 = vsel %vm7122_vm7, %v5458_v22, %v2981_v32  ;;  %v5388_v52 = vld [vmem:[%s6938_s11 + $0xa0] sm:$0xf] }
  0x6b   : > { %v5209_v43 = vcombine.low %v715_v13, %v725_v37  ;;  %v734_v49 = vrot.slane %v733_v62, 4  ;;  %v2983_v55 = vrot.slane %v2981_v32, 4  ;;  %v2988_v20 = vrot.slane %v5385_v51, 5  ;;  %v5444_v62 = vld [vmem:[%s6938_s11 + $0x9c] sm:$0xe] }
  0x6c   : > { %v2991_v33 = vrot.slane %v5386_v56, 5  ;;  %v751_v61 = vshrl.u32 %v573_v17, 16  ;;  %v744_v3 = vrot.slane %v743_v8, 4  ;;  %v754_v24 = vshll.u32 %v573_v17, 16  ;;  %v5389_v56 = vld [vmem:[%s6938_s11 + $0xa4] sm:$0x1] }
  0x6d   : > { %6070 = vmatprep.mubr.msk.bf16.mxu1 %vm309_vm1, %v5209_v43  ;;  %v739_v59 = vsel %vm6995_vm4, %v734_v49, %v738_v57  ;;  %v760_v50 = vshll.u32 %v7380_v16, 16  ;;  %v2985_v54 = vsel %vm7122_vm7, %v2983_v55, %v2984_v2  ;;  %v2989_v6 = vsel %vm7122_vm7, %v5459_v38, %v2988_v20  ;;  %v5391_v13 = vld [vmem:[%s6938_s11 + $0xac] sm:$0xf]  ;;  %v5445_v37 = vld [vmem:[%s6938_s11 + $0xa8] sm:$0xe] }
  0x6e   : > { %v2990_v26 = vrot.slane %v2988_v20, 4  ;;  %v753_v29 = vrot.slane %v751_v61, 4  ;;  %v749_v30 = vsel %vm6995_vm4, %v744_v3, %v748_v5  ;;  %v5475_v31 = vcombine.low %v2982_v18, %v2985_v54  ;;  %v5392_v8 = vld [vmem:[%s6938_s11 + $0xb0] sm:$0x1]  ;;  %v579_v18 = vld [vmem:[%s6938_s11 + $0x60] sm:$0xf] }
  0x6f   : > { %6215 = vmatmul.mubr.msk.bf16.gmra.mrb[16].mxu0 %vm309_vm1, %v5474_v10  ;;  %v756_v28 = vrot.slane %v754_v24, 5  ;;  %v762_v36 = vrot.slane %v760_v50, 5  ;;  %v5210_v34 = vcombine.low %v739_v59, %v749_v30  ;;  %v764_v40 = vshrl.u32 %v7380_v16, 16  ;;  %v7407_v10 = vld [vmem:[%s6938_s11 + $0x5c] sm:$0x1] }
  0x70   : > { %v2992_v44 = vsel %vm7122_vm7, %v2990_v26, %v2991_v33  ;;  %v770_v51 = vshll.u32 %v7385_v19, 16  ;;  %6218 = vmatprep.mubr.msk.bf16.mxu0 %vm309_vm1, %v5475_v31  ;;  %v775_v57 = vshrl.u32 %v576_v21, 16  ;;  %v778_v22 = vshll.u32 %v576_v21, 16 }
  0x71   : > { %v5476_v45 = vcombine.low %v2989_v6, %v2992_v44  ;;  %v757_v27 = vor.u32 %v756_v28, %v753_v29  ;;  %6071 = vmatmul.mubr.msk.bf16.gmra.mrb[8].mxu1 %vm309_vm1, %v5210_v34  ;;  %v766_v0 = vrot.slane %v764_v40, 4  ;;  %v784_v32 = vshll.u32 %v7400_v39, 16  ;;  %v7429_v40 = vld [vmem:[%s6938_s11 + $0x64] sm:$0xf] }
  0x72   : > { %v772_v5 = vrot.slane %v770_v51, 5  ;;  %v788_v17 = vshrl.u32 %v7400_v39, 16  ;;  %v777_v38 = vrot.slane %v775_v57, 4  ;;  %v780_v43 = vrot.slane %v778_v22, 5  ;;  %v7438_v22 = vld [vmem:[%s6938_s11 + $0x68] sm:$0x1] }
  0x73   : > { %v758_v2 = vrot.slane %v757_v27, 4  ;;  %v794_v49 = vshll.u32 %v7407_v10, 16  ;;  %v767_v55 = vor.u32 %v766_v0, %v762_v36  ;;  %v786_v20 = vrot.slane %v784_v32, 5 }
  0x74   : > { %v790_v33 = vrot.slane %v788_v17, 4  ;;  %v5460_v61 = vrot.slane %v5444_v62, 9  ;;  %v781_v59 = vor.u32 %v780_v43, %v777_v38  ;;  %v2995_v24 = vrot.slane %v5388_v52, 5  ;;  %v7442_v62 = vld [vmem:[%s6938_s11 + $0x70] sm:$0xf] }
  0x75   : > { %v763_v21 = vsel %vm6995_vm4, %v758_v2, %v762_v36  ;;  %v796_v3 = vrot.slane %v794_v49, 5  ;;  %v768_v50 = vrot.slane %v767_v55, 4  ;;  %v2998_v6 = vrot.slane %v5389_v56, 5  ;;  %v582_v56 = vld [vmem:[%s6938_s11 + $0x6c] sm:$0xf] }
  0x76   : > { %v791_v54 = vor.u32 %v790_v33, %v786_v20  ;;  %v5461_v26 = vrot.slane %v5445_v37, 9  ;;  %v782_v29 = vrot.slane %v781_v59, 4  ;;  %v2996_v30 = vsel %vm7122_vm7, %v5460_v61, %v2995_v24  ;;  %v5394_v49 = vld [vmem:[%s6938_s11 + $0xb8] sm:$0xf] }
  0x77   : > { %6219 = vmatmul.mubr.msk.bf16.gmra.mrb[20].mxu0 %vm309_vm1, %v5476_v45  ;;  %v2997_v31 = vrot.slane %v2995_v24, 4  ;;  %v3002_v28 = vrot.slane %v5391_v13, 5  ;;  %v773_v36 = vsel %vm6995_vm4, %v768_v50, %v772_v5  ;;  %v3005_v44 = vrot.slane %v5392_v8, 5  ;;  %v7447_v13 = vld [vmem:[%s6938_s11 + $0x74] sm:$0x1] }
  0x78   : > { %v792_v34 = vrot.slane %v791_v54, 4  ;;  %v799_v51 = vshrl.u32 %v579_v18, 16  ;;  %v5211_v52 = vcombine.low %v763_v21, %v773_v36  ;;  %v787_v45 = vsel %vm6995_vm4, %v782_v29, %v786_v20  ;;  %v5446_v24 = vld [vmem:[%s6938_s11 + $0xb4] sm:$0xe]  ;;  %v5447_v29 = vld [vmem:[%s6938_s11 + $0xc0] sm:$0xe] }
  0x79   : > { %v2999_v27 = vsel %vm7122_vm7, %v2997_v31, %v2998_v6  ;;  %v3003_v57 = vsel %vm7122_vm7, %v5461_v26, %v3002_v28  ;;  %v3004_v32 = vrot.slane %v3002_v28, 4  ;;  %v802_v2 = vshll.u32 %v579_v18, 16 }
  0x7a   : > { %v797_v0 = vsel %vm6995_vm4, %v792_v34, %v796_v3  ;;  %v5477_v5 = vcombine.low %v2996_v30, %v2999_v27  ;;  %v801_v17 = vrot.slane %v799_v51, 4  ;;  %6074 = vmatprep.mubr.msk.bf16.mxu1 %vm309_vm1, %v5211_v52  ;;  %v808_v38 = vshll.u32 %v7429_v40, 16  ;;  %v5395_v3 = vld [vmem:[%s6938_s11 + $0xbc] sm:$0x1]  ;;  %v5397_v34 = vld [vmem:[%s6938_s11 + $0xc4] sm:$0xf] }
  0x7b   : > { %v5212_v37 = vcombine.low %v787_v45, %v797_v0  ;;  %v812_v43 = vshrl.u32 %v7429_v40, 16  ;;  %v3006_v8 = vsel %vm7122_vm7, %v3004_v32, %v3005_v44  ;;  %v818_v55 = vshll.u32 %v7438_v22, 16  ;;  %v5398_v27 = vld [vmem:[%s6938_s11 + $0xc8] sm:$0x1] }
  0x7c   : > { %6222 = vmatprep.mubr.msk.bf16.mxu0 %vm309_vm1, %v5477_v5  ;;  %v823_v20 = vshrl.u32 %v582_v56, 16  ;;  %v826_v33 = vshll.u32 %v582_v56, 16  ;;  %v5478_v61 = vcombine.low %v3003_v57, %v3006_v8  ;;  %v804_v18 = vrot.slane %v802_v2, 5  ;;  %v585_v57 = vld [vmem:[%s6938_s11 + $0x78] sm:$0xf] }
  0x7d   : > { %6075 = vmatmul.mubr.msk.bf16.gmra.mrb[12].mxu1 %vm309_vm1, %v5212_v37  ;;  %v810_v21 = vrot.slane %v808_v38, 5  ;;  %v814_v59 = vrot.slane %v812_v43, 4  ;;  %v820_v50 = vrot.slane %v818_v55, 5  ;;  %v832_v26 = vshll.u32 %v7442_v62, 16  ;;  %v7473_v43 = vld [vmem:[%s8605_s1 + $0xc] sm:$0xf] }
  0x7e   : > { %v825_v54 = vrot.slane %v823_v20, 4  ;;  %v828_v6 = vrot.slane %v826_v33, 5  ;;  %v805_v30 = vor.u32 %v804_v18, %v801_v17  ;;  %v836_v28 = vshrl.u32 %v7442_v62, 16  ;;  %v7480_v33 = vld [vmem:[%s6938_s11 + $0x7c] sm:$0xf]  ;;  %6625 = vmatprep.subr.msk.bf16.mxu1 %vm358_vm0, %v7473_v43 }
  0x7f   : > { %6223 = vmatmul.mubr.msk.bf16.gmra.mrb[24].mxu0 %vm309_vm1, %v5478_v61  ;;  %v815_v31 = vor.u32 %v814_v59, %v810_v21  ;;  %v842_v36 = vshll.u32 %v7447_v13, 16  ;;  %v834_v51 = vrot.slane %v832_v26, 5  ;;  %v5462_v52 = vrot.slane %v5446_v24, 9  ;;  %v7483_v61 = vld [vmem:[%s6938_s11 + $0x80] sm:$0x1] }
  0x80   : > { %v829_v44 = vor.u32 %v828_v6, %v825_v54  ;;  %v3009_v45 = vrot.slane %v5394_v49, 5  ;;  %v806_v56 = vrot.slane %v805_v30, 4  ;;  %v838_v5 = vrot.slane %v836_v28, 4  ;;  %v588_v24 = vld [vmem:[%s6938_s11 + $0x84] sm:$0xf] }
  0x81   : > { %v816_v0 = vrot.slane %v815_v31, 4  ;;  %v844_v32 = vrot.slane %v842_v36, 5  ;;  %v3012_v38 = vrot.slane %v5395_v3, 5  ;;  %v5463_v20 = vrot.slane %v5447_v29, 9  ;;  %v7493_v29 = vld [vmem:[%s6938_s11 + $0x88] sm:$0xf] }
  0x82   : > { %v830_v37 = vrot.slane %v829_v44, 4  ;;  %v3010_v17 = vsel %vm7122_vm7, %v5462_v52, %v3009_v45  ;;  %v3011_v2 = vrot.slane %v3009_v45, 4  ;;  %v811_v49 = vsel %vm6995_vm4, %v806_v56, %v810_v21  ;;  %v7505_v45 = vld [vmem:[%s6938_s11 + $0x8c] sm:$0x1] }
  0x83   : > { %v821_v8 = vsel %vm6995_vm4, %v816_v0, %v820_v50  ;;  %v839_v55 = vor.u32 %v838_v5, %v834_v51  ;;  %v3016_v3 = vrot.slane %v5397_v34, 5  ;;  %v3019_v6 = vrot.slane %v5398_v27, 5  ;;  %v6706_v27 = vld [vmem:[%s6938_s11 + $0x18] sm:$0xff]  }
  0x84   : > { %v5213_v18 = vcombine.low %v811_v49, %v821_v8  ;;  %v835_v59 = vsel %vm6995_vm4, %v830_v37, %v834_v51  ;;  %v3013_v21 = vsel %vm7122_vm7, %v3011_v2, %v3012_v38  ;;  %v847_v26 = vshrl.u32 %v585_v57, 16  ;;  %v591_v37 = vld [vmem:[%s6938_s11 + $0x90] sm:$0xf]  ;;  %v7512_v49 = vld [vmem:[%s6938_s11 + $0x94] sm:$0xf] }
  0x85   : > { %v840_v50 = vrot.slane %v839_v55, 4  ;;  %v5479_v54 = vcombine.low %v3010_v17, %v3013_v21  ;;  %v3017_v30 = vsel %vm7122_vm7, %v5463_v20, %v3016_v3  ;;  %v3018_v31 = vrot.slane %v3016_v3, 4 }
  0x86   : > { %6078 = vmatprep.mubr.msk.bf16.mxu1 %vm309_vm1, %v5213_v18  ;;  %v850_v28 = vshll.u32 %v585_v57, 16  ;;  %v856_v36 = vshll.u32 %v7480_v33, 16  ;;  %v849_v44 = vrot.slane %v847_v26, 4  ;;  %v860_v51 = vshrl.u32 %v7480_v33, 16 }
  0x87   : > { %v845_v34 = vsel %vm6995_vm4, %v840_v50, %v844_v32  ;;  %6226 = vmatprep.mubr.msk.bf16.mxu0 %vm309_vm1, %v5479_v54  ;;  %v866_v52 = vshll.u32 %v7483_v61, 16  ;;  %v3020_v57 = vsel %vm7122_vm7, %v3018_v31, %v3019_v6  ;;  %v871_v38 = vshrl.u32 %v588_v24, 16 }
  0x88   : > { %v5214_v56 = vcombine.low %v835_v59, %v845_v34  ;;  %v852_v0 = vrot.slane %v850_v28, 5  ;;  %v858_v5 = vrot.slane %v856_v36, 5  ;;  %v5480_v32 = vcombine.low %v3017_v30, %v3020_v57  ;;  %v7518_v59 = vld [vmem:[%s6938_s11 + $0x98] sm:$0x1] }
  0x89   : > { %v862_v17 = vrot.slane %v860_v51, 4  ;;  %v868_v2 = vrot.slane %v866_v52, 5  ;;  %v874_v55 = vshll.u32 %v588_v24, 16  ;;  %v880_v20 = vshll.u32 %v7493_v29, 16  ;;  %v594_v24 = vld [vmem:[%s6938_s11 + $0x9c] sm:$0xf] }
  0x8a   : > { %6079 = vmatmul.mubr.msk.bf16.gmra.mrb[16].mxu1 %vm309_vm1, %v5214_v56  ;;  %v853_v8 = vor.u32 %v852_v0, %v849_v44  ;;  %v884_v18 = vshrl.u32 %v7493_v29, 16  ;;  %6227 = vmatmul.mubr.msk.bf16.gmra.mrb[28].mxu0 %vm309_vm1, %v5480_v32  ;;  %v873_v3 = vrot.slane %v871_v38, 4  ;;  %v890_v50 = vshll.u32 %v7505_v45, 16  ;;  %v7525_v51 = vld [vmem:[%s6938_s11 + $0xa0] sm:$0xf]  ;;  %v6707_v32 = vld [vmem:[%s6938_s11 + $0x24] sm:$0xff]  }
  0x8b   : > { %v863_v21 = vor.u32 %v862_v17, %v858_v5  ;;  %v895_v54 = vshrl.u32 %v591_v37, 16  ;;  %v876_v26 = vrot.slane %v874_v55, 5  ;;  %v882_v30 = vrot.slane %v880_v20, 5  ;;  %6232 = vmatprep.mubr.msk.bf16.mxu0 %vm309_vm1, %v6706_v27 }
  0x8c   : > { %v854_v6 = vrot.slane %v853_v8, 4  ;;  %v886_v31 = vrot.slane %v884_v18, 4  ;;  %v892_v36 = vrot.slane %v890_v50, 5  ;;  %v898_v44 = vshll.u32 %v591_v37, 16  ;;  %v7536_v8 = vld [vmem:[%s6938_s11 + $0xa4] sm:$0x1] }
  0x8d   : > { %v864_v28 = vrot.slane %v863_v21, 4  ;;  %v897_v34 = vrot.slane %v895_v54, 4  ;;  %v877_v56 = vor.u32 %v876_v26, %v873_v3  ;;  %v904_v0 = vshll.u32 %v7512_v49, 16  ;;  %v6708_v21 = vld [vmem:[%s6938_s11 + $0x30] sm:$0xff]   ;;  %v597_v26 = vld [vmem:[%s6938_s11 + $0xa8] sm:$0xf] }
  0x8e   : > { %v859_v52 = vsel %vm6995_vm4, %v854_v6, %v858_v5  ;;  %v887_v57 = vor.u32 %v886_v31, %v882_v30  ;;  %v900_v17 = vrot.slane %v898_v44, 5  ;;  %v908_v38 = vshrl.u32 %v7512_v49, 16 }
  0x8f   : > { %v869_v27 = vsel %vm6995_vm4, %v864_v28, %v868_v2  ;;  %v914_v37 = vshll.u32 %v7518_v59, 16  ;;  %v878_v20 = vrot.slane %v877_v56, 4  ;;  %v906_v18 = vrot.slane %v904_v0, 5 }
  0x90   : > { %v5215_v55 = vcombine.low %v859_v52, %v869_v27  ;;  %v888_v5 = vrot.slane %v887_v57, 4  ;;  %v901_v3 = vor.u32 %v900_v17, %v897_v34  ;;  %v910_v50 = vrot.slane %v908_v38, 4  ;;  %v7547_v52 = vld [vmem:[%s6938_s11 + $0xac] sm:$0xf]  ;;  %v7558_v38 = vld [vmem:[%s6938_s11 + $0xb0] sm:$0x1] }
  0x91   : > { %v916_v54 = vrot.slane %v914_v37, 5  ;;  %v919_v6 = vshrl.u32 %v594_v24, 16  ;;  %v883_v2 = vsel %vm6995_vm4, %v878_v20, %v882_v30  ;;  %v922_v28 = vshll.u32 %v594_v24, 16 }
  0x92   : > { %6082 = vmatprep.mubr.msk.bf16.mxu1 %vm309_vm1, %v5215_v55  ;;  %v893_v31 = vsel %vm6995_vm4, %v888_v5, %v892_v36  ;;  %v928_v44 = vshll.u32 %v7525_v51, 16  ;;  %6233 = vmatmul.mubr.msk.bf16.vlgmr.msra.gmra.mrb[0].mxu0 %vm309_vm1, %v6707_v32  ;;  %v902_v34 = vrot.slane %v901_v3, 4  ;;  %v911_v57 = vor.u32 %v910_v50, %v906_v18  ;;  %v600_v50 = vld [vmem:[%s6938_s11 + $0xb4] sm:$0xf] }
  0x93   : > { %v5216_v56 = vcombine.low %v883_v2, %v893_v31  ;;  %v921_v0 = vrot.slane %v919_v6, 4  ;;  %6265 = vmatpush3.bf16.msra.mxu0 %v7002_v46  ;;  %v924_v27 = vrot.slane %v922_v28, 5  ;;  %v932_v36 = vshrl.u32 %v7525_v51, 16  ;;  %6236 = vmatprep.mubr.msk.bf16.mxu0 %vm309_vm1, %v6708_v21  ;;  %v6709_v6 = vld [vmem:[%s6938_s11 + $0x3c] sm:$0xff]   ;;  %v7567_v28 = vld [vmem:[%s6938_s11 + $0xb8] sm:$0xf] }
  0x94   : > { %v930_v30 = vrot.slane %v928_v44, 5  ;;  %v938_v24 = vshll.u32 %v7536_v8, 16  ;;  %v907_v32 = vsel %vm6995_vm4, %v902_v34, %v906_v18  ;;  %v912_v17 = vrot.slane %v911_v57, 4  ;;  %v6710_v57 = vld [vmem:[%s6938_s11 + $0x48] sm:$0xff]  }
  0x95   : > { %6083 = vmatmul.mubr.msk.bf16.gmra.mrb[20].mxu1 %vm309_vm1, %v5216_v56  ;;  %v943_v46 = vshrl.u32 %v597_v26, 16  ;;  %v946_v37 = vshll.u32 %v597_v26, 16  ;;  %v925_v55 = vor.u32 %v924_v27, %v921_v0  ;;  %v934_v20 = vrot.slane %v932_v36, 4 }
  0x96   : > { %v940_v5 = vrot.slane %v938_v24, 5  ;;  %v952_v3 = vshll.u32 %v7547_v52, 16  ;;  %v917_v21 = vsel %vm6995_vm4, %v912_v17, %v916_v54  ;;  %v956_v18 = vshrl.u32 %v7547_v52, 16  ;;  %v7574_v54 = vld [vmem:[%s8605_s1 + $0x20] sm:$0xf] }
  0x97   : > { %v945_v2 = vrot.slane %v943_v46, 4  ;;  %v948_v31 = vrot.slane %v946_v37, 5  ;;  %v5217_v44 = vcombine.low %v907_v32, %v917_v21  ;;  %v926_v26 = vrot.slane %v925_v55, 4  ;;  %v7580_v46 = vld [vmem:[%s6938_s11 + $0xbc] sm:$0x1]  ;;  %6631 = vmatprep.subr.msk.bf16.mxu0 %vm358_vm0, %v7574_v54 }
  0x98   : > { %v935_v56 = vor.u32 %v934_v20, %v930_v30  ;;  %v954_v34 = vrot.slane %v952_v3, 5  ;;  %v958_v27 = vrot.slane %v956_v18, 4  ;;  %v962_v36 = vshll.u32 %v7558_v38, 16 }
  0x99   : > { %v949_v0 = vor.u32 %v948_v31, %v945_v2  ;;  %v967_v24 = vshrl.u32 %v600_v50, 16  ;;  %6086 = vmatprep.mubr.msk.bf16.mxu1 %vm309_vm1, %v5217_v44  ;;  %v931_v32 = vsel %vm6995_vm4, %v926_v26, %v930_v30  ;;  %v970_v37 = vshll.u32 %v600_v50, 16  ;;  %v1284_v31 = vld [vmem:[%s6938_s11] sm:$0xe]  ;;  %v1285_v26 = vld [vmem:[%s6938_s11 + $0xc] sm:$0xe] }
  0x9a   : > { %v936_v17 = vrot.slane %v935_v56, 4  ;;  %v976_v55 = vshll.u32 %v7567_v28, 16  ;;  %6237 = vmatmul.mubr.msk.bf16.gmra.mrb[4].mxu0 %vm309_vm1, %v6709_v6  ;;  %v959_v3 = vor.u32 %v958_v27, %v954_v34  ;;  %v964_v21 = vrot.slane %v962_v36, 5 }
  0x9b   : > { %v950_v20 = vrot.slane %v949_v0, 4  ;;  %v969_v2 = vrot.slane %v967_v24, 4  ;;  %v972_v18 = vrot.slane %v970_v37, 5  ;;  %v980_v50 = vshrl.u32 %v7567_v28, 16  ;;  %6240 = vmatprep.mubr.msk.bf16.mxu0 %vm309_vm1, %v6710_v57  ;;  %v1286_v37 = vld [vmem:[%s6938_s11 + $0x18] sm:$0xe] }
  0x9c   : > { %v941_v30 = vsel %vm6995_vm4, %v936_v17, %v940_v5  ;;  %v978_v44 = vrot.slane %v976_v55, 5  ;;  %v960_v0 = vrot.slane %v959_v3, 4  ;;  %v986_v27 = vshll.u32 %v7580_v46, 16  ;;  %v6738_v5 = vld [vmem:[%s6938_s11 + $0x4] sm:$0xf] }
  0x9d   : > { %v5218_v56 = vcombine.low %v931_v32, %v941_v30  ;;  %v955_v6 = vsel %vm6995_vm4, %v950_v20, %v954_v34  ;;  %v973_v36 = vor.u32 %v972_v18, %v969_v2  ;;  %v982_v24 = vrot.slane %v980_v50, 4  ;;  %v6711_v32 = vld [vmem:[%s6938_s11 + $0x54] sm:$0xff]   ;;  %v6712_v18 = vld [vmem:[%s6938_s11 + $0x60] sm:$0xff]  }
  0x9e   : > { %v5237_v25 = vrot.slane %v1284_v31, 9  ;;  %v1353_v17 = vrot.slane %v6738_v5, 5  ;;  %v965_v57 = vsel %vm6995_vm4, %v960_v0, %v964_v21  ;;  %v988_v55 = vrot.slane %v986_v27, 5 }
  0x9f   : > { %6087 = vmatmul.mubr.msk.bf16.gmra.mrb[24].mxu1 %vm309_vm1, %v5218_v56  ;;  %v1356_v30 = vrot.slane %v7200_v48, 5  ;;  %v5238_v34 = vrot.slane %v1285_v26, 9  ;;  %v5219_v20 = vcombine.low %v955_v6, %v965_v57  ;;  %v974_v3 = vrot.slane %v973_v36, 4 }
  0xa0   : > { %v983_v2 = vor.u32 %v982_v24, %v978_v44  ;;  %v1354_v31 = vsel %vm7122_vm7, %v5237_v25, %v1353_v17  ;;  %v1355_v50 = vrot.slane %v1353_v17, 4  ;;  %v1360_v56 = vrot.slane %v7209_v60, 5  ;;  %v1287_v25 = vld [vmem:[%s6938_s11 + $0x24] sm:$0xe] }
  0xa1   : > { %v1363_v5 = vrot.slane %v7220_v11, 5  ;;  %v5239_v21 = vrot.slane %v1286_v37, 9  ;;  %6090 = vmatprep.mubr.msk.bf16.mxu1 %vm309_vm1, %v5219_v20  ;;  %v979_v48 = vsel %vm6995_vm4, %v974_v3, %v978_v44  ;;  %v1367_v6 = vrot.slane %v7247_v35, 5  ;;  %v1288_v35 = vld [vmem:[%s6938_s11 + $0x30] sm:$0xe] }
  0xa2   : > { %v984_v26 = vrot.slane %v983_v2, 4  ;;  %v1370_v0 = vrot.slane %v7259_v58, 5  ;;  %6241 = vmatmul.mubr.msk.bf16.gmra.mrb[8].mxu0 %vm309_vm1, %v6711_v32  ;;  %v1357_v60 = vsel %vm7122_vm7, %v1355_v50, %v1356_v30  ;;  %v7618_v11 = vsel %vm7122_vm7, %v5238_v34, %v1360_v56  ;;  %v1289_v34 = vld [vmem:[%s6938_s11 + $0x3c] sm:$0xe]  ;;  %v1291_v50 = vld [vmem:[%s6938_s11 + $0x54] sm:$0xe] }
  0xa3   : > { %v1362_v27 = vrot.slane %v1360_v56, 4  ;;  %v7622_v44 = vsel %vm358_vm0, %v7473_v43, 0  ;;  %v5254_v36 = vcombine.low %v1354_v31, %v1357_v60  ;;  %6244 = vmatprep.mubr.msk.bf16.mxu0 %vm309_vm1, %v6712_v18  ;;  %v1368_v24 = vsel %vm7122_vm7, %v5239_v21, %v1367_v6  ;;  %v6713_v43 = vld [vmem:[%s6938_s11 + $0x6c] sm:$0xff]   ;;  %v6714_v2 = vld [vmem:[%s6938_s11 + $0x78] sm:$0xff]   ;;  %v1290_v18 = vld [vmem:[%s6938_s11 + $0x48] sm:$0xe] }
  0xa4   : > { %v989_v58 = vsel %vm6995_vm4, %v984_v26, %v988_v55  ;;  %v1369_v17 = vrot.slane %v1367_v6, 4  ;;  %v5240_v32 = vrot.slane %v1287_v25, 9  ;;  %v1374_v30 = vrot.slane %v7279_v14, 5 }
  0xa5   : > { %v5220_v37 = vcombine.low %v979_v48, %v989_v58  ;;  %v1364_v57 = vsel %vm7122_vm7, %v1362_v27, %v1363_v5  ;;  %v1377_v3 = vrot.slane %v7284_v15, 5  ;;  %v5241_v31 = vrot.slane %v1288_v35, 9 }
  0xa6   : > { %v5255_v55 = vcombine.low %v7618_v11, %v1364_v57  ;;  %v1371_v20 = vsel %vm7122_vm7, %v1369_v17, %v1370_v0  ;;  %v7645_v5 = vsel %vm7122_vm7, %v5240_v32, %v1374_v30  ;;  %v1376_v14 = vrot.slane %v1374_v30, 4 }
  0xa7   : > { %6091 = vmatmul.mubr.msk.bf16.gmra.mrb[28].mxu1 %vm309_vm1, %v5220_v37  ;;  %v5256_v56 = vcombine.low %v1368_v24, %v1371_v20  ;;  %v1381_v21 = vrot.slane %v7331_v9, 5  ;;  %v1384_v48 = vrot.slane %v7339_v7, 5  ;;  %v5242_v26 = vrot.slane %v1289_v34, 9  ;;  %v1292_v24 = vld [vmem:[%s6938_s11 + $0x60] sm:$0xe]  ;;  %v6715_v20 = vld [vmem:[%s6938_s11 + $0x84] sm:$0xff]  }
  0xa8   : > { %6096 = vmatprep.mubr.msk.bf16.mxu1 %vm309_vm1, %v5254_v36  ;;  %v1388_v15 = vrot.slane %v7355_v41, 5  ;;  %v1391_v6 = vrot.slane %v7358_v23, 5  ;;  %v7654_v0 = vsel %vm7122_vm7, %v1376_v14, %v1377_v3  ;;  %v5243_v9 = vrot.slane %v1290_v18, 9 }
  0xa9   : > { %v7658_v25 = vsel %vm7122_vm7, %v5241_v31, %v1381_v21  ;;  %v1383_v60 = vrot.slane %v1381_v21, 4  ;;  %v5257_v7 = vcombine.low %v7645_v5, %v7654_v0  ;;  %v1395_v11 = vrot.slane %v7380_v16, 5 }
  0xaa   : > { %v7664_v41 = vsel %vm7122_vm7, %v5242_v26, %v1388_v15  ;;  %v1390_v23 = vrot.slane %v1388_v15, 4  ;;  %6245 = vmatmul.mubr.msk.bf16.gmra.mrb[12].mxu0 %vm309_vm1, %v6713_v43  ;;  %v1398_v35 = vrot.slane %v7385_v19, 5  ;;  %v5244_v58 = vrot.slane %v1291_v50, 9  ;;  %v1293_v43 = vld [vmem:[%s6938_s11 + $0x6c] sm:$0xe] }
  0xab   : > { %v7670_v27 = vsel %vm7122_vm7, %v1383_v60, %v1384_v48  ;;  %v1402_v36 = vrot.slane %v7400_v39, 5  ;;  %6248 = vmatprep.mubr.msk.bf16.mxu0 %vm309_vm1, %v6714_v2  ;;  %v7684_v37 = vsel %vm7122_vm7, %v5243_v9, %v1395_v11  ;;  %v1397_v57 = vrot.slane %v1395_v11, 4  ;;  %v1294_v19 = vld [vmem:[%s6938_s11 + $0x78] sm:$0xe]  ;;  %v1295_v48 = vld [vmem:[%s6938_s11 + $0x84] sm:$0xe] }
  0xac   : > { %v5258_v17 = vcombine.low %v7658_v25, %v7670_v27  ;;  %v7680_v16 = vsel %vm7122_vm7, %v1390_v23, %v1391_v6  ;;  %v1405_v34 = vrot.slane %v7407_v10, 5  ;;  %v5245_v2 = vrot.slane %v1292_v24, 9  ;;  %v5562_v6 = vld [vmem:[%s6938_s11 + $0x18] sm:$0xf]  ;;  %v7728_v9 = vld [vmem:[%s6938_s11 + $0x1c] sm:$0xf] }
  0xad   : > { %v5259_v39 = vcombine.low %v7664_v41, %v7680_v16  ;;  %v7692_v32 = vsel %vm7122_vm7, %v5244_v58, %v1402_v36  ;;  %v1404_v30 = vrot.slane %v1402_v36, 4  ;;  %v7698_v3 = vsel %vm7122_vm7, %v1397_v57, %v1398_v35  ;;  %v6739_v23 = vld [vmem:[%s8605_s1 + $0x10] sm:$0xf]  ;;  %v7741_v36 = vld [vmem:[%s6938_s11 + $0x20] sm:$0x1] }
  0xae   : > { %v1409_v31 = vrot.slane %v7429_v40, 5  ;;  %v1412_v18 = vrot.slane %v7438_v22, 5  ;;  %v5260_v50 = vcombine.low %v7684_v37, %v7698_v3  ;;  %v5246_v10 = vrot.slane %v1293_v43, 9  ;;  %v6716_v40 = vld [vmem:[%s6938_s11 + $0x90] sm:$0xff]   ;;  %v5565_v43 = vld [vmem:[%s6938_s11 + $0x24] sm:$0xf] }
  0xaf   : > { %6097 = vmatmul.mubr.msk.bf16.vlgmr.msra.gmra.mrb[0].mxu1 %vm309_vm1, %v5255_v55  ;;  %v7707_v14 = vsel %vm7122_vm7, %v1404_v30, %v1405_v34  ;;  %v1416_v21 = vrot.slane %v7442_v62, 5  ;;  %v1419_v15 = vrot.slane %v7447_v13, 5  ;;  %v1423_v60 = vrot.slane %v7480_v33, 5 }
  0xb0   : > { %6100 = vmatprep.mubr.msk.bf16.mxu1 %vm309_vm1, %v5256_v56  ;;  %6129 = vmatpush3.bf16.msra.mxu1 %v7622_v44  ;;  %v5261_v22 = vcombine.low %v7692_v32, %v7707_v14  ;;  %v7718_v55 = vsel %vm7122_vm7, %v5245_v2, %v1409_v31  ;;  %v1411_v26 = vrot.slane %v1409_v31, 4  ;;  %v5247_v44 = vrot.slane %v1294_v19, 9 }
  0xb1   : > { %v7724_v62 = vsel %vm7122_vm7, %v5246_v10, %v1416_v21  ;;  %v1418_v56 = vrot.slane %v1416_v21, 4  ;;  %6627 = vmatprep.subr.msk.bf16.mxu1 %vm358_vm0, %v6739_v23  ;;  %v1426_v11 = vrot.slane %v7483_v61, 5  ;;  %v5248_v35 = vrot.slane %v1295_v48, 9  ;;  %v6718_v23 = vld [vmem:[%s6938_s11 + $0xa8] sm:$0xff]  }
  0xb2   : > { %v7736_v13 = vsel %vm7122_vm7, %v1411_v26, %v1412_v18  ;;  %v1430_v58 = vrot.slane %v7493_v29, 5  ;;  %6249 = vmatmul.mubr.msk.bf16.gmra.mrb[16].mxu0 %vm309_vm1, %v6715_v20  ;;  %v7752_v57 = vsel %vm7122_vm7, %v5247_v44, %v1423_v60  ;;  %v1425_v61 = vrot.slane %v1423_v60, 4  ;;  %v7780_v26 = vld [vmem:[%s6938_s11 + $0x2c] sm:$0x1] }
  0xb3   : > { %v5262_v33 = vcombine.low %v7718_v55, %v7736_v13  ;;  %v7748_v24 = vsel %vm7122_vm7, %v1418_v56, %v1419_v15  ;;  %6252 = vmatprep.mubr.msk.bf16.mxu0 %vm309_vm1, %v6716_v40  ;;  %v1433_v34 = vrot.slane %v7505_v45, 5  ;;  %v3726_v2 = vshrl.u32 %v5562_v6, 16  ;;  %v7777_v40 = vld [vmem:[%s6938_s11 + $0x28] sm:$0xf]  ;;  %v6717_v15 = vld [vmem:[%s6938_s11 + $0x9c] sm:$0xff]  }
  0xb4   : > { %v5263_v29 = vcombine.low %v7724_v62, %v7748_v24  ;;  %v7760_v19 = vsel %vm7122_vm7, %v5248_v35, %v1430_v58  ;;  %v1432_v30 = vrot.slane %v1430_v58, 4  ;;  %v7765_v20 = vsel %vm7122_vm7, %v1425_v61, %v1426_v11  ;;  %v7897_v55 = vld [vmem:[%s6938_s11 + $0x50] sm:$0x1] }
  0xb5   : > { %v3729_v31 = vshll.u32 %v5562_v6, 16  ;;  %v3735_v18 = vshll.u32 %v7728_v9, 16  ;;  %v5264_v10 = vcombine.low %v7752_v57, %v7765_v20  ;;  %v3739_v48 = vshrl.u32 %v7728_v9, 16 }
  0xb6   : > { %v7772_v21 = vsel %vm7122_vm7, %v1432_v30, %v1433_v34  ;;  %v3745_v45 = vshll.u32 %v7741_v36, 16  ;;  %v3728_v56 = vrot.slane %v3726_v2, 4  ;;  %v3750_v5 = vshrl.u32 %v5565_v43, 16  ;;  %v1296_v34 = vld [vmem:[%s6938_s11 + $0x90] sm:$0xe] }
  0xb7   : > { %6101 = vmatmul.mubr.msk.bf16.gmra.mrb[4].mxu1 %vm309_vm1, %v5257_v7  ;;  %v5265_v6 = vcombine.low %v7760_v19, %v7772_v21  ;;  %v3731_v44 = vrot.slane %v3729_v31, 5  ;;  %v3737_v60 = vrot.slane %v3735_v18, 5  ;;  %v3741_v11 = vrot.slane %v3739_v48, 4 }
  0xb8   : > { %6104 = vmatprep.mubr.msk.bf16.mxu1 %vm309_vm1, %v5258_v17  ;;  %v3747_v35 = vrot.slane %v3745_v45, 5  ;;  %v3753_v0 = vshll.u32 %v5565_v43, 16  ;;  %v3759_v58 = vshll.u32 %v7777_v40, 16  ;;  %v3763_v61 = vshrl.u32 %v7777_v40, 16  ;;  %v1297_v17 = vld [vmem:[%s6938_s11 + $0x9c] sm:$0xe] }
  0xb9   : > { %v3732_v7 = vor.u32 %v3731_v44, %v3728_v56  ;;  %v3769_v30 = vshll.u32 %v7780_v26, 16  ;;  %v3742_v2 = vor.u32 %v3741_v11, %v3737_v60  ;;  %v3752_v31 = vrot.slane %v3750_v5, 4  ;;  %v5568_v56 = vld [vmem:[%s6938_s11 + $0x30] sm:$0xf] }
  0xba   : > { %v3755_v25 = vrot.slane %v3753_v0, 5  ;;  %v7800_v27 = vsel %vm358_vm0, %v7574_v54, 0  ;;  %6253 = vmatmul.mubr.msk.bf16.gmra.mrb[20].mxu0 %vm309_vm1, %v6717_v15  ;;  %v3761_v18 = vrot.slane %v3759_v58, 5  ;;  %v3765_v48 = vrot.slane %v3763_v61, 4  ;;  %v6719_v58 = vld [vmem:[%s6938_s11 + $0xb4] sm:$0xff]  }
  0xbb   : > { %v3733_v43 = vrot.slane %v3732_v7, 4  ;;  %v3771_v45 = vrot.slane %v3769_v30, 5  ;;  %6256 = vmatprep.mubr.msk.bf16.mxu0 %vm309_vm1, %v6718_v23  ;;  %v3743_v44 = vrot.slane %v3742_v2, 4  ;;  %v5249_v5 = vrot.slane %v1296_v34, 9  ;;  %v7818_v34 = vld [vmem:[%s6938_s11 + $0x34] sm:$0xf] }
  0xbc   : > { %v3756_v11 = vor.u32 %v3755_v25, %v3752_v31  ;;  %v1437_v0 = vrot.slane %v7512_v49, 5  ;;  %v3766_v53 = vor.u32 %v3765_v48, %v3761_v18  ;;  %v1440_v15 = vrot.slane %v7518_v59, 5  ;;  %v6720_v59 = vld [vmem:[%s6938_s11 + $0xc0] sm:$0xff]   ;;  %v7830_v25 = vld [vmem:[%s6938_s11 + $0x38] sm:$0x1] }
  0xbd   : > { %v3738_v54 = vsel %vm6995_vm4, %v3733_v43, %v3737_v60  ;;  %v5250_v7 = vrot.slane %v1297_v17, 9  ;;  %v3748_v61 = vsel %vm6995_vm4, %v3743_v44, %v3747_v35  ;;  %v1444_v2 = vrot.slane %v7525_v51, 5  ;;  %v5571_v17 = vld [vmem:[%s6938_s11 + $0x3c] sm:$0xf]  ;;  %v7844_v51 = vld [vmem:[%s6938_s11 + $0x40] sm:$0xf] }
  0xbe   : > { %v3757_v30 = vrot.slane %v3756_v11, 4  ;;  %v7815_v23 = vsel %vm7122_vm7, %v5249_v5, %v1437_v0  ;;  %v1439_v49 = vrot.slane %v1437_v0, 4  ;;  %v7825_v60 = vcombine.low %v3738_v54, %v3748_v61  ;;  %v7855_v43 = vld [vmem:[%s6938_s11 + $0x44] sm:$0x1] }
  0xbf   : > { %6105 = vmatmul.mubr.msk.bf16.gmra.mrb[8].mxu1 %vm309_vm1, %v5259_v39  ;;  %v3767_v35 = vrot.slane %v3766_v53, 4  ;;  %v1447_v31 = vrot.slane %v7536_v8, 5  ;;  %v3774_v39 = vshrl.u32 %v5568_v56, 16  ;;  %v3777_v53 = vshll.u32 %v5568_v56, 16 }
  0xc0   : > { %6108 = vmatprep.mubr.msk.bf16.mxu1 %vm309_vm1, %v5260_v50  ;;  %v3762_v41 = vsel %vm6995_vm4, %v3757_v30, %v3761_v18  ;;  %v7840_v16 = vsel %vm7122_vm7, %v1439_v49, %v1440_v15  ;;  %v7852_v3 = vsel %vm7122_vm7, %v5250_v7, %v1444_v2  ;;  %v1446_v50 = vrot.slane %v1444_v2, 4 }
  0xc1   : > { %v3772_v8 = vsel %vm6995_vm4, %v3767_v35, %v3771_v45  ;;  %v5266_v37 = vcombine.low %v7815_v23, %v7840_v16  ;;  %v3776_v48 = vrot.slane %v3774_v39, 4  ;;  %v3779_v56 = vrot.slane %v3777_v53, 5  ;;  %v6721_v53 = vld [vmem:[%s6938_s11 + $0xcc] sm:$0xff]  }
  0xc2   : > { %v7857_v18 = vcombine.low %v3762_v41, %v3772_v8  ;;  %v3783_v44 = vshll.u32 %v7818_v34, 16  ;;  %6257 = vmatmul.mubr.msk.bf16.gmra.mrb[24].mxu0 %vm309_vm1, %v6719_v58  ;;  %v7863_v45 = vsel %vm7122_vm7, %v1446_v50, %v1447_v31  ;;  %v3787_v11 = vshrl.u32 %v7818_v34, 16  ;;  %v1298_v58 = vld [vmem:[%s6938_s11 + $0xa8] sm:$0xe] }
  0xc3   : > { %v3793_v5 = vshll.u32 %v7830_v25, 16  ;;  %v3798_v0 = vshrl.u32 %v5571_v17, 16  ;;  %6260 = vmatprep.mubr.msk.bf16.mxu0 %vm309_vm1, %v6720_v59  ;;  %v5267_v54 = vcombine.low %v7852_v3, %v7863_v45  ;;  %v3780_v15 = vor.u32 %v3779_v56, %v3776_v48  ;;  %v1299_v56 = vld [vmem:[%s6938_s11 + $0xb4] sm:$0xe] }
  0xc4   : > { %v3785_v7 = vrot.slane %v3783_v44, 5  ;;  %v3801_v61 = vshll.u32 %v5571_v17, 16  ;;  %v3789_v30 = vrot.slane %v3787_v11, 4  ;;  %v3807_v2 = vshll.u32 %v7844_v51, 16  ;;  %v5574_v11 = vld [vmem:[%s6938_s11 + $0x48] sm:$0xf] }
  0xc5   : > { %v3795_v49 = vrot.slane %v3793_v5, 5  ;;  %v3800_v35 = vrot.slane %v3798_v0, 4  ;;  %v3781_v31 = vrot.slane %v3780_v15, 4  ;;  %v3811_v39 = vshrl.u32 %v7844_v51, 16 }
  0xc6   : > { %v3803_v41 = vrot.slane %v3801_v61, 5  ;;  %v3817_v59 = vshll.u32 %v7855_v43, 16  ;;  %v3790_v17 = vor.u32 %v3789_v30, %v3785_v7  ;;  %v3809_v8 = vrot.slane %v3807_v2, 5  ;;  %v7894_v61 = vld [vmem:[%s6938_s11 + $0x4c] sm:$0xf] }
  0xc7   : > { %6109 = vmatmul.mubr.msk.bf16.gmra.mrb[12].mxu1 %vm309_vm1, %v5261_v22  ;;  %v5251_v50 = vrot.slane %v1298_v58, 9  ;;  %v1451_v48 = vrot.slane %v7547_v52, 5  ;;  %v3786_v44 = vsel %vm6995_vm4, %v3781_v31, %v3785_v7  ;;  %v3813_v14 = vrot.slane %v3811_v39, 4 }
  0xc8   : > { %6112 = vmatprep.mubr.msk.bf16.mxu1 %vm309_vm1, %v5262_v33  ;;  %v3804_v32 = vor.u32 %v3803_v41, %v3800_v35  ;;  %v3819_v22 = vrot.slane %v3817_v59, 5  ;;  %v3791_v5 = vrot.slane %v3790_v17, 4  ;;  %v1454_v52 = vrot.slane %v7558_v38, 5  ;;  %v7916_v59 = vld [vmem:[%s6938_s11 + $0x58] sm:$0xf] }
  0xc9   : > { %v7890_v0 = vsel %vm7122_vm7, %v5251_v50, %v1451_v48  ;;  %v1453_v15 = vrot.slane %v1451_v48, 4  ;;  %v3814_v33 = vor.u32 %v3813_v14, %v3809_v8  ;;  %v5252_v7 = vrot.slane %v1299_v56, 9  ;;  %v7923_v48 = vld [vmem:[%s6938_s11 + $0x5c] sm:$0x1] }
  0xca   : > { %v3805_v13 = vrot.slane %v3804_v32, 4  ;;  %v1458_v58 = vrot.slane %v7567_v28, 5  ;;  %6261 = vmatmul.mubr.msk.bf16.gmra.mrb[28].mxu0 %vm309_vm1, %v6721_v53  ;;  %v3796_v30 = vsel %vm6995_vm4, %v3791_v5, %v3795_v49  ;;  %v1461_v35 = vrot.slane %v7580_v46, 5  ;;  %v5577_v49 = vld [vmem:[%s6938_s11 + $0x54] sm:$0xf] }
  0xcb   : > { %v7905_v38 = vsel %vm7122_vm7, %v1453_v15, %v1454_v52  ;;  %v3822_v2 = vshrl.u32 %v5574_v11, 16  ;;  %6266 = vmatprep.mubr.msk.bf16.mxu0 %vm309_vm1, %v7825_v60  ;;  %v5613_v31 = vcombine.low %v3786_v44, %v3796_v30  ;;  %v3815_v41 = vrot.slane %v3814_v33, 4  ;;  %v5580_v60 = vld [vmem:[%s6938_s11 + $0x60] sm:$0xf]  ;;  %v7950_v30 = vld [vmem:[%s6938_s11 + $0x68] sm:$0x1] }
  0xcc   : > { %v3810_v28 = vsel %vm6995_vm4, %v3805_v13, %v3809_v8  ;;  %v5268_v39 = vcombine.low %v7890_v0, %v7905_v38  ;;  %v7920_v53 = vsel %vm7122_vm7, %v5252_v7, %v1458_v58  ;;  %v1460_v46 = vrot.slane %v1458_v58, 4  ;;  %v7946_v13 = vld [vmem:[%s6938_s11 + $0x64] sm:$0xf] }
  0xcd   : > { %v3824_v17 = vrot.slane %v3822_v2, 4  ;;  %v3825_v50 = vshll.u32 %v5574_v11, 16  ;;  %v3820_v8 = vsel %vm6995_vm4, %v3815_v41, %v3819_v22  ;;  %v3831_v56 = vshll.u32 %v7894_v61, 16 }
  0xce   : > { %v3835_v44 = vshrl.u32 %v7894_v61, 16  ;;  %v3841_v32 = vshll.u32 %v7897_v55, 16  ;;  %v5614_v14 = vcombine.low %v3810_v28, %v3820_v8  ;;  %v7937_v11 = vsel %vm7122_vm7, %v1460_v46, %v1461_v35 }
  0xcf   : > { %6113 = vmatmul.mubr.msk.bf16.gmra.mrb[16].mxu1 %vm309_vm1, %v5263_v29  ;;  %v3827_v5 = vrot.slane %v3825_v50, 5  ;;  %v3846_v15 = vshrl.u32 %v5577_v49, 16  ;;  %v5269_v22 = vcombine.low %v7920_v53, %v7937_v11  ;;  %v3833_v52 = vrot.slane %v3831_v56, 5  ;;  %v8054_v11 = vld [vmem:[%s6938_s11 + $0xa4] sm:$0x1] }
  0xd0   : > { %6116 = vmatprep.mubr.msk.bf16.mxu1 %vm309_vm1, %v5264_v10  ;;  %v3837_v62 = vrot.slane %v3835_v44, 4  ;;  %v3843_v24 = vrot.slane %v3841_v32, 5  ;;  %v3849_v7 = vshll.u32 %v5577_v49, 16  ;;  %v3855_v58 = vshll.u32 %v7916_v59, 16 }
  0xd1   : > { %v3828_v29 = vor.u32 %v3827_v5, %v3824_v17  ;;  %v3848_v33 = vrot.slane %v3846_v15, 4  ;;  %v3859_v57 = vshrl.u32 %v7916_v59, 16  ;;  %v3865_v20 = vshll.u32 %v7923_v48, 16  ;;  %v5583_v5 = vld [vmem:[%s6938_s11 + $0x6c] sm:$0xf] }
  0xd2   : > { %v3838_v35 = vor.u32 %v3837_v62, %v3833_v52  ;;  %v3870_v10 = vshrl.u32 %v5580_v60, 16  ;;  %6267 = vmatmul.mubr.msk.bf16.vlgmr.msra.gmra.mrb[0].mxu0 %vm309_vm1, %v7857_v18  ;;  %v3851_v28 = vrot.slane %v3849_v7, 5  ;;  %v3857_v41 = vrot.slane %v3855_v58, 5  ;;  %v7967_v62 = vld [vmem:[%s6938_s11 + $0x70] sm:$0xf] }
  0xd3   : > { %v3829_v2 = vrot.slane %v3828_v29, 4  ;;  %v3873_v46 = vshll.u32 %v5580_v60, 16  ;;  %6299 = vmatpush3.bf16.msra.mxu0 %v7800_v27  ;;  %6270 = vmatprep.mubr.msk.bf16.mxu0 %vm309_vm1, %v5613_v31  ;;  %v3861_v17 = vrot.slane %v3859_v57, 4  ;;  %v3867_v50 = vrot.slane %v3865_v20, 5  ;;  %v7978_v57 = vld [vmem:[%s6938_s11 + $0x74] sm:$0x1] }
  0xd4   : > { %v3839_v49 = vrot.slane %v3838_v35, 4  ;;  %v3872_v8 = vrot.slane %v3870_v10, 4  ;;  %v3852_v44 = vor.u32 %v3851_v28, %v3848_v33  ;;  %v3879_v18 = vshll.u32 %v7946_v13, 16 }
  0xd5   : > { %v3834_v56 = vsel %vm6995_vm4, %v3829_v2, %v3833_v52  ;;  %v3875_v32 = vrot.slane %v3873_v46, 5  ;;  %v3862_v15 = vor.u32 %v3861_v17, %v3857_v41  ;;  %v3883_v27 = vshrl.u32 %v7946_v13, 16  ;;  %v5586_v2 = vld [vmem:[%s6938_s11 + $0x78] sm:$0xf]  ;;  %v7988_v46 = vld [vmem:[%s6938_s11 + $0x7c] sm:$0xf] }
  0xd6   : > { %v3844_v60 = vsel %vm6995_vm4, %v3839_v49, %v3843_v24  ;;  %v3889_v31 = vshll.u32 %v7950_v30, 16  ;;  %v3853_v29 = vrot.slane %v3852_v44, 4  ;;  %v3881_v7 = vrot.slane %v3879_v18, 5 }
  0xd7   : > { %6117 = vmatmul.mubr.msk.bf16.gmra.mrb[20].mxu1 %vm309_vm1, %v5265_v6  ;;  %v5615_v52 = vcombine.low %v3834_v56, %v3844_v60  ;;  %v3876_v33 = vor.u32 %v3875_v32, %v3872_v8  ;;  %v3863_v24 = vrot.slane %v3862_v15, 4  ;;  %v3885_v58 = vrot.slane %v3883_v27, 4  ;;  %v7996_v32 = vld [vmem:[%s6938_s11 + $0x80] sm:$0x1]  ;;  %v5589_v27 = vld [vmem:[%s6938_s11 + $0x84] sm:$0xf] }
  0xd8   : > { %6120 = vmatprep.mubr.msk.bf16.mxu1 %vm309_vm1, %v5266_v37  ;;  %v3891_v35 = vrot.slane %v3889_v31, 5  ;;  %v3894_v20 = vshrl.u32 %v5583_v5, 16  ;;  %v3858_v19 = vsel %vm6995_vm4, %v3853_v29, %v3857_v41  ;;  %v3897_v6 = vshll.u32 %v5583_v5, 16 }
  0xd9   : > { %v3877_v21 = vrot.slane %v3876_v33, 4  ;;  %v3903_v10 = vshll.u32 %v7967_v62, 16  ;;  %v3868_v23 = vsel %vm6995_vm4, %v3863_v24, %v3867_v50  ;;  %v3886_v16 = vor.u32 %v3885_v58, %v3881_v7 }
  0xda   : > { %v3896_v37 = vrot.slane %v3894_v20, 4  ;;  %v3907_v28 = vshrl.u32 %v7967_v62, 16  ;;  %6271 = vmatmul.mubr.msk.bf16.gmra.mrb[4].mxu0 %vm309_vm1, %v5614_v14  ;;  %v5616_v49 = vcombine.low %v3858_v19, %v3868_v23  ;;  %v3899_v17 = vrot.slane %v3897_v6, 5 }
  0xdb   : > { %v3882_v41 = vsel %vm6995_vm4, %v3877_v21, %v3881_v7  ;;  %v3905_v8 = vrot.slane %v3903_v10, 5  ;;  %6274 = vmatprep.mubr.msk.bf16.mxu0 %vm309_vm1, %v5615_v52  ;;  %v3887_v56 = vrot.slane %v3886_v16, 4  ;;  %v3913_v44 = vshll.u32 %v7978_v57, 16  ;;  %v8004_v7 = vld [vmem:[%s6938_s11 + $0x88] sm:$0xf] }
  0xdc   : > { %v3909_v50 = vrot.slane %v3907_v28, 4  ;;  %v3918_v18 = vshrl.u32 %v5586_v2, 16  ;;  %v3900_v5 = vor.u32 %v3899_v17, %v3896_v37  ;;  %v3921_v60 = vshll.u32 %v5586_v2, 16  ;;  %v5592_v16 = vld [vmem:[%s6938_s11 + $0x90] sm:$0xf] }
  0xdd   : > { %v3927_v14 = vshll.u32 %v7988_v46, 16  ;;  %v3931_v15 = vshrl.u32 %v7988_v46, 16  ;;  %v3892_v31 = vsel %vm6995_vm4, %v3887_v56, %v3891_v35  ;;  %v3915_v52 = vrot.slane %v3913_v44, 5  ;;  %v8025_v28 = vld [vmem:[%s6938_s11 + $0x94] sm:$0xf] }
  0xde   : > { %v3910_v29 = vor.u32 %v3909_v50, %v3905_v8  ;;  %v3920_v33 = vrot.slane %v3918_v18, 4  ;;  %v5617_v24 = vcombine.low %v3882_v41, %v3892_v31  ;;  %v3901_v58 = vrot.slane %v3900_v5, 4  ;;  %v6722_v50 = vld [vmem:[%s6938_s11 + $0xc] sm:$0xff]  }
  0xdf   : > { %6121 = vmatmul.mubr.msk.bf16.gmra.mrb[24].mxu1 %vm309_vm1, %v5267_v54  ;;  %v3923_v20 = vrot.slane %v3921_v60, 5  ;;  %v3929_v19 = vrot.slane %v3927_v14, 5  ;;  %v3933_v21 = vrot.slane %v3931_v15, 4  ;;  %v3937_v6 = vshll.u32 %v7996_v32, 16  ;;  %v8018_v54 = vld [vmem:[%s6938_s11 + $0x8c] sm:$0x1] }
  0xe0   : > { %6124 = vmatprep.mubr.msk.bf16.mxu1 %vm309_vm1, %v5268_v39  ;;  %v3911_v35 = vrot.slane %v3910_v29, 4  ;;  %v3942_v10 = vshrl.u32 %v5589_v27, 16  ;;  %v3906_v3 = vsel %vm6995_vm4, %v3901_v58, %v3905_v8  ;;  %v3945_v2 = vshll.u32 %v5589_v27, 16  ;;  %v5595_v29 = vld [vmem:[%s6938_s11 + $0x9c] sm:$0xf] }
  0xe1   : > { %v3924_v45 = vor.u32 %v3923_v20, %v3920_v33  ;;  %v3951_v23 = vshll.u32 %v8004_v7, 16  ;;  %v3934_v38 = vor.u32 %v3933_v21, %v3929_v19  ;;  %v3939_v39 = vrot.slane %v3937_v6, 5  ;;  %v8042_v20 = vld [vmem:[%s6938_s11 + $0xa0] sm:$0xf] }
  0xe2   : > { %v3916_v0 = vsel %vm6995_vm4, %v3911_v35, %v3915_v52  ;;  %v3944_v37 = vrot.slane %v3942_v10, 4  ;;  %6275 = vmatmul.mubr.msk.bf16.gmra.mrb[8].mxu0 %vm309_vm1, %v5616_v49  ;;  %v3947_v8 = vrot.slane %v3945_v2, 5  ;;  %v3955_v18 = vshrl.u32 %v8004_v7, 16  ;;  %v8035_v49 = vld [vmem:[%s6938_s11 + $0x98] sm:$0x1] }
  0xe3   : > { %v5618_v41 = vcombine.low %v3906_v3, %v3916_v0  ;;  %v3925_v17 = vrot.slane %v3924_v45, 4  ;;  %v3953_v56 = vrot.slane %v3951_v23, 5  ;;  %6278 = vmatprep.mubr.msk.bf16.mxu0 %vm309_vm1, %v5617_v24  ;;  %v3935_v44 = vrot.slane %v3934_v38, 4  ;;  %v5598_v0 = vld [vmem:[%s6938_s11 + $0xa8] sm:$0xf] }
  0xe4   : > { %v3961_v5 = vshll.u32 %v8018_v54, 16  ;;  %v3966_v60 = vshrl.u32 %v5592_v16, 16  ;;  %v3948_v15 = vor.u32 %v3947_v8, %v3944_v37  ;;  %v3969_v27 = vshll.u32 %v5592_v16, 16  ;;  %v6723_v8 = vld [vmem:[%s6938_s11 + $0x18] sm:$0xff]  }
  0xe5   : > { %v3930_v14 = vsel %vm6995_vm4, %v3925_v17, %v3929_v19  ;;  %v3975_v31 = vshll.u32 %v8025_v28, 16  ;;  %v3940_v52 = vsel %vm6995_vm4, %v3935_v44, %v3939_v39  ;;  %v3957_v33 = vrot.slane %v3955_v18, 4 }
  0xe6   : > { %v3963_v24 = vrot.slane %v3961_v5, 5  ;;  %v3968_v58 = vrot.slane %v3966_v60, 4  ;;  %v5619_v19 = vcombine.low %v3930_v14, %v3940_v52  ;;  %v3949_v35 = vrot.slane %v3948_v15, 4  ;;  %v6724_v5 = vld [vmem:[%s6938_s11 + $0x24] sm:$0xff]  }
  0xe7   : > { %6125 = vmatmul.mubr.msk.bf16.gmra.mrb[28].mxu1 %vm309_vm1, %v5269_v22  ;;  %v3971_v21 = vrot.slane %v3969_v27, 5  ;;  %v3977_v6 = vrot.slane %v3975_v31, 5  ;;  %v3958_v10 = vor.u32 %v3957_v33, %v3953_v56  ;;  %v3979_v3 = vshrl.u32 %v8025_v28, 16  ;;  %v8067_v27 = vld [vmem:[%s6938_s11 + $0xac] sm:$0xf] }
  0xe8   : > { %6130 = vmatprep.mubr.msk.bf16.mxu1 %vm309_vm1, %v6722_v50  ;;  %v3985_v45 = vshll.u32 %v8035_v49, 16  ;;  %v3990_v2 = vshrl.u32 %v5595_v29, 16  ;;  %v3954_v23 = vsel %vm6995_vm4, %v3949_v35, %v3953_v56  ;;  %v3993_v22 = vshll.u32 %v5595_v29, 16  ;;  %v5601_v35 = vld [vmem:[%s6938_s11 + $0xb4] sm:$0xf] }
  0xe9   : > { %v3972_v53 = vor.u32 %v3971_v21, %v3968_v58  ;;  %v3999_v16 = vshll.u32 %v8042_v20, 16  ;;  %v3959_v38 = vrot.slane %v3958_v10, 4  ;;  %v3981_v39 = vrot.slane %v3979_v3, 4  ;;  %v8072_v58 = vld [vmem:[%s6938_s11 + $0xb0] sm:$0x1] }
  0xea   : > { %v3987_v37 = vrot.slane %v3985_v45, 5  ;;  %v3992_v17 = vrot.slane %v3990_v2, 4  ;;  %6279 = vmatmul.mubr.msk.bf16.gmra.mrb[12].mxu0 %vm309_vm1, %v5618_v41  ;;  %v3995_v56 = vrot.slane %v3993_v22, 5  ;;  %v4003_v18 = vshrl.u32 %v8042_v20, 16 }
  0xeb   : > { %v3973_v50 = vrot.slane %v3972_v53, 4  ;;  %v4001_v44 = vrot.slane %v3999_v16, 5  ;;  %6282 = vmatprep.mubr.msk.bf16.mxu0 %vm309_vm1, %v5619_v19  ;;  %v3964_v60 = vsel %vm6995_vm4, %v3959_v38, %v3963_v24  ;;  %v3982_v14 = vor.u32 %v3981_v39, %v3977_v6  ;;  %v8084_v16 = vld [vmem:[%s6938_s11 + $0xb8] sm:$0xf] }
  0xec   : > { %v4009_v15 = vshll.u32 %v8054_v11, 16  ;;  %v4014_v31 = vshrl.u32 %v5598_v0, 16  ;;  %v5620_v41 = vcombine.low %v3954_v23, %v3964_v60  ;;  %v3996_v52 = vor.u32 %v3995_v56, %v3992_v17  ;;  %v6725_v60 = vld [vmem:[%s6938_s11 + $0x30] sm:$0xff]  }
  0xed   : > { %v3978_v29 = vsel %vm6995_vm4, %v3973_v50, %v3977_v6  ;;  %v4005_v33 = vrot.slane %v4003_v18, 4  ;;  %v3983_v19 = vrot.slane %v3982_v14, 4  ;;  %v4017_v24 = vshll.u32 %v5598_v0, 16  ;;  %v8089_v50 = vld [vmem:[%s6938_s11 + $0xbc] sm:$0x1] }
  0xee   : > { %v4011_v21 = vrot.slane %v4009_v15, 5  ;;  %v4016_v10 = vrot.slane %v4014_v31, 4  ;;  %v3997_v3 = vrot.slane %v3996_v52, 4  ;;  %v4023_v2 = vshll.u32 %v8067_v27, 16 }
  0xef   : > { %6131 = vmatmul.mubr.msk.bf16.vlgmr.msra.gmra.mrb[0].mxu1 %vm309_vm1, %v6723_v8  ;;  %v4006_v45 = vor.u32 %v4005_v33, %v4001_v44  ;;  %v4027_v23 = vshrl.u32 %v8067_v27, 16  ;;  %v3988_v6 = vsel %vm6995_vm4, %v3983_v19, %v3987_v37  ;;  %v4019_v53 = vrot.slane %v4017_v24, 5  ;;  %v8102_v24 = vld [vmem:[%s6938_s11 + $0xc4] sm:$0xf] }
  0xf0   : > { %6134 = vmatprep.mubr.msk.bf16.mxu1 %vm309_vm1, %v6724_v5  ;;  %6333 = vmatpush3.bf16.msra.mxu1 %v6927_v4  ;;  %v4033_v22 = vshll.u32 %v8072_v58, 16  ;;  %v4038_v0 = vshrl.u32 %v5601_v35, 16  ;;  %v5621_v38 = vcombine.low %v3978_v29, %v3988_v6  ;;  %v4002_v39 = vsel %vm6995_vm4, %v3997_v3, %v4001_v44  ;;  %v5604_v5 = vld [vmem:[%s6938_s11 + $0xc0] sm:$0xf] }
  0xf1   : > { %v4007_v17 = vrot.slane %v4006_v45, 4  ;;  %v4025_v8 = vrot.slane %v4023_v2, 5  ;;  %v4020_v4 = vor.u32 %v4019_v53, %v4016_v10  ;;  %v4029_v56 = vrot.slane %v4027_v23, 4  ;;  %v6726_v29 = vld [vmem:[%s6938_s11 + $0x3c] sm:$0xff]  }
  0xf2   : > { %v4035_v18 = vrot.slane %v4033_v22, 5  ;;  %v4040_v37 = vrot.slane %v4038_v0, 4  ;;  %6283 = vmatmul.mubr.msk.bf16.gmra.mrb[16].mxu0 %vm309_vm1, %v5620_v41  ;;  %v4041_v15 = vshll.u32 %v5601_v35, 16  ;;  %v4047_v44 = vshll.u32 %v8084_v16, 16 }
  0xf3   : > { %v4012_v14 = vsel %vm6995_vm4, %v4007_v17, %v4011_v21  ;;  %v4051_v31 = vshrl.u32 %v8084_v16, 16  ;;  %6286 = vmatprep.mubr.msk.bf16.mxu0 %vm309_vm1, %v5621_v38  ;;  %v4021_v33 = vrot.slane %v4020_v4, 4  ;;  %v4030_v19 = vor.u32 %v4029_v56, %v4025_v8  ;;  %v8105_v21 = vld [vmem:[%s6938_s11 + $0xc8] sm:$0x1]  ;;  %v5607_v17 = vld [vmem:[%s6938_s11 + $0xcc] sm:$0xf] }
  0xf4   : > { %v5622_v52 = vcombine.low %v4002_v39, %v4012_v14  ;;  %v4057_v10 = vshll.u32 %v8089_v50, 16  ;;  %v4043_v41 = vrot.slane %v4041_v15, 5  ;;  %v4049_v3 = vrot.slane %v4047_v44, 5  ;;  %v8118_v14 = vld [vmem:[%s6938_s11 + $0xd0] sm:$0xf] }
  0xf5   : > { %v4053_v45 = vrot.slane %v4051_v31, 4  ;;  %v4062_v35 = vshrl.u32 %v5604_v5, 16  ;;  %v4026_v2 = vsel %vm6995_vm4, %v4021_v33, %v4025_v8  ;;  %v4031_v23 = vrot.slane %v4030_v19, 4 }
  0xf6   : > { %v4059_v6 = vrot.slane %v4057_v10, 5  ;;  %v4065_v53 = vshll.u32 %v5604_v5, 16  ;;  %v4044_v22 = vor.u32 %v4043_v41, %v4040_v37  ;;  %v4071_v39 = vshll.u32 %v8102_v24, 16 }
  0xf7   : > { %6135 = vmatmul.mubr.msk.bf16.gmra.mrb[4].mxu1 %vm309_vm1, %v6725_v60  ;;  %v4054_v0 = vor.u32 %v4053_v45, %v4049_v3  ;;  %v4064_v38 = vrot.slane %v4062_v35, 4  ;;  %v4036_v4 = vsel %vm6995_vm4, %v4031_v23, %v4035_v18  ;;  %v4075_v8 = vshrl.u32 %v8102_v24, 16  ;;  %v6727_v18 = vld [vmem:[%s6938_s11 + $0x48] sm:$0xff]   ;;  %v5643_v23 = vld [vmem:[%s6938_s11 + $0x18] sm:$0xe] }
  0xf8   : > { %6138 = vmatprep.mubr.msk.bf16.mxu1 %vm309_vm1, %v6726_v29  ;;  %v4067_v56 = vrot.slane %v4065_v53, 5  ;;  %v4081_v5 = vshll.u32 %v8105_v21, 16  ;;  %v5623_v37 = vcombine.low %v4026_v2, %v4036_v4  ;;  %v4045_v60 = vrot.slane %v4044_v22, 4  ;;  %v8121_v29 = vld [vmem:[%s6938_s11 + $0xd4] sm:$0x1] }
  0xf9   : > { %v4055_v15 = vrot.slane %v4054_v0, 4  ;;  %v4073_v44 = vrot.slane %v4071_v39, 5  ;;  %v4077_v33 = vrot.slane %v4075_v8, 4  ;;  %v4086_v10 = vshrl.u32 %v5607_v17, 16  ;;  %v6728_v53 = vld [vmem:[%s6938_s11 + $0x54] sm:$0xff]  }
  0xfa   : > { %v4068_v31 = vor.u32 %v4067_v56, %v4064_v38  ;;  %v4083_v19 = vrot.slane %v4081_v5, 5  ;;  %6287 = vmatmul.mubr.msk.bf16.gmra.mrb[20].mxu0 %vm309_vm1, %v5622_v52  ;;  %v4050_v41 = vsel %vm6995_vm4, %v4045_v60, %v4049_v3  ;;  %v4089_v35 = vshll.u32 %v5607_v17, 16  ;;  %v5644_v8 = vld [vmem:[%s6938_s11 + $0x24] sm:$0xe] }
  0xfb   : > { %v4060_v45 = vsel %vm6995_vm4, %v4055_v15, %v4059_v6  ;;  %v4095_v2 = vshll.u32 %v8118_v14, 16  ;;  %6290 = vmatprep.mubr.msk.bf16.mxu0 %vm309_vm1, %v5623_v37  ;;  %v4078_v38 = vor.u32 %v4077_v33, %v4073_v44  ;;  %v4088_v39 = vrot.slane %v4086_v10, 4  ;;  %v5645_v10 = vld [vmem:[%s6938_s11 + $0x30] sm:$0xe] }
  0xfc   : > { %v5624_v22 = vcombine.low %v4050_v41, %v4060_v45  ;;  %v4069_v0 = vrot.slane %v4068_v31, 4  ;;  %v4091_v52 = vrot.slane %v4089_v35, 5  ;;  %v4099_v56 = vshrl.u32 %v8118_v14, 16 }
  0xfd   : > { %v4097_v4 = vrot.slane %v4095_v2, 5  ;;  %v4105_v3 = vshll.u32 %v8121_v29, 16  ;;  %v4079_v17 = vrot.slane %v4078_v38, 4  ;;  %v5659_v5 = vrot.slane %v5643_v23, 9 }
  0xfe   : > { %v4074_v6 = vsel %vm6995_vm4, %v4069_v0, %v4073_v44  ;;  %v4469_v60 = vrot.slane %v7728_v9, 5  ;;  %v4092_v37 = vor.u32 %v4091_v52, %v4088_v39  ;;  %v4101_v15 = vrot.slane %v4099_v56, 4  ;;  %v5646_v39 = vld [vmem:[%s6938_s11 + $0x3c] sm:$0xe] }
  0xff   : > { %6139 = vmatmul.mubr.msk.bf16.gmra.mrb[8].mxu1 %vm309_vm1, %v6727_v18  ;;  %v4107_v31 = vrot.slane %v4105_v3, 5  ;;  %v4472_v33 = vrot.slane %v7741_v36, 5  ;;  %v4084_v41 = vsel %vm6995_vm4, %v4079_v17, %v4083_v19  ;;  %v5660_v9 = vrot.slane %v5644_v8, 9  ;;  %v6729_v3 = vld [vmem:[%s6938_s11 + $0x60] sm:$0xff]   ;;  %v5647_v8 = vld [vmem:[%s6938_s11 + $0x48] sm:$0xe] }
 0x100   : > { %6142 = vmatprep.mubr.msk.bf16.mxu1 %vm309_vm1, %v6728_v53  ;;  %v4470_v44 = vsel %vm7122_vm7, %v5659_v5, %v4469_v60  ;;  %v4471_v45 = vrot.slane %v4469_v60, 4  ;;  %v5625_v18 = vcombine.low %v4074_v6, %v4084_v41  ;;  %v4093_v35 = vrot.slane %v4092_v37, 4  ;;  %v6730_v6 = vld [vmem:[%s6938_s11 + $0x6c] sm:$0xff]  }
 0x101   : > { %v4102_v2 = vor.u32 %v4101_v15, %v4097_v4  ;;  %v4476_v23 = vrot.slane %v7777_v40, 5  ;;  %v8614_v36 = vshll.u32 %v7315_v12, 16  ;;  %v5661_v19 = vrot.slane %v5645_v10, 9  ;;  %v5648_v15 = vld [vmem:[%s6938_s11 + $0x54] sm:$0xe] }
 0x102   : > { %v4473_v53 = vsel %vm7122_vm7, %v4471_v45, %v4472_v33  ;;  %v4483_v38 = vrot.slane %v7818_v34, 5  ;;  %v8615_v52 = vor.u32 %v7327_v1, %v7317_v63  ;;  %6291 = vmatmul.mubr.msk.bf16.gmra.mrb[24].mxu0 %vm309_vm1, %v5624_v22  ;;  %v4479_v12 = vrot.slane %v7780_v26, 5 }
 0x103   : > { %v8150_v0 = vrot.slane %v8614_v36, 5  ;;  %v4103_v40 = vrot.slane %v4102_v2, 4  ;;  %6294 = vmatprep.mubr.msk.bf16.mxu0 %vm309_vm1, %v5625_v18  ;;  %v4098_v34 = vsel %vm6995_vm4, %v4093_v35, %v4097_v4  ;;  %v5676_v17 = vcombine.low %v4470_v44, %v4473_v53  ;;  %v5375_v44 = vld [vmem:[%s6938_s11 + $0x6c] sm:$0xf] }
 0x104   : > { %v8159_v56 = vrot.slane %v8615_v52, 4  ;;  %v8171_v1 = vsel %vm7122_vm7, %v5660_v9, %v4476_v23  ;;  %v4478_v5 = vrot.slane %v4476_v23, 4  ;;  %v5662_v60 = vrot.slane %v5646_v39, 9  ;;  %v6731_v39 = vld [vmem:[%s6938_s11 + $0x78] sm:$0xff]  }
 0x105   : > { %v4108_v22 = vsel %vm6995_vm4, %v4103_v40, %v4107_v31  ;;  %v4490_v26 = vrot.slane %v7844_v51, 5  ;;  %v4493_v37 = vrot.slane %v7855_v43, 5  ;;  %v8180_v33 = vsel %vm7122_vm7, %v5661_v19, %v4483_v38  ;;  %v5378_v19 = vld [vmem:[%s6938_s11 + $0x78] sm:$0xf]  ;;  %v6740_v40 = vld [vmem:[%s6938_s11 + $0x70] sm:$0xf] }
 0x106   : > { %v4485_v4 = vrot.slane %v4483_v38, 4  ;;  %v4486_v10 = vrot.slane %v7830_v25, 5  ;;  %v5663_v41 = vrot.slane %v5647_v8, 9  ;;  %v5626_v45 = vcombine.low %v4098_v34, %v4108_v22  ;;  %v6732_v8 = vld [vmem:[%s6938_s11 + $0x84] sm:$0xff]  }
 0x107   : > { %6143 = vmatmul.mubr.msk.bf16.gmra.mrb[12].mxu1 %vm309_vm1, %v6729_v3  ;;  %v4480_v31 = vsel %vm7122_vm7, %v4478_v5, %v4479_v12  ;;  %v8189_v51 = vsel %vm7122_vm7, %v5662_v60, %v4490_v26  ;;  %v4492_v43 = vrot.slane %v4490_v26, 4  ;;  %v4497_v9 = vrot.slane %v7894_v61, 5  ;;  %v5649_v60 = vld [vmem:[%s6938_s11 + $0x60] sm:$0xe] }
 0x108   : > { %6146 = vmatprep.mubr.msk.bf16.mxu1 %vm309_vm1, %v6730_v6  ;;  %v4500_v25 = vrot.slane %v7897_v55, 5  ;;  %v5664_v18 = vrot.slane %v5648_v15, 9  ;;  %v4504_v35 = vrot.slane %v7916_v59, 5  ;;  %v4507_v23 = vrot.slane %v7923_v48, 5 }
 0x109   : > { %v8197_v2 = vsel %vm7122_vm7, %v4492_v43, %v4493_v37  ;;  %v2360_v36 = vshrl.u32 %v5375_v44, 16  ;;  %v2363_v53 = vshll.u32 %v5375_v44, 16  ;;  %v4487_v38 = vsel %vm7122_vm7, %v4485_v4, %v4486_v10 }
 0x10a   : > { %v5679_v61 = vcombine.low %v8189_v51, %v8197_v2  ;;  %v8207_v55 = vsel %vm7122_vm7, %v5663_v41, %v4497_v9  ;;  %v4499_v59 = vrot.slane %v4497_v9, 4  ;;  %6295 = vmatmul.mubr.msk.bf16.gmra.mrb[28].mxu0 %vm309_vm1, %v5626_v45  ;;  %v8213_v48 = vsel %vm7122_vm7, %v5664_v18, %v4504_v35  ;;  %v6741_v45 = vld [vmem:[%s6938_s11 + $0x74] sm:$0x1] }
 0x10b   : > { %v4506_v52 = vrot.slane %v4504_v35, 4  ;;  %v2362_v3 = vrot.slane %v2360_v36, 4  ;;  %v2369_v12 = vshll.u32 %v6740_v40, 16  ;;  %6300 = vmatprep.mubr.msk.bf16.mxu0 %vm309_vm1, %v5676_v17  ;;  %v2365_v34 = vrot.slane %v2363_v53, 5  ;;  %v5650_v17 = vld [vmem:[%s6938_s11 + $0x6c] sm:$0xe] }
 0x10c   : > { %v8220_v6 = vsel %vm7122_vm7, %v4499_v59, %v4500_v25  ;;  %v2373_v5 = vshrl.u32 %v6740_v40, 16  ;;  %v2384_v22 = vshrl.u32 %v5378_v19, 16  ;;  %v5677_v26 = vcombine.low %v8171_v1, %v4480_v31  ;;  %v5381_v25 = vld [vmem:[%s6938_s11 + $0x84] sm:$0xf] }
 0x10d   : > { %v5678_v37 = vcombine.low %v8180_v33, %v4487_v38  ;;  %v5680_v15 = vcombine.low %v8207_v55, %v8220_v6  ;;  %v8229_v4 = vsel %vm7122_vm7, %v4506_v52, %v4507_v23  ;;  %v8234_v41 = vrot.slane %v2369_v12, 5 }
 0x10e   : > { %v5681_v10 = vcombine.low %v8213_v48, %v8229_v4  ;;  %v2375_v44 = vrot.slane %v2373_v5, 4  ;;  %v2379_v43 = vshll.u32 %v6741_v45, 16  ;;  %v2386_v1 = vrot.slane %v2384_v22, 4  ;;  %v5384_v22 = vld [vmem:[%s6938_s11 + $0x90] sm:$0xf] }
 0x10f   : > { %6147 = vmatmul.mubr.msk.bf16.gmra.mrb[16].mxu1 %vm309_vm1, %v6731_v39  ;;  %v2387_v33 = vshll.u32 %v5378_v19, 16  ;;  %v2406_v31 = vsel %vm6995_vm4, %v8159_v56, %v8150_v0  ;;  %v5665_v9 = vrot.slane %v5649_v60, 9  ;;  %v2366_v18 = vor.u32 %v2365_v34, %v2362_v3  ;;  %v6734_v3 = vld [vmem:[%s6938_s11 + $0x9c] sm:$0xff]   ;;  %v6742_v34 = vld [vmem:[%s6938_s11 + $0x88] sm:$0xf] }
 0x110   : > { %6150 = vmatprep.mubr.msk.bf16.mxu1 %vm309_vm1, %v6732_v8  ;;  %v4511_v35 = vrot.slane %v7946_v13, 5  ;;  %v4514_v23 = vrot.slane %v7950_v30, 5  ;;  %v5666_v36 = vrot.slane %v5650_v17, 9  ;;  %v4518_v19 = vrot.slane %v7967_v62, 5  ;;  %v6733_v13 = vld [vmem:[%s6938_s11 + $0x90] sm:$0xff]  }
 0x111   : > { %v2389_v53 = vrot.slane %v2387_v33, 5  ;;  %v4521_v38 = vrot.slane %v7978_v57, 5  ;;  %v2376_v59 = vor.u32 %v2375_v44, %v8234_v41  ;;  %v2408_v39 = vshrl.u32 %v5381_v25, 16 }
 0x112   : > { %v8251_v0 = vsel %vm7122_vm7, %v5665_v9, %v4511_v35  ;;  %v4513_v56 = vrot.slane %v4511_v35, 4  ;;  %6301 = vmatmul.mubr.msk.bf16.vlgmr.msra.gmra.mrb[0].mxu0 %vm309_vm1, %v5677_v26  ;;  %v8257_v52 = vsel %vm7122_vm7, %v5666_v36, %v4518_v19  ;;  %v4520_v62 = vrot.slane %v4518_v19, 4  ;;  %v6743_v36 = vld [vmem:[%s6938_s11 + $0x8c] sm:$0x1]  ;;  %v6744_v19 = vld [vmem:[%s6938_s11 + $0x94] sm:$0xf] }
 0x113   : > { %v2390_v30 = vor.u32 %v2389_v53, %v2386_v1  ;;  %v2411_v57 = vshll.u32 %v5381_v25, 16  ;;  %6304 = vmatprep.mubr.msk.bf16.mxu0 %vm309_vm1, %v5678_v37  ;;  %v8261_v40 = vrot.slane %v2366_v18, 4  ;;  %v8263_v12 = vrot.slane %v2379_v43, 5 }
 0x114   : > { %v8267_v8 = vsel %vm7122_vm7, %v4513_v56, %v4514_v23  ;;  %v2417_v5 = vshll.u32 %v6742_v34, 16  ;;  %v8275_v17 = vsel %vm7122_vm7, %v4520_v62, %v4521_v38  ;;  %v2410_v37 = vrot.slane %v2408_v39, 4  ;;  %v5651_v56 = vld [vmem:[%s6938_s11 + $0x78] sm:$0xe] }
 0x115   : > { %v2391_v60 = vrot.slane %v2390_v30, 4  ;;  %v5682_v26 = vcombine.low %v8251_v0, %v8267_v8  ;;  %v5683_v44 = vcombine.low %v8257_v52, %v8275_v17  ;;  %v2413_v45 = vrot.slane %v2411_v57, 5  ;;  %v6745_v57 = vld [vmem:[%s6938_s11 + $0x98] sm:$0x1]  ;;  %v6748_v0 = vld [vmem:[%s6938_s11 + $0xa4] sm:$0x1] }
 0x116   : > { %v8279_v43 = vrot.slane %v2417_v5, 5  ;;  %v2421_v1 = vshrl.u32 %v6742_v34, 16  ;;  %v2377_v33 = vrot.slane %v2376_v59, 4  ;;  %v2432_v25 = vshrl.u32 %v5384_v22, 16 }
 0x117   : > { %6151 = vmatmul.mubr.msk.bf16.gmra.mrb[20].mxu1 %vm309_vm1, %v6733_v13  ;;  %v2396_v9 = vsel %vm6995_vm4, %v2391_v60, %v7317_v63  ;;  %v2435_v18 = vshll.u32 %v5384_v22, 16  ;;  %v2427_v53 = vshll.u32 %v6743_v36, 16  ;;  %v2441_v38 = vshll.u32 %v6744_v19, 16 }
 0x118   : > { %6154 = vmatprep.mubr.msk.bf16.mxu1 %vm309_vm1, %v6734_v3  ;;  %v8286_v35 = vcombine.low %v2396_v9, %v2406_v31  ;;  %v2423_v23 = vrot.slane %v2421_v1, 4  ;;  %v2414_v59 = vor.u32 %v2413_v45, %v2410_v37  ;;  %v2434_v39 = vrot.slane %v2432_v25, 4  ;;  %v6735_v31 = vld [vmem:[%s6938_s11 + $0xa8] sm:$0xff]   ;;  %v5652_v37 = vld [vmem:[%s6938_s11 + $0x84] sm:$0xe]  ;;  %v6736_v45 = vld [vmem:[%s6938_s11 + $0xb4] sm:$0xff]  }
 0x119   : > { %v2437_v13 = vrot.slane %v2435_v18, 5  ;;  %v2445_v63 = vshrl.u32 %v6744_v19, 16  ;;  %v8292_v62 = vrot.slane %v2441_v38, 5  ;;  %v2451_v3 = vshll.u32 %v6745_v57, 16 }
 0x11a   : > { %v2424_v30 = vor.u32 %v2423_v23, %v8279_v43  ;;  %6305 = vmatmul.mubr.msk.bf16.gmra.mrb[4].mxu0 %vm309_vm1, %v5679_v61  ;;  %v5667_v22 = vrot.slane %v5651_v56, 9  ;;  %v4525_v60 = vrot.slane %v7988_v46, 5  ;;  %v2372_v51 = vsel %vm6995_vm4, %v8261_v40, %v8234_v41  ;;  %v6746_v56 = vld [vmem:[%s6938_s11 + $0xa0] sm:$0xf] }
 0x11b   : > { %v2438_v34 = vor.u32 %v2437_v13, %v2434_v39  ;;  %v2447_v5 = vrot.slane %v2445_v63, 4  ;;  %6308 = vmatprep.mubr.msk.bf16.mxu0 %vm309_vm1, %v5680_v15  ;;  %v2382_v2 = vsel %vm6995_vm4, %v2377_v33, %v8263_v12  ;;  %v2429_v61 = vrot.slane %v2427_v53, 5  ;;  %v5387_v15 = vld [vmem:[%s6938_s11 + $0x9c] sm:$0xf]  ;;  %v5390_v13 = vld [vmem:[%s6938_s11 + $0xa8] sm:$0xf] }
 0x11c   : > { %v4528_v1 = vrot.slane %v7996_v32, 5  ;;  %v2415_v46 = vrot.slane %v2414_v59, 4  ;;  %v8318_v55 = vsel %vm7122_vm7, %v5667_v22, %v4525_v60  ;;  %v4527_v6 = vrot.slane %v4525_v60, 4 }
 0x11d   : > { %v2448_v9 = vor.u32 %v2447_v5, %v8292_v62  ;;  %v2425_v25 = vrot.slane %v2424_v30, 4  ;;  %v5668_v18 = vrot.slane %v5652_v37, 9  ;;  %v4532_v41 = vrot.slane %v8004_v7, 5  ;;  %v5653_v37 = vld [vmem:[%s6938_s11 + $0x90] sm:$0xe] }
 0x11e   : > { %v4535_v40 = vrot.slane %v8018_v54, 5  ;;  %v2439_v32 = vrot.slane %v2438_v34, 4  ;;  %v2453_v33 = vrot.slane %v2451_v3, 5  ;;  %v8326_v23 = vsel %vm7122_vm7, %v4527_v6, %v4528_v1  ;;  %v5654_v1 = vld [vmem:[%s6938_s11 + $0x9c] sm:$0xe] }
 0x11f   : > { %6155 = vmatmul.mubr.msk.bf16.gmra.mrb[24].mxu1 %vm309_vm1, %v6735_v31  ;;  %v2449_v12 = vrot.slane %v2448_v9, 4  ;;  %v5684_v36 = vcombine.low %v8318_v55, %v8326_v23  ;;  %v8333_v7 = vsel %vm7122_vm7, %v5668_v18, %v4532_v41  ;;  %v4534_v54 = vrot.slane %v4532_v41, 4  ;;  %v6737_v31 = vld [vmem:[%s6938_s11 + $0xc0] sm:$0xff]  }
 0x120   : > { %6158 = vmatprep.mubr.msk.bf16.mxu1 %vm309_vm1, %v6736_v45  ;;  %v2456_v53 = vshrl.u32 %v5387_v15, 16  ;;  %v5408_v19 = vcombine.low %v2372_v51, %v2382_v2  ;;  %v2459_v38 = vshll.u32 %v5387_v15, 16  ;;  %v2465_v59 = vshll.u32 %v6746_v56, 16  ;;  %v6747_v51 = vld [vmem:[%s6938_s11 + $0xac] sm:$0xf] }
 0x121   : > { %v2469_v39 = vshrl.u32 %v6746_v56, 16  ;;  %v2420_v63 = vsel %vm6995_vm4, %v2415_v46, %v8279_v43  ;;  %v2430_v30 = vsel %vm6995_vm4, %v2425_v25, %v2429_v61  ;;  %v8344_v57 = vsel %vm7122_vm7, %v4534_v54, %v4535_v40  ;;  %v5393_v54 = vld [vmem:[%s6938_s11 + $0xb4] sm:$0xf] }
 0x122   : > { %v2458_v3 = vrot.slane %v2456_v53, 4  ;;  %6309 = vmatmul.mubr.msk.bf16.gmra.mrb[8].mxu0 %vm309_vm1, %v5681_v10  ;;  %v5685_v34 = vcombine.low %v8333_v7, %v8344_v57  ;;  %v2461_v43 = vrot.slane %v2459_v38, 5  ;;  %v8353_v5 = vrot.slane %v2465_v59, 5 }
 0x123   : > { %v2471_v22 = vrot.slane %v2469_v39, 4  ;;  %6312 = vmatprep.mubr.msk.bf16.mxu0 %vm309_vm1, %v5682_v26  ;;  %v2444_v48 = vsel %vm6995_vm4, %v2439_v32, %v8292_v62  ;;  %v2454_v4 = vsel %vm6995_vm4, %v2449_v12, %v2453_v33  ;;  %v2480_v10 = vshrl.u32 %v5390_v13, 16  ;;  %v6749_v26 = vld [vmem:[%s6938_s11 + $0xb0] sm:$0x1] }
 0x124   : > { %v2483_v60 = vshll.u32 %v5390_v13, 16  ;;  %v2462_v45 = vor.u32 %v2461_v43, %v2458_v3  ;;  %v2489_v2 = vshll.u32 %v6747_v51, 16  ;;  %v2493_v61 = vshrl.u32 %v6747_v51, 16 }
 0x125   : > { %v2472_v46 = vor.u32 %v2471_v22, %v8353_v5  ;;  %v2475_v8 = vshll.u32 %v6748_v0, 16  ;;  %v2499_v9 = vshll.u32 %v6749_v26, 16  ;;  %v5410_v62 = vcombine.low %v2420_v63, %v2430_v30 }
 0x126   : > { %v8371_v55 = vcombine.low %v2444_v48, %v2454_v4  ;;  %v2482_v6 = vrot.slane %v2480_v10, 4  ;;  %v5669_v15 = vrot.slane %v5653_v37, 9  ;;  %v2485_v25 = vrot.slane %v2483_v60, 5  ;;  %v6751_v10 = vld [vmem:[%s6938_s11 + $0xbc] sm:$0x1] }
 0x127   : > { %6159 = vmatmul.mubr.msk.bf16.gmra.mrb[28].mxu1 %vm309_vm1, %v6737_v31  ;;  %v4539_v18 = vrot.slane %v8025_v28, 5  ;;  %v4542_v41 = vrot.slane %v8035_v49, 5  ;;  %v5670_v40 = vrot.slane %v5654_v1, 9  ;;  %v2463_v32 = vrot.slane %v2462_v45, 4 }
 0x128   : > { %6180 = vmatprep.mubr.msk.bf16.mxu1 %vm309_vm1, %v5408_v19  ;;  %v8376_v12 = vrot.slane %v2489_v2, 5  ;;  %v2495_v33 = vrot.slane %v2493_v61, 4  ;;  %v4546_v23 = vrot.slane %v8042_v20, 5  ;;  %v2473_v53 = vrot.slane %v2472_v46, 4  ;;  %v6752_v2 = vld [vmem:[%s6938_s11 + $0xc4] sm:$0xf] }
 0x129   : > { %v2477_v38 = vrot.slane %v2475_v8, 5  ;;  %v8380_v56 = vrot.slane %v2499_v9, 5  ;;  %v4541_v19 = vrot.slane %v4539_v18, 4  ;;  %v4540_v28 = vsel %vm7122_vm7, %v5669_v15, %v4539_v18  ;;  %v5655_v46 = vld [vmem:[%s6938_s11 + $0xa8] sm:$0xe] }
 0x12a   : > { %6313 = vmatmul.mubr.msk.bf16.gmra.mrb[12].mxu0 %vm309_vm1, %v5683_v44  ;;  %v8390_v49 = vsel %vm7122_vm7, %v5670_v40, %v4546_v23  ;;  %v4548_v20 = vrot.slane %v4546_v23, 4  ;;  %v4549_v59 = vrot.slane %v8054_v11, 5  ;;  %v2486_v39 = vor.u32 %v2485_v25, %v2482_v6  ;;  %v5396_v44 = vld [vmem:[%s6938_s11 + $0xc0] sm:$0xf]  ;;  %v6750_v11 = vld [vmem:[%s6938_s11 + $0xb8] sm:$0xf] }
 0x12b   : > { %6316 = vmatprep.mubr.msk.bf16.mxu0 %vm309_vm1, %v5684_v36  ;;  %v4543_v13 = vsel %vm7122_vm7, %v4541_v19, %v4542_v41  ;;  %v2504_v52 = vshrl.u32 %v5393_v54, 16  ;;  %v2507_v17 = vshll.u32 %v5393_v54, 16  ;;  %v2468_v63 = vsel %vm6995_vm4, %v2463_v32, %v8353_v5 }
 0x12c   : > { %v2496_v30 = vor.u32 %v2495_v33, %v8376_v12  ;;  %v8403_v3 = vsel %vm7122_vm7, %v4548_v20, %v4549_v59  ;;  %v2513_v36 = vshll.u32 %v6750_v11, 16  ;;  %v5686_v31 = vcombine.low %v4540_v28, %v4543_v13  ;;  %v5657_v20 = vld [vmem:[%s6938_s11 + $0xc0] sm:$0xe] }
 0x12d   : > { %v5687_v43 = vcombine.low %v8390_v49, %v8403_v3  ;;  %v2506_v22 = vrot.slane %v2504_v52, 4  ;;  %v2509_v48 = vrot.slane %v2507_v17, 5  ;;  %v2517_v4 = vshrl.u32 %v6750_v11, 16  ;;  %v5658_v52 = vld [vmem:[%s6938_s11 + $0xcc] sm:$0xe] }
 0x12e   : > { %v2515_v5 = vrot.slane %v2513_v36, 5  ;;  %v2523_v60 = vshll.u32 %v6751_v10, 16  ;;  %v2528_v37 = vshrl.u32 %v5396_v44, 16  ;;  %v2531_v51 = vshll.u32 %v5396_v44, 16 }
 0x12f   : > { %6181 = vmatmul.mubr.msk.bf16.vlgmr.msra.gmra.mrb[16].mxu1 %vm309_vm1, %v8286_v35  ;;  %v2510_v45 = vor.u32 %v2509_v48, %v2506_v22  ;;  %v2537_v61 = vshll.u32 %v6752_v2, 16  ;;  %v2541_v1 = vshrl.u32 %v6752_v2, 16  ;;  %v2478_v0 = vsel %vm6995_vm4, %v2473_v53, %v2477_v38  ;;  %v6753_v53 = vld [vmem:[%s6938_s11 + $0xc8] sm:$0x1] }
 0x130   : > { %6184 = vmatprep.mubr.msk.bf16.mxu1 %vm309_vm1, %v5410_v62  ;;  %v2487_v8 = vrot.slane %v2486_v39, 4  ;;  %v2497_v26 = vrot.slane %v2496_v30, 4  ;;  %v2519_v35 = vrot.slane %v2517_v4, 4  ;;  %v2530_v6 = vrot.slane %v2528_v37, 4 }
 0x131   : > { %v2511_v9 = vrot.slane %v2510_v45, 4  ;;  %v2533_v15 = vrot.slane %v2531_v51, 5  ;;  %v2539_v25 = vrot.slane %v2537_v61, 5  ;;  %v2543_v18 = vrot.slane %v2541_v1, 4 }
 0x132   : > { %6317 = vmatmul.mubr.msk.bf16.gmra.mrb[16].mxu0 %vm309_vm1, %v5685_v34  ;;  %v2520_v62 = vor.u32 %v2519_v35, %v2515_v5  ;;  %v5671_v41 = vrot.slane %v5655_v46, 9  ;;  %v4553_v40 = vrot.slane %v8067_v27, 5  ;;  %v5412_v32 = vcombine.low %v2468_v63, %v2478_v0  ;;  %v5656_v34 = vld [vmem:[%s6938_s11 + $0xb4] sm:$0xe]  ;;  %s8500_s11 = scalar_lea.vmem [#allocation2], %s5169_s10 }
 0x133   : > { %6320 = vmatprep.mubr.msk.bf16.mxu0 %vm309_vm1, %v5686_v31  ;;  %v2525_v33 = vrot.slane %v2523_v60, 5  ;;  %v4556_v23 = vrot.slane %v8072_v58, 5  ;;  %v2547_v38 = vshll.u32 %v6753_v53, 16  ;;  %v2492_v19 = vsel %vm6995_vm4, %v2487_v8, %v8376_v12  ;;  %s5081_s19 = sshll.u32 %s8500_s11, 4  ;;  %s8552_s19 = int_to_ptr.vmem [resolvable:$true] %s5081_s19 }
 0x134   : > { %v2521_v54 = vrot.slane %v2520_v62, 4  ;;  %v4554_v7 = vsel %vm7122_vm7, %v5671_v41, %v4553_v40  ;;  %v4555_v57 = vrot.slane %v4553_v40, 4  ;;  %v2502_v27 = vsel %vm6995_vm4, %v2497_v26, %v8380_v56  ;;  %s6754_s27 = scalar_lea.vmem %s8552_s19, 2048  ;;  %p6761_p1 = scmp.lt.s32.totalorder %s8552_s19, %s6759_s29 }
 0x135   : > { %v2516_v58 = vsel %vm6995_vm4, %v2511_v9, %v2515_v5  ;;  %v4560_v28 = vrot.slane %v8084_v16, 5  ;;  %v2534_v59 = vor.u32 %v2533_v15, %v2530_v6  ;;  %v2544_v39 = vor.u32 %v2543_v18, %v2539_v25  ;;  %p6755_p12 = scmp.ne.s32.totalorder %s8552_s19, %s6754_s27  ;;  %p6762_p2 = scmp.lt.s32.totalorder %s6760_s30, %s6754_s27 }
 0x136   : > { %v4557_v13 = vsel %vm7122_vm7, %v4555_v57, %v4556_v23  ;;  %v4567_v12 = vrot.slane %v8102_v24, 5  ;;  %v2526_v56 = vsel %vm6995_vm4, %v2521_v54, %v2525_v33  ;;  %v5672_v44 = vrot.slane %v5656_v34, 9 }
 0x137   : > { %6185 = vmatmul.mubr.msk.bf16.gmra.mrb[20].mxu1 %vm309_vm1, %v8371_v55  ;;  %v5688_v17 = vcombine.low %v4554_v7, %v4557_v13  ;;  %v4563_v16 = vrot.slane %v8089_v50, 5  ;;  %v5413_v63 = vcombine.low %v2492_v19, %v2502_v27  ;;  %v2549_v30 = vrot.slane %v2547_v38, 5  ;;  %p6756_p13 = pnand %p6755_p12, %p6897_p4  ;;  %p6763_p3 = por %p6762_p2, %p6761_p1 }
 0x138   : > { %6188 = vmatprep.mubr.msk.bf16.mxu1 %vm309_vm1, %v5412_v32  ;;  %v4562_v55 = vrot.slane %v4560_v28, 4  ;;  %v5673_v11 = vrot.slane %v5657_v20, 9  ;;  %v4569_v36 = vrot.slane %v4567_v12, 4  ;;  %v4570_v31 = vrot.slane %v8105_v21, 5  ;;  %v8488_v32 = vld [vmem:[%s8606_s2] ss:$0 sm:$0xff] }
 0x139   : > { %v5674_v22 = vrot.slane %v5658_v52, 9  ;;  %v4574_v24 = vrot.slane %v8118_v14, 5  ;;  %v5414_v48 = vcombine.low %v2516_v58, %v2526_v56  ;;  %v2535_v5 = vrot.slane %v2534_v59, 4  ;;  %p6757_p0 = pneg %p6756_p13 }
 0x13a   : > { %6321 = vmatmul.mubr.msk.bf16.gmra.mrb[20].mxu0 %vm309_vm1, %v5687_v43  ;;  %v2545_v4 = vrot.slane %v2544_v39, 4  ;;  %v4577_v50 = vrot.slane %v8121_v29, 5  ;;  %v4561_v10 = vsel %vm7122_vm7, %v5672_v44, %v4560_v28  ;;  %v4564_v21 = vsel %vm7122_vm7, %v4562_v55, %v4563_v16 }
 0x13b   : > { %6324 = vmatprep.mubr.msk.bf16.mxu0 %vm309_vm1, %v5688_v17  ;;  %v4575_v14 = vsel %vm7122_vm7, %v5674_v22, %v4574_v24  ;;  %v4576_v60 = vrot.slane %v4574_v24, 4  ;;  %v4568_v49 = vsel %vm7122_vm7, %v5673_v11, %v4567_v12  ;;  %v4571_v3 = vsel %vm7122_vm7, %v4569_v36, %v4570_v31  ;;  %p6764_p5 = pnand %p6763_p3, %p6757_p0 }
 0x13c   : > { %v5689_v43 = vcombine.low %v4561_v10, %v4564_v21  ;;  %v2540_v45 = vsel %vm6995_vm4, %v2535_v5, %v2539_v25  ;;  %v2550_v51 = vsel %vm6995_vm4, %v2545_v4, %v2549_v30  ;;  %v5690_v2 = vcombine.low %v4568_v49, %v4571_v3 }
 0x13d   : > { %v4578_v29 = vsel %vm7122_vm7, %v4576_v60, %v4577_v50  ;;  %v5415_v61 = vcombine.low %v2540_v45, %v2550_v51 }
 0x13e   : > { %v5691_v37 = vcombine.low %v4575_v14, %v4578_v29 }
 0x13f   : > { %6189 = vmatmul.mubr.msk.bf16.gmra.mrb[24].mxu1 %vm309_vm1, %v5413_v63 }
 0x140   : > { %6192 = vmatprep.mubr.msk.bf16.mxu1 %vm309_vm1, %v5414_v48 }
 0x142   : > { %6325 = vmatmul.mubr.msk.bf16.gmra.mrb[24].mxu0 %vm309_vm1, %v5689_v43 }
 0x143   : > { %6328 = vmatprep.mubr.msk.bf16.mxu0 %vm309_vm1, %v5690_v2 }
 0x147   : > { %6193 = vmatmul.mubr.msk.bf16.gmra.mrb[28].mxu1 %vm309_vm1, %v5415_v61 }
 0x14a   : > { %6329 = vmatmul.mubr.msk.bf16.gmra.mrb[28].mxu0 %vm309_vm1, %v5691_v37 }
 0x1c2   : > { %v6132_v47 = vpop.f32.mrb[0].mxu1 }
 0x1c3   : > { %v1960_v1 = vpop.f32.mrb[1].mxu1  ;;  %v6334_v33 = vadd.f32 %v6132_v47, %v8488_v32 }
 0x1c4   : > { %v6133_v46 = vpop.f32.mrb[2].mxu1  ;;  %v6336_v23 = vadd.f32 %v8488_v32, %v1960_v1 }
 0x1c5   : > { %v1963_v0 = vpop.f32.mrb[3].mxu1  ;;  %v6338_v53 = vadd.f32 %v6133_v46, %v8488_v32 }
 0x1c6   : > { %v6340_v57 = vadd.f32 %v8488_v32, %v1963_v0 }
 0x1ca   : > { %v6136_v8 = vpop.f32.mrb[4].mxu1 }
 0x1cb   : > { %v1976_v26 = vpop.f32.mrb[5].mxu1  ;;  %v6342_v12 = vadd.f32 %v6136_v8, %v8488_v32 }
 0x1cc   : > { %v6137_v35 = vpop.f32.mrb[6].mxu1  ;;  %v6344_v56 = vadd.f32 %v8488_v32, %v1976_v26 }
 0x1cd   : > { %v1979_v42 = vpop.f32.mrb[7].mxu1  ;;  %v6346_v16 = vadd.f32 %v6137_v35, %v8488_v32 }
 0x1ce   : > { %v6348_v55 = vadd.f32 %v8488_v32, %v1979_v42 }
 0x1d2   : > { %v6140_v9 = vpop.f32.mrb[8].mxu1 }
 0x1d3   : > { %v1992_v6 = vpop.f32.mrb[9].mxu1  ;;  %v6350_v10 = vadd.f32 %v6140_v9, %v8488_v32 }
 0x1d4   : > { %v6141_v15 = vpop.f32.mrb[10].mxu1  ;;  %v6352_v14 = vadd.f32 %v8488_v32, %v1992_v6 }
 0x1d5   : > { %v1995_v25 = vpop.f32.mrb[11].mxu1  ;;  %v6354_v3 = vadd.f32 %v6141_v15, %v8488_v32 }
 0x1d6   : > { %v6356_v37 = vadd.f32 %v8488_v32, %v1995_v25 }
 0x1da   : > { %v8477_v62 = vpop.f32.mrb[12].mxu1 }
 0x1db   : > { %v8479_v18 = vpop.f32.mrb[13].mxu1  ;;  %v6358_v26 = vadd.f32 %v8477_v62, %v8488_v32 }
 0x1dc   : > { %v8481_v41 = vpop.f32.mrb[14].mxu1  ;;  %v6360_v42 = vadd.f32 %v8488_v32, %v8479_v18 }
 0x1dd   : > { %v8483_v40 = vpop.f32.mrb[15].mxu1  ;;  %v6362_v15 = vadd.f32 %v8481_v41, %v8488_v32 }
 0x1e5   : > { %v6302_v54 = vpop.f32.mrb[0].mxu0 }
 0x1e6   : > { %v6335_v38 = vadd.f32 %v6334_v33, %v6302_v54  ;;  %v4714_v7 = vpop.f32.mrb[1].mxu0 }
 0x1e7   : > { %v6337_v34 = vadd.f32 %v6336_v23, %v4714_v7  ;;  %v6303_v19 = vpop.f32.mrb[2].mxu0  ;;  %v6364_v23 = vadd.f32 %v8488_v32, %v8483_v40 }
 0x1e8   : > { %v6339_v27 = vadd.f32 %v6338_v53, %v6303_v19  ;;  %v4717_v58 = vpop.f32.mrb[3].mxu0  ;;  %v4875_v20 = vmax.f32 %v6335_v38, 0.0 }
 0x1e9   : > { %v6341_v28 = vadd.f32 %v6340_v57, %v4717_v58  ;;  %v4873_v39 = vmax.f32 %v6337_v34, 0.0 }
 0x1ea   : > { %v4876_v59 = vmax.f32 %v6339_v27, 0.0 }
 0x1eb   : > { %v4874_v13 = vmax.f32 %v6341_v28, 0.0 }
 0x1ec   : > { %v5786_v52 = vpack.c.bf16 %v4876_v59, %v4875_v20 }
 0x1ed   : > { %v5781_v17 = vpack.c.bf16 %v4874_v13, %v4873_v39  ;;  %v6306_v44 = vpop.f32.mrb[4].mxu0 }
 0x1ee   : > { %5858 = vst [vmem:[%s8500_s11 + $0x8] sm:$0xff] %v5786_v52   ;;  %v6343_v63 = vadd.f32 %v6342_v12, %v6306_v44  ;;  %v4730_v30 = vpop.f32.mrb[5].mxu0 }
 0x1ef   : > { %5782 = vst [vmem:[%s8500_s11] sm:$0xff] %v5781_v17   ;;  %v6345_v11 = vadd.f32 %v6344_v56, %v4730_v30  ;;  %v6307_v36 = vpop.f32.mrb[6].mxu0 }
 0x1f0   : > { %v6347_v31 = vadd.f32 %v6346_v16, %v6307_v36  ;;  %v4733_v22 = vpop.f32.mrb[7].mxu0  ;;  %v4879_v48 = vmax.f32 %v6343_v63, 0.0 }
 0x1f1   : > { %v6349_v24 = vadd.f32 %v6348_v55, %v4733_v22  ;;  %v4877_v4 = vmax.f32 %v6345_v11, 0.0 }
 0x1f2   : > { %v4880_v5 = vmax.f32 %v6347_v31, 0.0 }
 0x1f3   : > { %v4878_v50 = vmax.f32 %v6349_v24, 0.0 }
 0x1f4   : > { %v5796_v21 = vpack.c.bf16 %v4880_v5, %v4879_v48 }
 0x1f5   : > { %v5791_v60 = vpack.c.bf16 %v4878_v50, %v4877_v4  ;;  %v6310_v49 = vpop.f32.mrb[8].mxu0 }
 0x1f6   : > { %5860 = vst [vmem:[%s8500_s11 + $0x18] sm:$0xff] %v5796_v21   ;;  %v6351_v29 = vadd.f32 %v6350_v10, %v6310_v49  ;;  %v4746_v43 = vpop.f32.mrb[9].mxu0 }
 0x1f7   : > { %5859 = vst [vmem:[%s8500_s11 + $0x10] sm:$0xff] %v5791_v60   ;;  %v6353_v45 = vadd.f32 %v6352_v14, %v4746_v43  ;;  %v6311_v51 = vpop.f32.mrb[10].mxu0 }
 0x1f8   : > { %v6355_v2 = vadd.f32 %v6354_v3, %v6311_v51  ;;  %v4749_v61 = vpop.f32.mrb[11].mxu0  ;;  %v4883_v1 = vmax.f32 %v6351_v29, 0.0 }
 0x1f9   : > { %v6357_v47 = vadd.f32 %v6356_v37, %v4749_v61  ;;  %v4881_v0 = vmax.f32 %v6353_v45, 0.0 }
 0x1fa   : > { %v4884_v46 = vmax.f32 %v6355_v2, 0.0 }
 0x1fb   : > { %v4882_v8 = vmax.f32 %v6357_v47, 0.0 }
 0x1fc   : > { %v5806_v35 = vpack.c.bf16 %v4884_v46, %v4883_v1 }
 0x1fd   : > { %v5801_v9 = vpack.c.bf16 %v4882_v8, %v4881_v0  ;;  %v6314_v6 = vpop.f32.mrb[12].mxu0 }
 0x1fe   : > { %5862 = vst [vmem:[%s8500_s11 + $0x28] sm:$0xff] %v5806_v35   ;;  %v6359_v25 = vadd.f32 %v6358_v26, %v6314_v6  ;;  %v4762_v33 = vpop.f32.mrb[13].mxu0 }
 0x1ff   : > { %5861 = vst [vmem:[%s8500_s11 + $0x20] sm:$0xff] %v5801_v9   ;;  %v6361_v54 = vadd.f32 %v6360_v42, %v4762_v33  ;;  %v6315_v53 = vpop.f32.mrb[14].mxu0 }
 0x200   : > { %v6363_v38 = vadd.f32 %v6362_v15, %v6315_v53  ;;  %v4765_v62 = vpop.f32.mrb[15].mxu0  ;;  %v4887_v34 = vmax.f32 %v6359_v25, 0.0 }
 0x201   : > { %v6365_v57 = vadd.f32 %v6364_v23, %v4765_v62  ;;  %v4885_v41 = vmax.f32 %v6361_v54, 0.0 }
 0x202   : > { %v6182_v7 = vpop.f32.mrb[16].mxu1  ;;  %v4888_v19 = vmax.f32 %v6363_v38, 0.0 }
 0x203   : > { %v2750_v18 = vpop.f32.mrb[17].mxu1  ;;  %v4886_v58 = vmax.f32 %v6365_v57, 0.0  ;;  %v6366_v28 = vadd.f32 %v6182_v7, %v8488_v32 }
 0x204   : > { %v6183_v27 = vpop.f32.mrb[18].mxu1  ;;  %v5816_v59 = vpack.c.bf16 %v4888_v19, %v4887_v34  ;;  %v6368_v40 = vadd.f32 %v8488_v32, %v2750_v18 }
 0x205   : > { %v2753_v20 = vpop.f32.mrb[19].mxu1  ;;  %v5811_v39 = vpack.c.bf16 %v4886_v58, %v4885_v41  ;;  %v6318_v13 = vpop.f32.mrb[16].mxu0  ;;  %v6370_v12 = vadd.f32 %v6183_v27, %v8488_v32 }
 0x206   : > { %5864 = vst [vmem:[%s8500_s11 + $0x38] sm:$0xff] %v5816_v59   ;;  %v6367_v52 = vadd.f32 %v6366_v28, %v6318_v13  ;;  %v4778_v56 = vpop.f32.mrb[17].mxu0  ;;  %v6372_v17 = vadd.f32 %v8488_v32, %v2753_v20 }
 0x207   : > { %5863 = vst [vmem:[%s8500_s11 + $0x30] sm:$0xff] %v5811_v39   ;;  %v6369_v44 = vadd.f32 %v6368_v40, %v4778_v56  ;;  %v6319_v16 = vpop.f32.mrb[18].mxu0 }
 0x208   : > { %v6371_v63 = vadd.f32 %v6370_v12, %v6319_v16  ;;  %v4781_v30 = vpop.f32.mrb[19].mxu0  ;;  %v4891_v31 = vmax.f32 %v6367_v52, 0.0 }
 0x209   : > { %v6373_v11 = vadd.f32 %v6372_v17, %v4781_v30  ;;  %v4889_v48 = vmax.f32 %v6369_v44, 0.0 }
 0x20a   : > { %v6186_v55 = vpop.f32.mrb[20].mxu1  ;;  %v4892_v22 = vmax.f32 %v6371_v63, 0.0 }
 0x20b   : > { %v2766_v36 = vpop.f32.mrb[21].mxu1  ;;  %v4890_v5 = vmax.f32 %v6373_v11, 0.0  ;;  %v6374_v4 = vadd.f32 %v6186_v55, %v8488_v32 }
 0x20c   : > { %v6187_v24 = vpop.f32.mrb[22].mxu1  ;;  %v5826_v10 = vpack.c.bf16 %v4892_v22, %v4891_v31  ;;  %v6376_v21 = vadd.f32 %v8488_v32, %v2766_v36 }
 0x20d   : > { %v2769_v50 = vpop.f32.mrb[23].mxu1  ;;  %v5821_v14 = vpack.c.bf16 %v4890_v5, %v4889_v48  ;;  %v6322_v60 = vpop.f32.mrb[20].mxu0  ;;  %v6378_v49 = vadd.f32 %v6187_v24, %v8488_v32 }
 0x20e   : > { %5866 = vst [vmem:[%s8500_s11 + $0x48] sm:$0xff] %v5826_v10   ;;  %v6375_v3 = vadd.f32 %v6374_v4, %v6322_v60  ;;  %v4794_v29 = vpop.f32.mrb[21].mxu0  ;;  %v6380_v43 = vadd.f32 %v8488_v32, %v2769_v50 }
 0x20f   : > { %5865 = vst [vmem:[%s8500_s11 + $0x40] sm:$0xff] %v5821_v14   ;;  %v6377_v37 = vadd.f32 %v6376_v21, %v4794_v29  ;;  %v6323_v45 = vpop.f32.mrb[22].mxu0 }
 0x210   : > { %v6379_v51 = vadd.f32 %v6378_v49, %v6323_v45  ;;  %v4797_v2 = vpop.f32.mrb[23].mxu0  ;;  %v4895_v46 = vmax.f32 %v6375_v3, 0.0 }
 0x211   : > { %v6381_v47 = vadd.f32 %v6380_v43, %v4797_v2  ;;  %v4893_v26 = vmax.f32 %v6377_v37, 0.0 }
 0x212   : > { %v6190_v61 = vpop.f32.mrb[24].mxu1  ;;  %v4896_v0 = vmax.f32 %v6379_v51, 0.0 }
 0x213   : > { %v2782_v1 = vpop.f32.mrb[25].mxu1  ;;  %v4894_v35 = vmax.f32 %v6381_v47, 0.0  ;;  %v6382_v42 = vadd.f32 %v6190_v61, %v8488_v32 }
 0x214   : > { %v6191_v8 = vpop.f32.mrb[26].mxu1  ;;  %v5836_v6 = vpack.c.bf16 %v4896_v0, %v4895_v46  ;;  %v6384_v15 = vadd.f32 %v8488_v32, %v2782_v1 }
 0x215   : > { %v2785_v9 = vpop.f32.mrb[27].mxu1  ;;  %v5831_v25 = vpack.c.bf16 %v4894_v35, %v4893_v26  ;;  %v6326_v33 = vpop.f32.mrb[24].mxu0  ;;  %v6386_v23 = vadd.f32 %v6191_v8, %v8488_v32 }
 0x216   : > { %5868 = vst [vmem:[%s8500_s11 + $0x58] sm:$0xff] %v5836_v6   ;;  %v6383_v54 = vadd.f32 %v6382_v42, %v6326_v33  ;;  %v4810_v53 = vpop.f32.mrb[25].mxu0  ;;  %v6388_v38 = vadd.f32 %v8488_v32, %v2785_v9 }
 0x217   : > { %5867 = vst [vmem:[%s8500_s11 + $0x50] sm:$0xff] %v5831_v25   ;;  %v6385_v62 = vadd.f32 %v6384_v15, %v4810_v53  ;;  %v6327_v7 = vpop.f32.mrb[26].mxu0 }
 0x218   : > { %v6387_v57 = vadd.f32 %v6386_v23, %v6327_v7  ;;  %v4813_v18 = vpop.f32.mrb[27].mxu0  ;;  %v4899_v41 = vmax.f32 %v6383_v54, 0.0 }
 0x219   : > { %v6389_v19 = vadd.f32 %v6388_v38, %v4813_v18  ;;  %v4897_v20 = vmax.f32 %v6385_v62, 0.0 }
 0x21a   : > { %v6194_v34 = vpop.f32.mrb[28].mxu1  ;;  %v4900_v58 = vmax.f32 %v6387_v57, 0.0 }
 0x21b   : > { %v2798_v27 = vpop.f32.mrb[29].mxu1  ;;  %v4898_v59 = vmax.f32 %v6389_v19, 0.0  ;;  %v6390_v40 = vadd.f32 %v6194_v34, %v8488_v32 }
 0x21c   : > { %v6195_v28 = vpop.f32.mrb[30].mxu1  ;;  %v5846_v13 = vpack.c.bf16 %v4900_v58, %v4899_v41  ;;  %v6392_v12 = vadd.f32 %v8488_v32, %v2798_v27 }
 0x21d   : > { %v2801_v39 = vpop.f32.mrb[31].mxu1  ;;  %v5841_v52 = vpack.c.bf16 %v4898_v59, %v4897_v20  ;;  %v6330_v56 = vpop.f32.mrb[28].mxu0  ;;  %v6394_v17 = vadd.f32 %v6195_v28, %v8488_v32 }
 0x21e   : > { %5870 = vst [vmem:[%s8500_s11 + $0x68] sm:$0xff] %v5846_v13   ;;  %v6391_v44 = vadd.f32 %v6390_v40, %v6330_v56  ;;  %v4826_v16 = vpop.f32.mrb[29].mxu0  ;;  %v6396_v63 = vadd.f32 %v8488_v32, %v2801_v39 }
 0x21f   : > { %5869 = vst [vmem:[%s8500_s11 + $0x60] sm:$0xff] %v5841_v52   ;;  %v6393_v30 = vadd.f32 %v6392_v12, %v4826_v16  ;;  %v6331_v55 = vpop.f32.mrb[30].mxu0 }
 0x220   : > { %v6395_v11 = vadd.f32 %v6394_v17, %v6331_v55  ;;  %v4829_v36 = vpop.f32.mrb[31].mxu0  ;;  %v4903_v22 = vmax.f32 %v6391_v44, 0.0 }
 0x221   : > { %v6397_v31 = vadd.f32 %v6396_v63, %v4829_v36  ;;  %v4901_v48 = vmax.f32 %v6393_v30, 0.0 }
 0x222   : > { %v4904_v24 = vmax.f32 %v6395_v11, 0.0 }
 0x223   : > { %v4902_v5 = vmax.f32 %v6397_v31, 0.0 }
 0x224   : > { %v5856_v4 = vpack.c.bf16 %v4904_v24, %v4903_v22 }
 0x225   : > { %v5851_v32 = vpack.c.bf16 %v4902_v5, %v4901_v48 }
 0x226   : > { %5872 = vst [vmem:[%s8500_s11 + $0x78] sm:$0xff] %v5856_v4  }
 0x227   : > { %5871 = vst [vmem:[%s8500_s11 + $0x70] sm:$0xff] %v5851_v32  }
 0x228   : > { %6767 = shalt.err (!%p6764_p5)
}
 0x229   : > { %s6768_s4 = scalar_lea.hbm %s8550_s26, 2048  ;;  %s6772_s7 = scalar_lea.hbm %s8607_s3, 4096 }
 0x22a   : > { %p6769_p6 = scmp.ne.s32.totalorder %s8550_s26, %s6768_s4  ;;  %p6773_p10 = scmp.lt.u32.totalorder %s8550_s26, %s8607_s3 }
 0x22b   : > { %p6774_p11 = scmp.lt.u32.totalorder %s6772_s7, %s6768_s4  ;;  %p6776_p13 = scmp.lt.u32.totalorder %s6768_s4, %s8550_s26 }
 0x22c   : > { %p6770_p7 = pnand %p6769_p6, %p6897_p4 }
 0x22d   : > { %p6775_p12 = por %p6774_p11, %p6773_p10 }
 0x22e   : > { %p6771_p9 = pneg %p6770_p7 }
 0x22f   : > { %p6777_p0 = por %p6776_p13, %p6775_p12 }
 0x231   : > { %p6778_p1 = pnand %p6777_p0, %p6771_p9 }
 0x233   : > { %6781 = shalt.err (!%p6778_p1)
}
 0x234   : > { %s6835_s10 = smov 64   ;;  %s6836_s11 = smov 4  }
 0x235   : > { %6633 = dma.vmem_to_hbm [thread:$0]  (%p6897_p4), %s8552_s19, 2048, %s8550_s26, %s8558_s15, %s6835_s10, %s6835_s10, %s6836_s11  }
 0x236 PF: > { %p6639_p2 = scmp.ge.s32.totalorder %s6832_s17, 2  ;;  %s5096_s18 = sand.u32 1, %s6812_s12  }
 0x237   : > { %s5097_s21 = scalar_lea.sflag [#allocation3], %s5096_s18 }
 0x238   : > { %p6636_p3 = pnand %p6639_p2, %p6904_p8 }
 0x23a   : > { %6807 = dma.done.wait (!%p6636_p3), %s5097_s21, 2048  }
 0x23b   : > { %6809 = vsyncadd (!%p6636_p3), %s5097_s21, 4294965248  ;;  %s16_s17 = sadd.s32 1, %s6832_s17   ;;  %s8616_s12 = smov %s6816_s13 }
 0x23c   : > { %p13_p5 = scmp.ge.s32.totalorder %s16_s17, 4   ;;  %s8617_s13 = smov %s6820_s14 }
 0x23d   : > { %s8618_s14 = smov %s6910_s25  ;;  %s8619_s15 = smov %s6828_s16 }
 0x23e   : > { %s8620_s16 = smov %s8622_s20  ;;  %15 = sbr.rel (!%p13_p5) target bundleno = 4 (0x4), region = 78 }
 0x245   :  { %5102 = vsyncpa [#allocation3], 1 }
 0x246   :  { %5104 = vsyncpa [#allocation3 + $0x1], 1 }

</bundles_post_ra>
